<compile_context>
chip_gen: v7x
topology: tpu7x:2x2x1
jax: 0.10.0
libtpu: 0.0.40
codegen_flags: <defaults>
</compile_context>

<pallas_src>
import functools

import jax
import jax.numpy as jnp
from jax.experimental import pallas as pl
from jax.experimental.pallas import tpu as pltpu


# ----------------------------------------------------------------------------
# Kernel 1: WithBias LayerNorm (over channels) + fused [qkv | gate] 1x1 conv
#           (+ gate bias + SiLU on the gate rows only).
# ----------------------------------------------------------------------------
def _pre_kernel(x_ref, wln_ref, bln_ref, wf_ref, bf_ref, o_ref, *, c, mm_dtype):
    x = x_ref[...]                                        # (C, T) f32
    mu = jnp.mean(x, axis=0, keepdims=True)               # LN over channels
    var = jnp.mean((x - mu) ** 2, axis=0, keepdims=True)  # unbiased=False
    xn = (x - mu) * jax.lax.rsqrt(var + 1e-5)
    xn = xn * wln_ref[...] + bln_ref[...]                 # (C, T) f32

    # One fused bf16 matmul (f32 accumulation): rows [0:3C]=qkv, [3C:4C]=gate.
    z = jnp.dot(wf_ref[...], xn.astype(mm_dtype),
                preferred_element_type=jnp.float32) + bf_ref[...]   # (4C, T)

    c3 = 3 * c
    z_qkv = z[0:c3, :]
    z_g = z[c3:4 * c, :]
    # SiLU only on gate rows; two sublane-aligned lane-dense stores.
    o_ref[0:c3, :] = z_qkv.astype(o_ref.dtype)
    o_ref[c3:4 * c, :] = (z_g * jax.nn.sigmoid(z_g)).astype(o_ref.dtype)


# ----------------------------------------------------------------------------
# Kernel 2 (fused): 3x3 depthwise conv on the qkv rows (roll + boundary masks),
#                   q/k L2-normalize, block-diagonal channel attention, top-k
#                   sparsification, gate multiply, project_out.
# ----------------------------------------------------------------------------
def _dwconv_attn_kernel(x_ref, coord_ref, wdw_ref, bdw_ref, t_ref, m_ref,
                        wpo_ref, bpo_ref, o_ref, *, c, h, w, topk, mm_dtype):
    hw = h * w
    c2, c3 = 2 * c, 3 * c
    NEG = jnp.float32(-3.0e38)

    xall = x_ref[...].astype(jnp.float32)           # (4C, hw)
    xq = xall[0:c3, :]                              # qkv 1x1-conv output
    g = xall[c3:4 * c, :]                           # SiLU(gate(LN(x))) passthrough

    wt = wdw_ref[...]                               # (3C, 9) taps, row-major (dy,dx)
    yy = coord_ref[0:1, :]                          # (1, hw) token row index
    xx = coord_ref[1:2, :]                          # (1, hw) token col index

    # 3x3 depthwise conv (padding=1, groups=3C) on the flat hw axis: XLU rolls
    # + cheap iota-derived boundary masks; center tap needs no mask; gate rows
    # are never rolled.
    acc = xq * wt[:, 4:5]
    k_idx = 0
    for dy in (-1, 0, 1):
        for dx in (-1, 0, 1):
            if dy == 0 and dx == 0:
                k_idx += 1
                continue
            s = dy * w + dx
            shifted = pltpu.roll(xq, shift=(-s) % hw, axis=1)
            ok = ((yy + dy >= 0) & (yy + dy < h) &
                  (xx + dx >= 0) & (xx + dx < w)).astype(jnp.float32)
            acc = acc + (shifted * ok) * wt[:, k_idx:k_idx + 1]
            k_idx += 1
    qkv = acc + bdw_ref[...]                        # (3C, hw)

    # F.normalize(dim=-1) on q/k rows only: x / max(||x||, 1e-12)
    qk = qkv[0:c2, :]
    ssq = jnp.sum(qk * qk, axis=-1, keepdims=True)  # (2C, 1) XLU reduce
    inv = jax.lax.rsqrt(jnp.maximum(ssq, 1e-24))    # EUP rsqrt == 1/max(||x||,1e-12)
    qn = qkv[0:c, :] * inv[0:c, :]
    kn = qkv[c:c2, :] * inv[c:c2, :]
    v = qkv[c2:c3, :]

    # Q @ K^T for all heads at once (block-diagonal head mask); fine for small
    # per-head channel counts.
    # TODO(synk): for large C / many heads, switch to per-head batched
    # dot_general (block-diagonal wastes (heads-1)/heads of the MXU work).
    attn = jax.lax.dot_general(
        qn.astype(mm_dtype), kn.astype(mm_dtype),
        (((1,), (1,)), ((), ())),
        preferred_element_type=jnp.float32) * t_ref[...]      # (C, C)
    mask = m_ref[...] > 0.5
    attn_b = jnp.where(mask, attn, NEG)

    # Per-row top-k via iterative k-th-max threshold (O(k*C^2)); ties at the
    # threshold keep all tied entries (torch.topk keeps exactly k).
    if topk <= 8:                                    # small static k: unroll
        work, thr = attn_b, jnp.full((c, 1), NEG, jnp.float32)
        for _ in range(topk):
            thr = jnp.max(work, axis=-1, keepdims=True)
            work = jnp.where(work >= thr, NEG, work)
    else:                                            # bound vreg live ranges
        def body(_, carry):
            work, _thr = carry
            thr = jnp.max(work, axis=-1, keepdims=True)
            return jnp.where(work >= thr, NEG, work), thr
        _, thr = jax.lax.fori_loop(
            0, topk, body, (attn_b, jnp.full((c, 1), NEG, jnp.float32)))
    sparse = jnp.where(mask & (attn_b >= thr), attn, 0.0)

    out = jnp.dot(sparse.astype(mm_dtype), v.astype(mm_dtype),
                  preferred_element_type=jnp.float32)          # (C, hw)
    y = out * g                                                # gate multiply
    o_ref[...] = (jnp.dot(wpo_ref[...], y.astype(mm_dtype),
                          preferred_element_type=jnp.float32)
                  + bpo_ref[...])                              # project_out


# ----------------------------------------------------------------------------
# Wrapper
# ----------------------------------------------------------------------------
def _vmem_limit_bytes():
    try:
        cap = pltpu.get_tpu_info().vmem_capacity_bytes
    except Exception:
        return 32 * 1024 * 1024
    # ~96 MiB on 128 MiB parts (v5e/v6e), ~48 MiB on v7x's 64 MiB.
    return min(96 * 1024 * 1024, (int(cap) * 3) // 4)


def sparse_attention_forward(x, params, *, num_heads, topk,
                             mm_dtype=jnp.bfloat16):
    # mm_dtype=bf16 (default): bf16 MXU operands + bf16 HBM intermediate, f32
    # accumulation everywhere.  Pass mm_dtype=jnp.float32 for bit-closer parity
    # with the PyTorch reference.
    b, c, h, w = x.shape
    hw = h * w
    c3, c4 = 3 * c, 4 * c
    ch = c // num_heads
    assert c % num_heads == 0
    assert 1 <= topk <= ch

    inter_dtype = jnp.bfloat16 if mm_dtype == jnp.bfloat16 else jnp.float32

    x_f = x.reshape(b, c, hw).astype(jnp.float32)           # free reshape (NCHW)

    # Fused [qkv ; gate] 1x1-conv weight / bias, (out, in) layout.
    w_fused = jnp.concatenate([params["w_qkv"], params["w_g"]],
                              axis=0).astype(mm_dtype)                          # (4C, C)
    b_fused = jnp.concatenate([params["b_qkv"], params["b_g"]],
                              axis=0).astype(jnp.float32)                       # (4C, 1)

    w_dw = params["w_dw"].reshape(c3, 9).astype(jnp.float32)                    # (3C, 9)
    b_dw = params["b_dw"].astype(jnp.float32)                                   # (3C, 1)
    w_po = params["w_po"].astype(mm_dtype)                                      # (C, C)
    b_po = params["b_po"].astype(jnp.float32)                                   # (C, 1)

    # Token (row, col) coordinates for in-kernel boundary masks (tiny DMA).
    yy, xx = jnp.meshgrid(jnp.arange(h, dtype=jnp.int32),
                          jnp.arange(w, dtype=jnp.int32), indexing="ij")
    coords = jnp.stack([yy.reshape(-1), xx.reshape(-1)], axis=0)                # (2, hw)

    # Per-row temperature (head-major rows) and block-diagonal head mask.
    temp_rows = jnp.repeat(params["temperature"].reshape(num_heads), ch
                           ).reshape(c, 1).astype(jnp.float32)                  # (C, 1)
    head_id = jnp.repeat(jnp.arange(num_heads), ch)
    block_mask = (head_id[:, None] == head_id[None, :]).astype(jnp.float32)     # (C, C)

    # Spatial (token) tile for the pre kernel: biggest lane-dense tile.
    if hw <= 2048 or hw % 128 != 0:
        # Small or 128-unaligned spatial extent: one full-width block per batch.
        # TODO(synk): for large non-128-multiple hw, move to a pl.cdiv grid with
        # tail masking instead of a single oversized block.
        thw = hw
    else:
        thw = next(t for t in (2048, 1024, 512, 256, 128) if hw % t == 0)
    n_thw = hw // thw

    vmem_limit = _vmem_limit_bytes()
    cparams_2d = pltpu.CompilerParams(
        dimension_semantics=("parallel", "parallel"),
        vmem_limit_bytes=vmem_limit)
    cparams_1d = pltpu.CompilerParams(
        dimension_semantics=("parallel",),
        vmem_limit_bytes=vmem_limit)

    # --- 1) LayerNorm + fused qkv/gate 1x1 conv (+SiLU on gate rows) ---------
    pre = pl.pallas_call(
        functools.partial(_pre_kernel, c=c, mm_dtype=mm_dtype),
        out_shape=jax.ShapeDtypeStruct((b, c4, hw), inter_dtype),
        grid=(b, n_thw),
        in_specs=[
            pl.BlockSpec((None, c, thw), lambda i, j: (i, 0, j)),
            pl.BlockSpec((c, 1), lambda i, j: (0, 0)),
            pl.BlockSpec((c, 1), lambda i, j: (0, 0)),
            pl.BlockSpec((c4, c), lambda i, j: (0, 0)),
            pl.BlockSpec((c4, 1), lambda i, j: (0, 0)),
        ],
        out_specs=pl.BlockSpec((None, c4, thw), lambda i, j: (i, 0, j)),
        compiler_params=cparams_2d,
    )(x_f, params["w_ln"], params["b_ln"], w_fused, b_fused)

    # --- 2) fused dwconv + attention + top-k + gate + project_out ------------
    # TODO(synk): for v7x at realistic Restormer sizes (C>=192, hw>=16K) add a
    # head-group / hw-tile grid axis with accumulators instead of whole
    # (4C, hw) per-batch blocks.
    y = pl.pallas_call(
        functools.partial(_dwconv_attn_kernel, c=c, h=h, w=w,
                          topk=topk, mm_dtype=mm_dtype),
        out_shape=jax.ShapeDtypeStruct((b, c, hw), jnp.float32),
        grid=(b,),
        in_specs=[
            pl.BlockSpec((None, c4, hw), lambda i: (i, 0, 0)),
            pl.BlockSpec((2, hw), lambda i: (0, 0)),
            pl.BlockSpec((c3, 9), lambda i: (0, 0)),
            pl.BlockSpec((c3, 1), lambda i: (0, 0)),
            pl.BlockSpec((c, 1), lambda i: (0, 0)),
            pl.BlockSpec((c, c), lambda i: (0, 0)),
            pl.BlockSpec((c, c), lambda i: (0, 0)),
            pl.BlockSpec((c, 1), lambda i: (0, 0)),
        ],
        out_specs=pl.BlockSpec((None, c, hw), lambda i: (i, 0, 0)),
        compiler_params=cparams_1d,
    )(pre, coords, w_dw, b_dw, temp_rows, block_mask, w_po, b_po)

    return y.reshape(b, c, h, w)                             # already NCHW


def init_params(key, dim, num_heads):
    ks = jax.random.split(key, 5)
    # 1x1 conv weights stored (out, in); depthwise weight stored (3*dim, 3, 3).
    # qkv/dwconv/project_out biases are zero (module's `bias=False` case); the
    # gate conv keeps its default bias.
    return {
        "w_ln": jnp.ones((dim, 1), jnp.float32),
        "b_ln": jnp.zeros((dim, 1), jnp.float32),
        "w_qkv": 0.1 * jax.random.normal(ks[0], (3 * dim, dim), jnp.float32),
        "b_qkv": jnp.zeros((3 * dim, 1), jnp.float32),
        "w_dw": 0.1 * jax.random.normal(ks[1], (3 * dim, 3, 3), jnp.float32),
        "b_dw": jnp.zeros((3 * dim, 1), jnp.float32),
        "w_g": 0.1 * jax.random.normal(ks[2], (dim, dim), jnp.float32),
        "b_g": 0.1 * jax.random.normal(ks[3], (dim, 1), jnp.float32),
        "w_po": 0.1 * jax.random.normal(ks[4], (dim, dim), jnp.float32),
        "b_po": jnp.zeros((dim, 1), jnp.float32),
        "temperature": jnp.ones((num_heads, 1, 1), jnp.float32),
    }


if __name__ == "__main__":
    # dim=32, 4 heads -> c_head=8; topk runs over the per-head channel axis, so
    # pick topk < c_head so sparsification is actually exercised.
    # TODO(synk): the adaptive topk update driven by current_loss/previous_loss
    # is host-side Python training state; here topk is a static int resolved
    # exactly like int(max(min_topk, min(topk, max_topk))).
    dim, num_heads = 32, 4
    min_topk, max_topk = 2, 4
    topk_state = max_topk                                    # module init: topk=max_topk
    topk = int(max(min_topk, min(topk_state, max_topk)))     # = 4

    b, h, w = 2, 16, 16
    key = jax.random.PRNGKey(0)
    kx, kp = jax.random.split(key)
    x = jax.random.normal(kx, (b, dim, h, w), jnp.float32)   # NCHW input
    params = init_params(kp, dim, num_heads)

    fwd = jax.jit(functools.partial(sparse_attention_forward,
                                    num_heads=num_heads, topk=topk))
    out = jax.block_until_ready(fwd(x, params))
    assert out.shape == (b, dim, h, w)
    assert bool(jnp.all(jnp.isfinite(out)))
    print("KERNEL_OK")
</pallas_src>

<mosaic_0001>
module attributes {stable_mosaic.version = 11 : i64} {
  func.func @_pre_kernel(%arg0: i32, %arg1: i32, %arg2: memref<1x32x256xf32, #tpu.memory_space<vmem>>, %arg3: memref<32x1xf32, #tpu.memory_space<vmem>>, %arg4: memref<32x1xf32, #tpu.memory_space<vmem>>, %arg5: memref<128x32xbf16, #tpu.memory_space<vmem>>, %arg6: memref<128x1xf32, #tpu.memory_space<vmem>>, %arg7: memref<1x128x256xbf16, #tpu.memory_space<vmem>>) attributes {dimension_semantics = [#tpu.dimension_semantics<parallel>, #tpu.dimension_semantics<parallel>], iteration_bounds = array<i64: 2, 1>, scalar_prefetch = 0 : i64, scratch_operands = 0 : i64, tpu.core_type = #tpu.core_type<tc>, window_params = [{transform_indices = @transform_0, window_bounds = array<i64: 1, 32, 256>}, {pipeline_mode = #tpu.pipeline_mode<synchronous>, transform_indices = @transform_1, window_bounds = array<i64: 32, 1>}, {pipeline_mode = #tpu.pipeline_mode<synchronous>, transform_indices = @transform_2, window_bounds = array<i64: 32, 1>}, {pipeline_mode = #tpu.pipeline_mode<synchronous>, transform_indices = @transform_3, window_bounds = array<i64: 128, 32>}, {pipeline_mode = #tpu.pipeline_mode<synchronous>, transform_indices = @transform_4, window_bounds = array<i64: 128, 1>}, {transform_indices = @transform_5, window_bounds = array<i64: 1, 128, 256>}]} {
    %c0 = arith.constant 0 : index
    %c0_0 = arith.constant 0 : index
    %c0_1 = arith.constant 0 : index
    %0 = vector.load %arg2[%c0, %c0_0, %c0_1] : memref<1x32x256xf32, #tpu.memory_space<vmem>>, vector<1x32x256xf32>
    %1 = vector.shape_cast %0 : vector<1x32x256xf32> to vector<32x256xf32>
    %cst = arith.constant dense<0.000000e+00> : vector<256xf32>
    %2 = vector.multi_reduction <add>, %1, %cst [0] : vector<32x256xf32> to vector<256xf32>
    %3 = vector.shape_cast %2 : vector<256xf32> to vector<1x256xf32>
    %cst_2 = arith.constant 3.200000e+01 : f32
    %4 = vector.broadcast %cst_2 : f32 to vector<1x256xf32>
    %5 = arith.divf %3, %4 : vector<1x256xf32>
    %6 = vector.broadcast %5 : vector<1x256xf32> to vector<32x256xf32>
    %7 = arith.subf %1, %6 : vector<32x256xf32>
    %8 = arith.mulf %7, %7 : vector<32x256xf32>
    %cst_3 = arith.constant dense<0.000000e+00> : vector<256xf32>
    %9 = vector.multi_reduction <add>, %8, %cst_3 [0] : vector<32x256xf32> to vector<256xf32>
    %10 = vector.shape_cast %9 : vector<256xf32> to vector<1x256xf32>
    %cst_4 = arith.constant 3.200000e+01 : f32
    %11 = vector.broadcast %cst_4 : f32 to vector<1x256xf32>
    %12 = arith.divf %10, %11 : vector<1x256xf32>
    %13 = vector.broadcast %5 : vector<1x256xf32> to vector<32x256xf32>
    %14 = arith.subf %1, %13 : vector<32x256xf32>
    %cst_5 = arith.constant 9.99999974E-6 : f32
    %15 = vector.broadcast %cst_5 : f32 to vector<1x256xf32>
    %16 = arith.addf %12, %15 : vector<1x256xf32>
    %17 = math.rsqrt %16 : vector<1x256xf32>
    %18 = vector.broadcast %17 : vector<1x256xf32> to vector<32x256xf32>
    %19 = arith.mulf %14, %18 : vector<32x256xf32>
    %c0_6 = arith.constant 0 : index
    %c0_7 = arith.constant 0 : index
    %20 = vector.load %arg3[%c0_6, %c0_7] : memref<32x1xf32, #tpu.memory_space<vmem>>, vector<32x1xf32>
    %21 = vector.broadcast %20 : vector<32x1xf32> to vector<32x256xf32>
    %22 = arith.mulf %19, %21 : vector<32x256xf32>
    %c0_8 = arith.constant 0 : index
    %c0_9 = arith.constant 0 : index
    %23 = vector.load %arg4[%c0_8, %c0_9] : memref<32x1xf32, #tpu.memory_space<vmem>>, vector<32x1xf32>
    %24 = vector.broadcast %23 : vector<32x1xf32> to vector<32x256xf32>
    %25 = arith.addf %22, %24 : vector<32x256xf32>
    %c0_10 = arith.constant 0 : index
    %c0_11 = arith.constant 0 : index
    %26 = vector.load %arg5[%c0_10, %c0_11] : memref<128x32xbf16, #tpu.memory_space<vmem>>, vector<128x32xbf16>
    %27 = arith.truncf %25 : vector<32x256xf32> to vector<32x256xbf16>
    %cst_12 = arith.constant dense<0.000000e+00> : vector<128x256xf32>
    %28 = tpu.matmul %26, %27, %cst_12 {dimension_numbers = #tpu.dot_dimension_numbers<[1], [0], [0], [1], [0, 0, 1, 1], [], []>} : vector<128x32xbf16>, vector<32x256xbf16>, vector<128x256xf32> -> vector<128x256xf32>
    %c0_13 = arith.constant 0 : index
    %c0_14 = arith.constant 0 : index
    %29 = vector.load %arg6[%c0_13, %c0_14] : memref<128x1xf32, #tpu.memory_space<vmem>>, vector<128x1xf32>
    %30 = vector.broadcast %29 : vector<128x1xf32> to vector<128x256xf32>
    %31 = arith.addf %28, %30 : vector<128x256xf32>
    %32 = vector.extract_strided_slice %31 {offsets = [0, 0], sizes = [96, 256], strides = [1, 1]} : vector<128x256xf32> to vector<96x256xf32>
    %33 = vector.extract_strided_slice %31 {offsets = [96, 0], sizes = [32, 256], strides = [1, 1]} : vector<128x256xf32> to vector<32x256xf32>
    %34 = arith.truncf %32 : vector<96x256xf32> to vector<96x256xbf16>
    %c0_15 = arith.constant 0 : index
    %c0_16 = arith.constant 0 : index
    %c0_17 = arith.constant 0 : index
    %35 = vector.load %arg7[%c0_15, %c0_16, %c0_17] : memref<1x128x256xbf16, #tpu.memory_space<vmem>>, vector<1x96x256xbf16>
    %36 = vector.shape_cast %35 : vector<1x96x256xbf16> to vector<96x256xbf16>
    %37 = vector.shape_cast %34 : vector<96x256xbf16> to vector<1x96x256xbf16>
    tpu.vector_store %arg7[%c0_15, %c0_16, %c0_17], %37 {strides = array<i32>} : memref<1x128x256xbf16, #tpu.memory_space<vmem>>, vector<1x96x256xbf16>,
    %38 = arith.negf %33 : vector<32x256xf32>
    %39 = math.exp %38 : vector<32x256xf32>
    %cst_18 = arith.constant 1.000000e+00 : f32
    %40 = vector.broadcast %cst_18 : f32 to vector<32x256xf32>
    %41 = arith.addf %40, %39 : vector<32x256xf32>
    %42 = arith.divf %40, %41 : vector<32x256xf32>
    %43 = arith.mulf %33, %42 : vector<32x256xf32>
    %44 = arith.truncf %43 : vector<32x256xf32> to vector<32x256xbf16>
    %c0_19 = arith.constant 0 : index
    %c96 = arith.constant 96 : index
    %c0_20 = arith.constant 0 : index
    %45 = vector.load %arg7[%c0_19, %c96, %c0_20] : memref<1x128x256xbf16, #tpu.memory_space<vmem>>, vector<1x32x256xbf16>
    %46 = vector.shape_cast %45 : vector<1x32x256xbf16> to vector<32x256xbf16>
    %47 = vector.shape_cast %44 : vector<32x256xbf16> to vector<1x32x256xbf16>
    tpu.vector_store %arg7[%c0_19, %c96, %c0_20], %47 {strides = array<i32>} : memref<1x128x256xbf16, #tpu.memory_space<vmem>>, vector<1x32x256xbf16>,
    return
  }
  func.func @transform_0(%arg0: i32, %arg1: i32) -> (i32, i32, i32) {
    %c0_i32 = arith.constant 0 : i32
    %c0_i32_0 = arith.constant 0 : i32
    return %arg0, %c0_i32, %arg1 : i32, i32, i32
  }
  func.func @transform_1(%arg0: i32, %arg1: i32) -> (i32, i32) {
    %c0_i32 = arith.constant 0 : i32
    %c0_i32_0 = arith.constant 0 : i32
    %c0_i32_1 = arith.constant 0 : i32
    return %c0_i32, %c0_i32_0 : i32, i32
  }
  func.func @transform_2(%arg0: i32, %arg1: i32) -> (i32, i32) {
    %c0_i32 = arith.constant 0 : i32
    %c0_i32_0 = arith.constant 0 : i32
    %c0_i32_1 = arith.constant 0 : i32
    return %c0_i32, %c0_i32_0 : i32, i32
  }
  func.func @transform_3(%arg0: i32, %arg1: i32) -> (i32, i32) {
    %c0_i32 = arith.constant 0 : i32
    %c0_i32_0 = arith.constant 0 : i32
    %c0_i32_1 = arith.constant 0 : i32
    return %c0_i32, %c0_i32_0 : i32, i32
  }
  func.func @transform_4(%arg0: i32, %arg1: i32) -> (i32, i32) {
    %c0_i32 = arith.constant 0 : i32
    %c0_i32_0 = arith.constant 0 : i32
    %c0_i32_1 = arith.constant 0 : i32
    return %c0_i32, %c0_i32_0 : i32, i32
  }
  func.func @transform_5(%arg0: i32, %arg1: i32) -> (i32, i32, i32) {
    %c0_i32 = arith.constant 0 : i32
    %c0_i32_0 = arith.constant 0 : i32
    return %arg0, %c0_i32, %arg1 : i32, i32, i32
  }
}

module attributes {stable_mosaic.version = 11 : i64} {
  func.func @_dwconv_attn_kernel(%arg0: i32, %arg1: memref<1x128x256xbf16, #tpu.memory_space<vmem>>, %arg2: memref<2x256xi32, #tpu.memory_space<vmem>>, %arg3: memref<96x9xf32, #tpu.memory_space<vmem>>, %arg4: memref<96x1xf32, #tpu.memory_space<vmem>>, %arg5: memref<32x1xf32, #tpu.memory_space<vmem>>, %arg6: memref<32x32xf32, #tpu.memory_space<vmem>>, %arg7: memref<32x32xbf16, #tpu.memory_space<vmem>>, %arg8: memref<32x1xf32, #tpu.memory_space<vmem>>, %arg9: memref<1x32x256xf32, #tpu.memory_space<vmem>>) attributes {dimension_semantics = [#tpu.dimension_semantics<parallel>], iteration_bounds = array<i64: 2>, scalar_prefetch = 0 : i64, scratch_operands = 0 : i64, tpu.core_type = #tpu.core_type<tc>, window_params = [{transform_indices = @transform_0, window_bounds = array<i64: 1, 128, 256>}, {pipeline_mode = #tpu.pipeline_mode<synchronous>, transform_indices = @transform_1, window_bounds = array<i64: 2, 256>}, {pipeline_mode = #tpu.pipeline_mode<synchronous>, transform_indices = @transform_2, window_bounds = array<i64: 96, 9>}, {pipeline_mode = #tpu.pipeline_mode<synchronous>, transform_indices = @transform_3, window_bounds = array<i64: 96, 1>}, {pipeline_mode = #tpu.pipeline_mode<synchronous>, transform_indices = @transform_4, window_bounds = array<i64: 32, 1>}, {pipeline_mode = #tpu.pipeline_mode<synchronous>, transform_indices = @transform_5, window_bounds = array<i64: 32, 32>}, {pipeline_mode = #tpu.pipeline_mode<synchronous>, transform_indices = @transform_6, window_bounds = array<i64: 32, 32>}, {pipeline_mode = #tpu.pipeline_mode<synchronous>, transform_indices = @transform_7, window_bounds = array<i64: 32, 1>}, {transform_indices = @transform_8, window_bounds = array<i64: 1, 32, 256>}]} {
    %c0 = arith.constant 0 : index
    %c0_0 = arith.constant 0 : index
    %c0_1 = arith.constant 0 : index
    %0 = vector.load %arg1[%c0, %c0_0, %c0_1] : memref<1x128x256xbf16, #tpu.memory_space<vmem>>, vector<1x128x256xbf16>
    %1 = vector.shape_cast %0 : vector<1x128x256xbf16> to vector<128x256xbf16>
    %2 = arith.extf %1 : vector<128x256xbf16> to vector<128x256xf32>
    %3 = vector.extract_strided_slice %2 {offsets = [0, 0], sizes = [96, 256], strides = [1, 1]} : vector<128x256xf32> to vector<96x256xf32>
    %4 = vector.extract_strided_slice %2 {offsets = [96, 0], sizes = [32, 256], strides = [1, 1]} : vector<128x256xf32> to vector<32x256xf32>
    %c0_2 = arith.constant 0 : index
    %c0_3 = arith.constant 0 : index
    %5 = vector.load %arg3[%c0_2, %c0_3] : memref<96x9xf32, #tpu.memory_space<vmem>>, vector<96x9xf32>
    %c0_4 = arith.constant 0 : index
    %c0_5 = arith.constant 0 : index
    %6 = vector.load %arg2[%c0_4, %c0_5] : memref<2x256xi32, #tpu.memory_space<vmem>>, vector<1x256xi32>
    %c1 = arith.constant 1 : index
    %c0_6 = arith.constant 0 : index
    %7 = vector.load %arg2[%c1, %c0_6] : memref<2x256xi32, #tpu.memory_space<vmem>>, vector<1x256xi32>
    %8 = vector.extract_strided_slice %5 {offsets = [0, 4], sizes = [96, 1], strides = [1, 1]} : vector<96x9xf32> to vector<96x1xf32>
    %9 = vector.broadcast %8 : vector<96x1xf32> to vector<96x256xf32>
    %10 = arith.mulf %3, %9 : vector<96x256xf32>
    %c17_i32 = arith.constant 17 : i32
    %11 = tpu.dynamic_rotate %3 by %c17_i32 dim 1 : vector<96x256xf32>, i32 -> vector<96x256xf32>
    %c-1_i32 = arith.constant -1 : i32
    %12 = vector.broadcast %c-1_i32 : i32 to vector<1x256xi32>
    %13 = arith.addi %6, %12 : vector<1x256xi32>
    %c0_i32 = arith.constant 0 : i32
    %14 = vector.broadcast %c0_i32 : i32 to vector<1x256xi32>
    %15 = arith.cmpi sge, %13, %14 : vector<1x256xi32>
    %c-1_i32_7 = arith.constant -1 : i32
    %16 = vector.broadcast %c-1_i32_7 : i32 to vector<1x256xi32>
    %17 = arith.addi %6, %16 : vector<1x256xi32>
    %c16_i32 = arith.constant 16 : i32
    %18 = vector.broadcast %c16_i32 : i32 to vector<1x256xi32>
    %19 = arith.cmpi slt, %17, %18 : vector<1x256xi32>
    %20 = arith.andi %15, %19 : vector<1x256xi1>
    %c-1_i32_8 = arith.constant -1 : i32
    %21 = vector.broadcast %c-1_i32_8 : i32 to vector<1x256xi32>
    %22 = arith.addi %7, %21 : vector<1x256xi32>
    %c0_i32_9 = arith.constant 0 : i32
    %23 = vector.broadcast %c0_i32_9 : i32 to vector<1x256xi32>
    %24 = arith.cmpi sge, %22, %23 : vector<1x256xi32>
    %25 = arith.andi %20, %24 : vector<1x256xi1>
    %c-1_i32_10 = arith.constant -1 : i32
    %26 = vector.broadcast %c-1_i32_10 : i32 to vector<1x256xi32>
    %27 = arith.addi %7, %26 : vector<1x256xi32>
    %c16_i32_11 = arith.constant 16 : i32
    %28 = vector.broadcast %c16_i32_11 : i32 to vector<1x256xi32>
    %29 = arith.cmpi slt, %27, %28 : vector<1x256xi32>
    %30 = arith.andi %25, %29 : vector<1x256xi1>
    %31 = arith.extui %30 : vector<1x256xi1> to vector<1x256xi32>
    %32 = arith.sitofp %31 : vector<1x256xi32> to vector<1x256xf32>
    %33 = vector.broadcast %32 : vector<1x256xf32> to vector<96x256xf32>
    %34 = arith.mulf %11, %33 : vector<96x256xf32>
    %35 = vector.extract_strided_slice %5 {offsets = [0, 0], sizes = [96, 1], strides = [1, 1]} : vector<96x9xf32> to vector<96x1xf32>
    %36 = vector.broadcast %35 : vector<96x1xf32> to vector<96x256xf32>
    %37 = arith.mulf %34, %36 : vector<96x256xf32>
    %38 = arith.addf %10, %37 : vector<96x256xf32>
    %c16_i32_12 = arith.constant 16 : i32
    %39 = tpu.dynamic_rotate %3 by %c16_i32_12 dim 1 : vector<96x256xf32>, i32 -> vector<96x256xf32>
    %c-1_i32_13 = arith.constant -1 : i32
    %40 = vector.broadcast %c-1_i32_13 : i32 to vector<1x256xi32>
    %41 = arith.addi %6, %40 : vector<1x256xi32>
    %c0_i32_14 = arith.constant 0 : i32
    %42 = vector.broadcast %c0_i32_14 : i32 to vector<1x256xi32>
    %43 = arith.cmpi sge, %41, %42 : vector<1x256xi32>
    %c-1_i32_15 = arith.constant -1 : i32
    %44 = vector.broadcast %c-1_i32_15 : i32 to vector<1x256xi32>
    %45 = arith.addi %6, %44 : vector<1x256xi32>
    %c16_i32_16 = arith.constant 16 : i32
    %46 = vector.broadcast %c16_i32_16 : i32 to vector<1x256xi32>
    %47 = arith.cmpi slt, %45, %46 : vector<1x256xi32>
    %48 = arith.andi %43, %47 : vector<1x256xi1>
    %c0_i32_17 = arith.constant 0 : i32
    %49 = vector.broadcast %c0_i32_17 : i32 to vector<1x256xi32>
    %50 = arith.addi %7, %49 : vector<1x256xi32>
    %c0_i32_18 = arith.constant 0 : i32
    %51 = vector.broadcast %c0_i32_18 : i32 to vector<1x256xi32>
    %52 = arith.cmpi sge, %50, %51 : vector<1x256xi32>
    %53 = arith.andi %48, %52 : vector<1x256xi1>
    %c0_i32_19 = arith.constant 0 : i32
    %54 = vector.broadcast %c0_i32_19 : i32 to vector<1x256xi32>
    %55 = arith.addi %7, %54 : vector<1x256xi32>
    %c16_i32_20 = arith.constant 16 : i32
    %56 = vector.broadcast %c16_i32_20 : i32 to vector<1x256xi32>
    %57 = arith.cmpi slt, %55, %56 : vector<1x256xi32>
    %58 = arith.andi %53, %57 : vector<1x256xi1>
    %59 = arith.extui %58 : vector<1x256xi1> to vector<1x256xi32>
    %60 = arith.sitofp %59 : vector<1x256xi32> to vector<1x256xf32>
    %61 = vector.broadcast %60 : vector<1x256xf32> to vector<96x256xf32>
    %62 = arith.mulf %39, %61 : vector<96x256xf32>
    %63 = vector.extract_strided_slice %5 {offsets = [0, 1], sizes = [96, 1], strides = [1, 1]} : vector<96x9xf32> to vector<96x1xf32>
    %64 = vector.broadcast %63 : vector<96x1xf32> to vector<96x256xf32>
    %65 = arith.mulf %62, %64 : vector<96x256xf32>
    %66 = arith.addf %38, %65 : vector<96x256xf32>
    %c15_i32 = arith.constant 15 : i32
    %67 = tpu.dynamic_rotate %3 by %c15_i32 dim 1 : vector<96x256xf32>, i32 -> vector<96x256xf32>
    %c-1_i32_21 = arith.constant -1 : i32
    %68 = vector.broadcast %c-1_i32_21 : i32 to vector<1x256xi32>
    %69 = arith.addi %6, %68 : vector<1x256xi32>
    %c0_i32_22 = arith.constant 0 : i32
    %70 = vector.broadcast %c0_i32_22 : i32 to vector<1x256xi32>
    %71 = arith.cmpi sge, %69, %70 : vector<1x256xi32>
    %c-1_i32_23 = arith.constant -1 : i32
    %72 = vector.broadcast %c-1_i32_23 : i32 to vector<1x256xi32>
    %73 = arith.addi %6, %72 : vector<1x256xi32>
    %c16_i32_24 = arith.constant 16 : i32
    %74 = vector.broadcast %c16_i32_24 : i32 to vector<1x256xi32>
    %75 = arith.cmpi slt, %73, %74 : vector<1x256xi32>
    %76 = arith.andi %71, %75 : vector<1x256xi1>
    %c1_i32 = arith.constant 1 : i32
    %77 = vector.broadcast %c1_i32 : i32 to vector<1x256xi32>
    %78 = arith.addi %7, %77 : vector<1x256xi32>
    %c0_i32_25 = arith.constant 0 : i32
    %79 = vector.broadcast %c0_i32_25 : i32 to vector<1x256xi32>
    %80 = arith.cmpi sge, %78, %79 : vector<1x256xi32>
    %81 = arith.andi %76, %80 : vector<1x256xi1>
    %c1_i32_26 = arith.constant 1 : i32
    %82 = vector.broadcast %c1_i32_26 : i32 to vector<1x256xi32>
    %83 = arith.addi %7, %82 : vector<1x256xi32>
    %c16_i32_27 = arith.constant 16 : i32
    %84 = vector.broadcast %c16_i32_27 : i32 to vector<1x256xi32>
    %85 = arith.cmpi slt, %83, %84 : vector<1x256xi32>
    %86 = arith.andi %81, %85 : vector<1x256xi1>
    %87 = arith.extui %86 : vector<1x256xi1> to vector<1x256xi32>
    %88 = arith.sitofp %87 : vector<1x256xi32> to vector<1x256xf32>
    %89 = vector.broadcast %88 : vector<1x256xf32> to vector<96x256xf32>
    %90 = arith.mulf %67, %89 : vector<96x256xf32>
    %91 = vector.extract_strided_slice %5 {offsets = [0, 2], sizes = [96, 1], strides = [1, 1]} : vector<96x9xf32> to vector<96x1xf32>
    %92 = vector.broadcast %91 : vector<96x1xf32> to vector<96x256xf32>
    %93 = arith.mulf %90, %92 : vector<96x256xf32>
    %94 = arith.addf %66, %93 : vector<96x256xf32>
    %c1_i32_28 = arith.constant 1 : i32
    %95 = tpu.dynamic_rotate %3 by %c1_i32_28 dim 1 : vector<96x256xf32>, i32 -> vector<96x256xf32>
    %c0_i32_29 = arith.constant 0 : i32
    %96 = vector.broadcast %c0_i32_29 : i32 to vector<1x256xi32>
    %97 = arith.addi %6, %96 : vector<1x256xi32>
    %c0_i32_30 = arith.constant 0 : i32
    %98 = vector.broadcast %c0_i32_30 : i32 to vector<1x256xi32>
    %99 = arith.cmpi sge, %97, %98 : vector<1x256xi32>
    %c0_i32_31 = arith.constant 0 : i32
    %100 = vector.broadcast %c0_i32_31 : i32 to vector<1x256xi32>
    %101 = arith.addi %6, %100 : vector<1x256xi32>
    %c16_i32_32 = arith.constant 16 : i32
    %102 = vector.broadcast %c16_i32_32 : i32 to vector<1x256xi32>
    %103 = arith.cmpi slt, %101, %102 : vector<1x256xi32>
    %104 = arith.andi %99, %103 : vector<1x256xi1>
    %c-1_i32_33 = arith.constant -1 : i32
    %105 = vector.broadcast %c-1_i32_33 : i32 to vector<1x256xi32>
    %106 = arith.addi %7, %105 : vector<1x256xi32>
    %c0_i32_34 = arith.constant 0 : i32
    %107 = vector.broadcast %c0_i32_34 : i32 to vector<1x256xi32>
    %108 = arith.cmpi sge, %106, %107 : vector<1x256xi32>
    %109 = arith.andi %104, %108 : vector<1x256xi1>
    %c-1_i32_35 = arith.constant -1 : i32
    %110 = vector.broadcast %c-1_i32_35 : i32 to vector<1x256xi32>
    %111 = arith.addi %7, %110 : vector<1x256xi32>
    %c16_i32_36 = arith.constant 16 : i32
    %112 = vector.broadcast %c16_i32_36 : i32 to vector<1x256xi32>
    %113 = arith.cmpi slt, %111, %112 : vector<1x256xi32>
    %114 = arith.andi %109, %113 : vector<1x256xi1>
    %115 = arith.extui %114 : vector<1x256xi1> to vector<1x256xi32>
    %116 = arith.sitofp %115 : vector<1x256xi32> to vector<1x256xf32>
    %117 = vector.broadcast %116 : vector<1x256xf32> to vector<96x256xf32>
    %118 = arith.mulf %95, %117 : vector<96x256xf32>
    %119 = vector.extract_strided_slice %5 {offsets = [0, 3], sizes = [96, 1], strides = [1, 1]} : vector<96x9xf32> to vector<96x1xf32>
    %120 = vector.broadcast %119 : vector<96x1xf32> to vector<96x256xf32>
    %121 = arith.mulf %118, %120 : vector<96x256xf32>
    %122 = arith.addf %94, %121 : vector<96x256xf32>
    %c255_i32 = arith.constant 255 : i32
    %123 = tpu.dynamic_rotate %3 by %c255_i32 dim 1 : vector<96x256xf32>, i32 -> vector<96x256xf32>
    %c0_i32_37 = arith.constant 0 : i32
    %124 = vector.broadcast %c0_i32_37 : i32 to vector<1x256xi32>
    %125 = arith.addi %6, %124 : vector<1x256xi32>
    %c0_i32_38 = arith.constant 0 : i32
    %126 = vector.broadcast %c0_i32_38 : i32 to vector<1x256xi32>
    %127 = arith.cmpi sge, %125, %126 : vector<1x256xi32>
    %c0_i32_39 = arith.constant 0 : i32
    %128 = vector.broadcast %c0_i32_39 : i32 to vector<1x256xi32>
    %129 = arith.addi %6, %128 : vector<1x256xi32>
    %c16_i32_40 = arith.constant 16 : i32
    %130 = vector.broadcast %c16_i32_40 : i32 to vector<1x256xi32>
    %131 = arith.cmpi slt, %129, %130 : vector<1x256xi32>
    %132 = arith.andi %127, %131 : vector<1x256xi1>
    %c1_i32_41 = arith.constant 1 : i32
    %133 = vector.broadcast %c1_i32_41 : i32 to vector<1x256xi32>
    %134 = arith.addi %7, %133 : vector<1x256xi32>
    %c0_i32_42 = arith.constant 0 : i32
    %135 = vector.broadcast %c0_i32_42 : i32 to vector<1x256xi32>
    %136 = arith.cmpi sge, %134, %135 : vector<1x256xi32>
    %137 = arith.andi %132, %136 : vector<1x256xi1>
    %c1_i32_43 = arith.constant 1 : i32
    %138 = vector.broadcast %c1_i32_43 : i32 to vector<1x256xi32>
    %139 = arith.addi %7, %138 : vector<1x256xi32>
    %c16_i32_44 = arith.constant 16 : i32
    %140 = vector.broadcast %c16_i32_44 : i32 to vector<1x256xi32>
    %141 = arith.cmpi slt, %139, %140 : vector<1x256xi32>
    %142 = arith.andi %137, %141 : vector<1x256xi1>
    %143 = arith.extui %142 : vector<1x256xi1> to vector<1x256xi32>
    %144 = arith.sitofp %143 : vector<1x256xi32> to vector<1x256xf32>
    %145 = vector.broadcast %144 : vector<1x256xf32> to vector<96x256xf32>
    %146 = arith.mulf %123, %145 : vector<96x256xf32>
    %147 = vector.extract_strided_slice %5 {offsets = [0, 5], sizes = [96, 1], strides = [1, 1]} : vector<96x9xf32> to vector<96x1xf32>
    %148 = vector.broadcast %147 : vector<96x1xf32> to vector<96x256xf32>
    %149 = arith.mulf %146, %148 : vector<96x256xf32>
    %150 = arith.addf %122, %149 : vector<96x256xf32>
    %c241_i32 = arith.constant 241 : i32
    %151 = tpu.dynamic_rotate %3 by %c241_i32 dim 1 : vector<96x256xf32>, i32 -> vector<96x256xf32>
    %c1_i32_45 = arith.constant 1 : i32
    %152 = vector.broadcast %c1_i32_45 : i32 to vector<1x256xi32>
    %153 = arith.addi %6, %152 : vector<1x256xi32>
    %c0_i32_46 = arith.constant 0 : i32
    %154 = vector.broadcast %c0_i32_46 : i32 to vector<1x256xi32>
    %155 = arith.cmpi sge, %153, %154 : vector<1x256xi32>
    %c1_i32_47 = arith.constant 1 : i32
    %156 = vector.broadcast %c1_i32_47 : i32 to vector<1x256xi32>
    %157 = arith.addi %6, %156 : vector<1x256xi32>
    %c16_i32_48 = arith.constant 16 : i32
    %158 = vector.broadcast %c16_i32_48 : i32 to vector<1x256xi32>
    %159 = arith.cmpi slt, %157, %158 : vector<1x256xi32>
    %160 = arith.andi %155, %159 : vector<1x256xi1>
    %c-1_i32_49 = arith.constant -1 : i32
    %161 = vector.broadcast %c-1_i32_49 : i32 to vector<1x256xi32>
    %162 = arith.addi %7, %161 : vector<1x256xi32>
    %c0_i32_50 = arith.constant 0 : i32
    %163 = vector.broadcast %c0_i32_50 : i32 to vector<1x256xi32>
    %164 = arith.cmpi sge, %162, %163 : vector<1x256xi32>
    %165 = arith.andi %160, %164 : vector<1x256xi1>
    %c-1_i32_51 = arith.constant -1 : i32
    %166 = vector.broadcast %c-1_i32_51 : i32 to vector<1x256xi32>
    %167 = arith.addi %7, %166 : vector<1x256xi32>
    %c16_i32_52 = arith.constant 16 : i32
    %168 = vector.broadcast %c16_i32_52 : i32 to vector<1x256xi32>
    %169 = arith.cmpi slt, %167, %168 : vector<1x256xi32>
    %170 = arith.andi %165, %169 : vector<1x256xi1>
    %171 = arith.extui %170 : vector<1x256xi1> to vector<1x256xi32>
    %172 = arith.sitofp %171 : vector<1x256xi32> to vector<1x256xf32>
    %173 = vector.broadcast %172 : vector<1x256xf32> to vector<96x256xf32>
    %174 = arith.mulf %151, %173 : vector<96x256xf32>
    %175 = vector.extract_strided_slice %5 {offsets = [0, 6], sizes = [96, 1], strides = [1, 1]} : vector<96x9xf32> to vector<96x1xf32>
    %176 = vector.broadcast %175 : vector<96x1xf32> to vector<96x256xf32>
    %177 = arith.mulf %174, %176 : vector<96x256xf32>
    %178 = arith.addf %150, %177 : vector<96x256xf32>
    %c240_i32 = arith.constant 240 : i32
    %179 = tpu.dynamic_rotate %3 by %c240_i32 dim 1 : vector<96x256xf32>, i32 -> vector<96x256xf32>
    %c1_i32_53 = arith.constant 1 : i32
    %180 = vector.broadcast %c1_i32_53 : i32 to vector<1x256xi32>
    %181 = arith.addi %6, %180 : vector<1x256xi32>
    %c0_i32_54 = arith.constant 0 : i32
    %182 = vector.broadcast %c0_i32_54 : i32 to vector<1x256xi32>
    %183 = arith.cmpi sge, %181, %182 : vector<1x256xi32>
    %c1_i32_55 = arith.constant 1 : i32
    %184 = vector.broadcast %c1_i32_55 : i32 to vector<1x256xi32>
    %185 = arith.addi %6, %184 : vector<1x256xi32>
    %c16_i32_56 = arith.constant 16 : i32
    %186 = vector.broadcast %c16_i32_56 : i32 to vector<1x256xi32>
    %187 = arith.cmpi slt, %185, %186 : vector<1x256xi32>
    %188 = arith.andi %183, %187 : vector<1x256xi1>
    %c0_i32_57 = arith.constant 0 : i32
    %189 = vector.broadcast %c0_i32_57 : i32 to vector<1x256xi32>
    %190 = arith.addi %7, %189 : vector<1x256xi32>
    %c0_i32_58 = arith.constant 0 : i32
    %191 = vector.broadcast %c0_i32_58 : i32 to vector<1x256xi32>
    %192 = arith.cmpi sge, %190, %191 : vector<1x256xi32>
    %193 = arith.andi %188, %192 : vector<1x256xi1>
    %c0_i32_59 = arith.constant 0 : i32
    %194 = vector.broadcast %c0_i32_59 : i32 to vector<1x256xi32>
    %195 = arith.addi %7, %194 : vector<1x256xi32>
    %c16_i32_60 = arith.constant 16 : i32
    %196 = vector.broadcast %c16_i32_60 : i32 to vector<1x256xi32>
    %197 = arith.cmpi slt, %195, %196 : vector<1x256xi32>
    %198 = arith.andi %193, %197 : vector<1x256xi1>
    %199 = arith.extui %198 : vector<1x256xi1> to vector<1x256xi32>
    %200 = arith.sitofp %199 : vector<1x256xi32> to vector<1x256xf32>
    %201 = vector.broadcast %200 : vector<1x256xf32> to vector<96x256xf32>
    %202 = arith.mulf %179, %201 : vector<96x256xf32>
    %203 = vector.extract_strided_slice %5 {offsets = [0, 7], sizes = [96, 1], strides = [1, 1]} : vector<96x9xf32> to vector<96x1xf32>
    %204 = vector.broadcast %203 : vector<96x1xf32> to vector<96x256xf32>
    %205 = arith.mulf %202, %204 : vector<96x256xf32>
    %206 = arith.addf %178, %205 : vector<96x256xf32>
    %c239_i32 = arith.constant 239 : i32
    %207 = tpu.dynamic_rotate %3 by %c239_i32 dim 1 : vector<96x256xf32>, i32 -> vector<96x256xf32>
    %c1_i32_61 = arith.constant 1 : i32
    %208 = vector.broadcast %c1_i32_61 : i32 to vector<1x256xi32>
    %209 = arith.addi %6, %208 : vector<1x256xi32>
    %c0_i32_62 = arith.constant 0 : i32
    %210 = vector.broadcast %c0_i32_62 : i32 to vector<1x256xi32>
    %211 = arith.cmpi sge, %209, %210 : vector<1x256xi32>
    %c1_i32_63 = arith.constant 1 : i32
    %212 = vector.broadcast %c1_i32_63 : i32 to vector<1x256xi32>
    %213 = arith.addi %6, %212 : vector<1x256xi32>
    %c16_i32_64 = arith.constant 16 : i32
    %214 = vector.broadcast %c16_i32_64 : i32 to vector<1x256xi32>
    %215 = arith.cmpi slt, %213, %214 : vector<1x256xi32>
    %216 = arith.andi %211, %215 : vector<1x256xi1>
    %c1_i32_65 = arith.constant 1 : i32
    %217 = vector.broadcast %c1_i32_65 : i32 to vector<1x256xi32>
    %218 = arith.addi %7, %217 : vector<1x256xi32>
    %c0_i32_66 = arith.constant 0 : i32
    %219 = vector.broadcast %c0_i32_66 : i32 to vector<1x256xi32>
    %220 = arith.cmpi sge, %218, %219 : vector<1x256xi32>
    %221 = arith.andi %216, %220 : vector<1x256xi1>
    %c1_i32_67 = arith.constant 1 : i32
    %222 = vector.broadcast %c1_i32_67 : i32 to vector<1x256xi32>
    %223 = arith.addi %7, %222 : vector<1x256xi32>
    %c16_i32_68 = arith.constant 16 : i32
    %224 = vector.broadcast %c16_i32_68 : i32 to vector<1x256xi32>
    %225 = arith.cmpi slt, %223, %224 : vector<1x256xi32>
    %226 = arith.andi %221, %225 : vector<1x256xi1>
    %227 = arith.extui %226 : vector<1x256xi1> to vector<1x256xi32>
    %228 = arith.sitofp %227 : vector<1x256xi32> to vector<1x256xf32>
    %229 = vector.broadcast %228 : vector<1x256xf32> to vector<96x256xf32>
    %230 = arith.mulf %207, %229 : vector<96x256xf32>
    %231 = vector.extract_strided_slice %5 {offsets = [0, 8], sizes = [96, 1], strides = [1, 1]} : vector<96x9xf32> to vector<96x1xf32>
    %232 = vector.broadcast %231 : vector<96x1xf32> to vector<96x256xf32>
    %233 = arith.mulf %230, %232 : vector<96x256xf32>
    %234 = arith.addf %206, %233 : vector<96x256xf32>
    %c0_69 = arith.constant 0 : index
    %c0_70 = arith.constant 0 : index
    %235 = vector.load %arg4[%c0_69, %c0_70] : memref<96x1xf32, #tpu.memory_space<vmem>>, vector<96x1xf32>
    %236 = vector.broadcast %235 : vector<96x1xf32> to vector<96x256xf32>
    %237 = arith.addf %234, %236 : vector<96x256xf32>
    %238 = vector.extract_strided_slice %237 {offsets = [0, 0], sizes = [64, 256], strides = [1, 1]} : vector<96x256xf32> to vector<64x256xf32>
    %239 = arith.mulf %238, %238 : vector<64x256xf32>
    %cst = arith.constant dense<0.000000e+00> : vector<64xf32>
    %240 = vector.multi_reduction <add>, %239, %cst [1] : vector<64x256xf32> to vector<64xf32>
    %241 = vector.shape_cast %240 : vector<64xf32> to vector<64x1xf32>
    %cst_71 = arith.constant 1.000000e-24 : f32
    %242 = vector.broadcast %cst_71 : f32 to vector<64x1xf32>
    %243 = arith.maximumf %241, %242 : vector<64x1xf32>
    %244 = math.rsqrt %243 : vector<64x1xf32>
    %245 = vector.extract_strided_slice %237 {offsets = [0, 0], sizes = [32, 256], strides = [1, 1]} : vector<96x256xf32> to vector<32x256xf32>
    %246 = vector.extract_strided_slice %244 {offsets = [0, 0], sizes = [32, 1], strides = [1, 1]} : vector<64x1xf32> to vector<32x1xf32>
    %247 = vector.broadcast %246 : vector<32x1xf32> to vector<32x256xf32>
    %248 = arith.mulf %245, %247 : vector<32x256xf32>
    %249 = vector.extract_strided_slice %237 {offsets = [32, 0], sizes = [32, 256], strides = [1, 1]} : vector<96x256xf32> to vector<32x256xf32>
    %250 = vector.extract_strided_slice %244 {offsets = [32, 0], sizes = [32, 1], strides = [1, 1]} : vector<64x1xf32> to vector<32x1xf32>
    %251 = vector.broadcast %250 : vector<32x1xf32> to vector<32x256xf32>
    %252 = arith.mulf %249, %251 : vector<32x256xf32>
    %253 = vector.extract_strided_slice %237 {offsets = [64, 0], sizes = [32, 256], strides = [1, 1]} : vector<96x256xf32> to vector<32x256xf32>
    %254 = arith.truncf %248 : vector<32x256xf32> to vector<32x256xbf16>
    %255 = arith.truncf %252 : vector<32x256xf32> to vector<32x256xbf16>
    %cst_72 = arith.constant dense<0.000000e+00> : vector<32x32xf32>
    %256 = tpu.matmul %254, %255, %cst_72 {dimension_numbers = #tpu.dot_dimension_numbers<[1], [1], [0], [0], [0, 0, 1, 0], [], []>} : vector<32x256xbf16>, vector<32x256xbf16>, vector<32x32xf32> -> vector<32x32xf32>
    %c0_73 = arith.constant 0 : index
    %c0_74 = arith.constant 0 : index
    %257 = vector.load %arg5[%c0_73, %c0_74] : memref<32x1xf32, #tpu.memory_space<vmem>>, vector<32x1xf32>
    %258 = vector.broadcast %257 : vector<32x1xf32> to vector<32x32xf32>
    %259 = arith.mulf %256, %258 : vector<32x32xf32>
    %c0_75 = arith.constant 0 : index
    %c0_76 = arith.constant 0 : index
    %260 = vector.load %arg6[%c0_75, %c0_76] : memref<32x32xf32, #tpu.memory_space<vmem>>, vector<32x32xf32>
    %cst_77 = arith.constant 5.000000e-01 : f32
    %261 = vector.broadcast %cst_77 : f32 to vector<32x32xf32>
    %262 = arith.cmpf ogt, %260, %261 : vector<32x32xf32>
    %cst_78 = arith.constant -3.000000e+38 : f32
    %263 = vector.broadcast %cst_78 : f32 to vector<32x32xf32>
    %264 = arith.select %262, %259, %263 : vector<32x32xi1>, vector<32x32xf32>
    %cst_79 = arith.constant dense<0xFF800000> : vector<32xf32>
    %265 = vector.multi_reduction <maximumf>, %264, %cst_79 [1] : vector<32x32xf32> to vector<32xf32>
    %266 = vector.shape_cast %265 : vector<32xf32> to vector<32x1xf32>
    %267 = vector.broadcast %266 : vector<32x1xf32> to vector<32x32xf32>
    %268 = arith.cmpf oge, %264, %267 : vector<32x32xf32>
    %cst_80 = arith.constant -3.000000e+38 : f32
    %269 = vector.broadcast %cst_80 : f32 to vector<32x32xf32>
    %270 = arith.select %268, %269, %264 : vector<32x32xi1>, vector<32x32xf32>
    %cst_81 = arith.constant dense<0xFF800000> : vector<32xf32>
    %271 = vector.multi_reduction <maximumf>, %270, %cst_81 [1] : vector<32x32xf32> to vector<32xf32>
    %272 = vector.shape_cast %271 : vector<32xf32> to vector<32x1xf32>
    %273 = vector.broadcast %272 : vector<32x1xf32> to vector<32x32xf32>
    %274 = arith.cmpf oge, %270, %273 : vector<32x32xf32>
    %cst_82 = arith.constant -3.000000e+38 : f32
    %275 = vector.broadcast %cst_82 : f32 to vector<32x32xf32>
    %276 = arith.select %274, %275, %270 : vector<32x32xi1>, vector<32x32xf32>
    %cst_83 = arith.constant dense<0xFF800000> : vector<32xf32>
    %277 = vector.multi_reduction <maximumf>, %276, %cst_83 [1] : vector<32x32xf32> to vector<32xf32>
    %278 = vector.shape_cast %277 : vector<32xf32> to vector<32x1xf32>
    %279 = vector.broadcast %278 : vector<32x1xf32> to vector<32x32xf32>
    %280 = arith.cmpf oge, %276, %279 : vector<32x32xf32>
    %cst_84 = arith.constant -3.000000e+38 : f32
    %281 = vector.broadcast %cst_84 : f32 to vector<32x32xf32>
    %282 = arith.select %280, %281, %276 : vector<32x32xi1>, vector<32x32xf32>
    %cst_85 = arith.constant dense<0xFF800000> : vector<32xf32>
    %283 = vector.multi_reduction <maximumf>, %282, %cst_85 [1] : vector<32x32xf32> to vector<32xf32>
    %284 = vector.shape_cast %283 : vector<32xf32> to vector<32x1xf32>
    %285 = vector.broadcast %284 : vector<32x1xf32> to vector<32x32xf32>
    %286 = arith.cmpf oge, %264, %285 : vector<32x32xf32>
    %287 = arith.andi %262, %286 : vector<32x32xi1>
    %cst_86 = arith.constant 0.000000e+00 : f32
    %288 = vector.broadcast %cst_86 : f32 to vector<32x32xf32>
    %289 = arith.select %287, %259, %288 : vector<32x32xi1>, vector<32x32xf32>
    %290 = arith.truncf %289 : vector<32x32xf32> to vector<32x32xbf16>
    %291 = arith.truncf %253 : vector<32x256xf32> to vector<32x256xbf16>
    %cst_87 = arith.constant dense<0.000000e+00> : vector<32x256xf32>
    %292 = tpu.matmul %290, %291, %cst_87 {dimension_numbers = #tpu.dot_dimension_numbers<[1], [0], [0], [1], [0, 0, 1, 1], [], []>} : vector<32x32xbf16>, vector<32x256xbf16>, vector<32x256xf32> -> vector<32x256xf32>
    %293 = arith.mulf %292, %4 : vector<32x256xf32>
    %c0_88 = arith.constant 0 : index
    %c0_89 = arith.constant 0 : index
    %294 = vector.load %arg7[%c0_88, %c0_89] : memref<32x32xbf16, #tpu.memory_space<vmem>>, vector<32x32xbf16>
    %295 = arith.truncf %293 : vector<32x256xf32> to vector<32x256xbf16>
    %cst_90 = arith.constant dense<0.000000e+00> : vector<32x256xf32>
    %296 = tpu.matmul %294, %295, %cst_90 {dimension_numbers = #tpu.dot_dimension_numbers<[1], [0], [0], [1], [0, 0, 1, 1], [], []>} : vector<32x32xbf16>, vector<32x256xbf16>, vector<32x256xf32> -> vector<32x256xf32>
    %c0_91 = arith.constant 0 : index
    %c0_92 = arith.constant 0 : index
    %297 = vector.load %arg8[%c0_91, %c0_92] : memref<32x1xf32, #tpu.memory_space<vmem>>, vector<32x1xf32>
    %298 = vector.broadcast %297 : vector<32x1xf32> to vector<32x256xf32>
    %299 = arith.addf %296, %298 : vector<32x256xf32>
    %c0_93 = arith.constant 0 : index
    %c0_94 = arith.constant 0 : index
    %c0_95 = arith.constant 0 : index
    %300 = vector.load %arg9[%c0_93, %c0_94, %c0_95] : memref<1x32x256xf32, #tpu.memory_space<vmem>>, vector<1x32x256xf32>
    %301 = vector.shape_cast %300 : vector<1x32x256xf32> to vector<32x256xf32>
    %302 = vector.shape_cast %299 : vector<32x256xf32> to vector<1x32x256xf32>
    tpu.vector_store %arg9[%c0_93, %c0_94, %c0_95], %302 {strides = array<i32>} : memref<1x32x256xf32, #tpu.memory_space<vmem>>, vector<1x32x256xf32>,
    return
  }
  func.func @transform_0(%arg0: i32) -> (i32, i32, i32) {
    %c0_i32 = arith.constant 0 : i32
    %c0_i32_0 = arith.constant 0 : i32
    %c0_i32_1 = arith.constant 0 : i32
    return %arg0, %c0_i32, %c0_i32_0 : i32, i32, i32
  }
  func.func @transform_1(%arg0: i32) -> (i32, i32) {
    %c0_i32 = arith.constant 0 : i32
    %c0_i32_0 = arith.constant 0 : i32
    %c0_i32_1 = arith.constant 0 : i32
    return %c0_i32, %c0_i32_0 : i32, i32
  }
  func.func @transform_2(%arg0: i32) -> (i32, i32) {
    %c0_i32 = arith.constant 0 : i32
    %c0_i32_0 = arith.constant 0 : i32
    %c0_i32_1 = arith.constant 0 : i32
    return %c0_i32, %c0_i32_0 : i32, i32
  }
  func.func @transform_3(%arg0: i32) -> (i32, i32) {
    %c0_i32 = arith.constant 0 : i32
    %c0_i32_0 = arith.constant 0 : i32
    %c0_i32_1 = arith.constant 0 : i32
    return %c0_i32, %c0_i32_0 : i32, i32
  }
  func.func @transform_4(%arg0: i32) -> (i32, i32) {
    %c0_i32 = arith.constant 0 : i32
    %c0_i32_0 = arith.constant 0 : i32
    %c0_i32_1 = arith.constant 0 : i32
    return %c0_i32, %c0_i32_0 : i32, i32
  }
  func.func @transform_5(%arg0: i32) -> (i32, i32) {
    %c0_i32 = arith.constant 0 : i32
    %c0_i32_0 = arith.constant 0 : i32
    %c0_i32_1 = arith.constant 0 : i32
    return %c0_i32, %c0_i32_0 : i32, i32
  }
  func.func @transform_6(%arg0: i32) -> (i32, i32) {
    %c0_i32 = arith.constant 0 : i32
    %c0_i32_0 = arith.constant 0 : i32
    %c0_i32_1 = arith.constant 0 : i32
    return %c0_i32, %c0_i32_0 : i32, i32
  }
  func.func @transform_7(%arg0: i32) -> (i32, i32) {
    %c0_i32 = arith.constant 0 : i32
    %c0_i32_0 = arith.constant 0 : i32
    %c0_i32_1 = arith.constant 0 : i32
    return %c0_i32, %c0_i32_0 : i32, i32
  }
  func.func @transform_8(%arg0: i32) -> (i32, i32, i32) {
    %c0_i32 = arith.constant 0 : i32
    %c0_i32_0 = arith.constant 0 : i32
    %c0_i32_1 = arith.constant 0 : i32
    return %arg0, %c0_i32, %c0_i32_0 : i32, i32, i32
  }
}

</mosaic_0001>

<bundles_post_ra>
// kernel: eq.8
= control target key start
LH: loop header
LB: loop body
LE: loop exit
PB: predicated region body
PF: predicated region fallthrough
CT: control target
= control target key end

     0   :  { %vm7_vm0 = vcmask 64512   ;;  %s37_s8 = smov 8   ;;  %s38_s9 = smov 16   ;;  %vm13_vm1 = vcmask 261312   ;;  %vm19_vm2 = vcmask 195712   ;;  %vm25_vm3 = vcmask 130112   ;;  %s55_s0 = inlined_call_operand.vmem [shape: s32[4,8], index: 0, kind: input, shape index: {}]   ;;  %s56_s1 = inlined_call_operand.vmem [shape: s32[32], index: 1, kind: output, shape index: {}]  }
   0x1   :  { %v4_v0 = vld [vmem:[%s55_s0] sm:$0xf]  ;;  %s36_s0 = smov 24  }
   0x2   :  { %5 = vst [vmem:[#allocation1] sm:$0xf] %v4_v0 }
   0x9   :  { %v10_v1 = vld [vmem:[#allocation1 + $0x3] sm:$0x1]   ;;  %v22_v2 = vld [vmem:[#allocation1 + $0x1] sm:$0x1]   ;;  %v6_v3 = vld [vmem:[#allocation1] sm:$0x1]  }
   0xa   :  { %11 = vrot.lane.b32.xlu0 %v10_v1, %s36_s0  ;;  %23 = vrot.lane.b32.xlu1 %v22_v2, %s37_s8  ;;  %v16_v4 = vld [vmem:[#allocation1 + $0x2] sm:$0x1]   ;;  %8 = vst.msk [vmem:[#allocation0] sm:$0x1] %vm7_vm0, %v6_v3  }
   0xe   :  { %17 = vrot.lane.b32.xlu0 %v16_v4, %s38_s9 }
  0x7c   :  { %v12_v5 = vpop.permute.xlu0 %11   ;;  %v24_v6 = vpop.permute.xlu1 %23  }
  0x7d   :  { %14 = vst.msk [vmem:[#allocation0] sm:$0x1] %vm13_vm1, %v12_v5  }
  0x80   :  { %v18_v7 = vpop.permute.xlu0 %17  }
  0x81   :  { %20 = vst.msk [vmem:[#allocation0] sm:$0x1] %vm19_vm2, %v18_v7  }
  0x82   :  { %26 = vst.msk [vmem:[#allocation0] sm:$0x1] %vm25_vm3, %v24_v6  }
  0x89   :  { %v30_v8 = vld [vmem:[#allocation0] sm:$0x1] }
  0x8a   :  { %32 = vst [vmem:[%s56_s1] sm:$0x1] %v30_v8 }

// kernel: sparse_attention_forward.2
= control target key start
LH: loop header
LB: loop body
LE: loop exit
PB: predicated region body
PF: predicated region fallthrough
CT: control target
= control target key end

     0   :  { %s1154_s18 = smov 0   ;;  %s1156_s19 = smov 0   ;;  %s1375_s0 = inlined_call_operand.vmem [shape: f32[2,32,256], index: 0, kind: input, shape index: {}]   ;;  %s1376_s1 = inlined_call_operand.vmem [shape: f32[32,1], index: 1, kind: input, shape index: {}]   ;;  %s1377_s2 = inlined_call_operand.vmem [shape: f32[32,1], index: 2, kind: input, shape index: {}]   ;;  %s1378_s3 = inlined_call_operand.vmem [shape: bf16[128,32], index: 3, kind: input, shape index: {}]   ;;  %s1379_s4 = inlined_call_operand.vmem [shape: f32[128,1], index: 4, kind: input, shape index: {}]   ;;  %s1380_s5 = inlined_call_operand.vmem [shape: bf16[2,128,256], index: 5, kind: output, shape index: {}]  }
   0x1   :  { %s1158_s20 = smov 0  }
   0x2 LB: > { %s27_s21 = sadd.s32 1, %s1117_s19  ;;  %p959_p0 = scmp.ge.s32.totalorder %s1121_s20, 1  ;;  %s1121_s20 = sphi %s1158_s20, %s15_s20   ;;  %s1117_s19 = sphi %s1156_s19, %s1382_s19   ;;  %s1113_s18 = sphi %s1154_s18, %s1381_s18  }
   0x3   : > { %p29_p1 = scmp.ge.s32.totalorder %s27_s21, 2  ;;  %p208_p2 = scmp.lt.s32.totalorder %s1121_s20, 3 }
   0x5   : > { %s1384_s21 = smov (%p29_p1, %s27_s21), 0  ;;  %p209_p3 = pnand %p959_p0, %p208_p2 }
   0x6   : > { %v374_v0 = vld [vmem:[%s1377_s2] sm:$0xff] (!%p209_p3)  ;;  %v1123_v2 = vmov (!%p209_p3), 0   ;;  %p245_p4 = scmp.lt.s32.totalorder (!%p209_p3), %s1113_s18, 1  ;;  %v375_v3 = vld [vmem:[%s1377_s2 + $0x8] sm:$0xff] (!%p209_p3)  ;;  %v345_v5 = vld [vmem:[%s1376_s1 + $0x18] sm:$0xff] (!%p209_p3)  ;;  %vm562_vm0 = vcmask (!%p209_p3), 261120  }
   0x7   : > { %212 = sbr.rel (%p209_p3) target bundleno = 428 (0x1ac), region = 40  ;;  %v342_v1 = vld [vmem:[%s1376_s1] sm:$0xff] (!%p209_p3)  ;;  %1054 = vset.pattern.permute.xlu1 (!%p209_p3), %v1123_v2  ;;  %1053 = vset.pattern.permute.xlu0 (!%p209_p3), %v1123_v2  ;;  %v343_v4 = vld [vmem:[%s1376_s1 + $0x8] sm:$0xff] (!%p209_p3)  ;;  %v344_v6 = vld [vmem:[%s1376_s1 + $0x10] sm:$0xff] (!%p209_p3) }
   0x8   : > { %380 = vperm.xlu1 (!%p209_p3), %1054, %v374_v0   ;;  %348 = vperm.xlu0 (!%p209_p3), %1053, %v342_v1   ;;  %v377_v7 = vld [vmem:[%s1377_s2 + $0x18] sm:$0xff] (!%p209_p3)  ;;  %v376_v8 = vld [vmem:[%s1377_s2 + $0x10] sm:$0xff] (!%p209_p3)  ;;  %v439_v9 = vld [vmem:[%s1379_s4 + $0x68] sm:$0xff] (!%p209_p3) }
   0x9   : > { %619 = vmatprep.mubr.bf16.mxu0 (!%p209_p3), %v1123_v2  ;;  %659 = vmatprep.mubr.bf16.mxu1 (!%p209_p3), %v1123_v2  ;;  %v438_v10 = vld [vmem:[%s1379_s4 + $0x60] sm:$0xff] (!%p209_p3)  ;;  %v441_v11 = vld [vmem:[%s1379_s4 + $0x78] sm:$0xff] (!%p209_p3)  ;;  %v440_v12 = vld [vmem:[%s1379_s4 + $0x70] sm:$0xff] (!%p209_p3) }
   0xa   : > { %v427_v17 = vld [vmem:[%s1379_s4 + $0x8] sm:$0xff] (!%p209_p3)  ;;  %v426_v18 = vld [vmem:[%s1379_s4] sm:$0xff] (!%p209_p3)  ;;  %v429_v23 = vld [vmem:[%s1379_s4 + $0x18] sm:$0xff] (!%p209_p3) }
   0xb   : > { %v428_v24 = vld [vmem:[%s1379_s4 + $0x10] sm:$0xff] (!%p209_p3)  ;;  %v431_v29 = vld [vmem:[%s1379_s4 + $0x28] sm:$0xff] (!%p209_p3)  ;;  %v430_v30 = vld [vmem:[%s1379_s4 + $0x20] sm:$0xff] (!%p209_p3) }
   0xc   : > { %385 = vperm.xlu1 (!%p209_p3), %1054, %v375_v3   ;;  %353 = vperm.xlu0 (!%p209_p3), %1053, %v343_v4   ;;  %v433_v33 = vld [vmem:[%s1379_s4 + $0x38] sm:$0xff] (!%p209_p3)  ;;  %v432_v34 = vld [vmem:[%s1379_s4 + $0x30] sm:$0xff] (!%p209_p3)  ;;  %v435_v37 = vld [vmem:[%s1379_s4 + $0x48] sm:$0xff] (!%p209_p3) }
   0xd   : > { %v434_v38 = vld [vmem:[%s1379_s4 + $0x40] sm:$0xff] (!%p209_p3)  ;;  %v437_v41 = vld [vmem:[%s1379_s4 + $0x58] sm:$0xff] (!%p209_p3)  ;;  %v436_v42 = vld [vmem:[%s1379_s4 + $0x50] sm:$0xff] (!%p209_p3) }
   0xe   : > { %s1386_s18 = smov (!%p245_p4, %s1113_s18), 1 }
   0xf   : > { %s1006_s13 = sshll.u32 %s1386_s18, 6  ;;  %s1007_s27 = sshll.u32 %s1386_s18, 7 }
  0x10   : > { %363 = vperm.xlu1 %1054, %v345_v5   ;;  %358 = vperm.xlu0 %1053, %v344_v6   ;;  %s252_s24 = scalar_lea.vmem %s1375_s0, %s1006_s13  ;;  %s1312_s30 = scalar_lea.vmem %s1380_s5, %s1007_s27 }
  0x11   : > { %v265_v13 = vld [vmem:[%s252_s24] sm:$0xff]  ;;  %v267_v14 = vld [vmem:[%s252_s24 + $0x10] sm:$0xff]  ;;  %v266_v15 = vld [vmem:[%s252_s24 + $0x8] sm:$0xff] }
  0x12   : > { %v268_v16 = vld [vmem:[%s252_s24 + $0x18] sm:$0xff]  ;;  %v273_v19 = vadd.f32 %v267_v14, %v265_v13  ;;  %v269_v20 = vld [vmem:[%s252_s24 + $0x20] sm:$0xff]  ;;  %v270_v22 = vld [vmem:[%s252_s24 + $0x28] sm:$0xff] }
  0x13   : > { %v282_v21 = vadd.f32 %v268_v16, %v266_v15  ;;  %v271_v26 = vld [vmem:[%s252_s24 + $0x30] sm:$0xff]  ;;  %v272_v28 = vld [vmem:[%s252_s24 + $0x38] sm:$0xff] }
  0x14   : > { %395 = vperm.xlu1 %1054, %v377_v7   ;;  %390 = vperm.xlu0 %1053, %v376_v8   ;;  %v274_v25 = vadd.f32 %v273_v19, %v269_v20 }
  0x15   : > { %v283_v27 = vadd.f32 %v282_v21, %v270_v22 }
  0x16   : > { %v275_v31 = vadd.f32 %v274_v25, %v271_v26 }
  0x17   : > { %v284_v32 = vadd.f32 %v283_v27, %v272_v28 }
  0x18   : > { %509 = vperm.xlu1 %1054, %v439_v9   ;;  %504 = vperm.xlu0 %1053, %v438_v10   ;;  %v276_v35 = vrot.slane %v275_v31, 4 }
  0x19   : > { %v285_v36 = vrot.slane %v284_v32, 4 }
  0x1a   : > { %v277_v39 = vadd.f32 %v276_v35, %v275_v31 }
  0x1b   : > { %v286_v40 = vadd.f32 %v285_v36, %v284_v32 }
  0x1c   : > { %519 = vperm.xlu1 %1054, %v441_v11   ;;  %514 = vperm.xlu0 %1053, %v440_v12   ;;  %v278_v43 = vrot.slane %v277_v39, 2 }
  0x1d   : > { %v287_v44 = vrot.slane %v286_v40, 2 }
  0x1e   : > { %v279_v45 = vadd.f32 %v278_v43, %v277_v39 }
  0x1f   : > { %v288_v46 = vadd.f32 %v287_v44, %v286_v40 }
  0x20   : > { %449 = vperm.xlu1 %1054, %v427_v17   ;;  %444 = vperm.xlu0 %1053, %v426_v18   ;;  %v280_v47 = vrot.slane %v279_v45, 1 }
  0x21   : > { %v289_v48 = vrot.slane %v288_v46, 1 }
  0x22   : > { %v281_v49 = vadd.f32 %v280_v47, %v279_v45 }
  0x23   : > { %v290_v50 = vadd.f32 %v289_v48, %v288_v46 }
  0x24   : > { %459 = vperm.xlu1 %1054, %v429_v23   ;;  %454 = vperm.xlu0 %1053, %v428_v24   ;;  %v292_v51 = vmul.f32 0.03125, %v281_v49 }
  0x25   : > { %v293_v52 = vmul.f32 0.03125, %v290_v50 }
  0x26   : > { %v294_v53 = vsub.f32 %v265_v13, %v292_v51  ;;  %v296_v54 = vsub.f32 %v267_v14, %v292_v51  ;;  %v298_v57 = vsub.f32 %v269_v20, %v292_v51  ;;  %v300_v63 = vsub.f32 %v271_v26, %v292_v51 }
  0x27   : > { %v295_v55 = vsub.f32 %v266_v15, %v293_v52  ;;  %v297_v56 = vsub.f32 %v268_v16, %v293_v52  ;;  %v299_v60 = vsub.f32 %v270_v22, %v293_v52  ;;  %v301_v3 = vsub.f32 %v272_v28, %v293_v52 }
  0x28   : > { %469 = vperm.xlu1 %1054, %v431_v29   ;;  %464 = vperm.xlu0 %1053, %v430_v30   ;;  %v302_v58 = vmul.f32 %v294_v53, %v294_v53  ;;  %v304_v59 = vmul.f32 %v296_v54, %v296_v54  ;;  %v306_v0 = vmul.f32 %v298_v57, %v298_v57 }
  0x29   : > { %v303_v61 = vmul.f32 %v295_v55, %v295_v55  ;;  %v305_v62 = vmul.f32 %v297_v56, %v297_v56  ;;  %v307_v4 = vmul.f32 %v299_v60, %v299_v60  ;;  %v308_v6 = vmul.f32 %v300_v63, %v300_v63 }
  0x2a   : > { %v310_v1 = vadd.f32 %v304_v59, %v302_v58  ;;  %v309_v8 = vmul.f32 %v301_v3, %v301_v3 }
  0x2b   : > { %v319_v5 = vadd.f32 %v305_v62, %v303_v61 }
  0x2c   : > { %479 = vperm.xlu1 %1054, %v433_v33   ;;  %474 = vperm.xlu0 %1053, %v432_v34   ;;  %v311_v7 = vadd.f32 %v310_v1, %v306_v0 }
  0x2d   : > { %v320_v9 = vadd.f32 %v319_v5, %v307_v4  ;;  %v1056_v4 = vld [vmem:[%s1378_s3 + $0x20] sm:$0xff]   ;;  %v1057_v5 = vld [vmem:[%s1378_s3 + $0x8] sm:$0xff]  }
  0x2e   : > { %v312_v10 = vadd.f32 %v311_v7, %v308_v6  ;;  %v1058_v6 = vld [vmem:[%s1378_s3 + $0x28] sm:$0xff]   ;;  %v1059_v7 = vld [vmem:[%s1378_s3 + $0x10] sm:$0xff]  }
  0x2f   : > { %v321_v11 = vadd.f32 %v320_v9, %v309_v8  ;;  %v1060_v8 = vld [vmem:[%s1378_s3 + $0x30] sm:$0xff]   ;;  %v1061_v9 = vld [vmem:[%s1378_s3 + $0x18] sm:$0xff]  }
  0x30   : > { %489 = vperm.xlu1 %1054, %v435_v37   ;;  %484 = vperm.xlu0 %1053, %v434_v38   ;;  %v313_v12 = vrot.slane %v312_v10, 4 }
  0x31   : > { %v322_v13 = vrot.slane %v321_v11, 4 }
  0x32   : > { %v314_v14 = vadd.f32 %v313_v12, %v312_v10  ;;  %v1062_v10 = vld [vmem:[%s1378_s3 + $0x38] sm:$0xff]  }
  0x33   : > { %v323_v15 = vadd.f32 %v322_v13, %v321_v11 }
  0x34   : > { %499 = vperm.xlu1 %1054, %v437_v41   ;;  %494 = vperm.xlu0 %1053, %v436_v42   ;;  %v315_v16 = vrot.slane %v314_v14, 2 }
  0x35   : > { %v324_v17 = vrot.slane %v323_v15, 2 }
  0x36   : > { %v316_v18 = vadd.f32 %v315_v16, %v314_v14 }
  0x37   : > { %v325_v19 = vadd.f32 %v324_v17, %v323_v15 }
  0x38   : > { %v317_v20 = vrot.slane %v316_v18, 1 }
  0x39   : > { %v326_v21 = vrot.slane %v325_v19, 1 }
  0x3a   : > { %v318_v22 = vadd.f32 %v317_v20, %v316_v18 }
  0x3b   : > { %v327_v23 = vadd.f32 %v326_v21, %v325_v19 }
  0x3c   : > { %v328_v24 = vmul.f32 0.03125, %v318_v22 }
  0x3d   : > { %v329_v25 = vmul.f32 0.03125, %v327_v23 }
  0x3e   : > { %v330_v26 = vadd.f32 1e-05, %v328_v24 }
  0x3f   : > { %v331_v27 = vadd.f32 1e-05, %v329_v25 }
  0x40   : > { %1063 = vrsqrt.f32 %v330_v26 }
  0x41   : > { %1065 = vrsqrt.f32 %v331_v27 }
  0x4a   : > { %v1064_v28 = vpop.eup %1063 }
  0x4b   : > { %v1066_v29 = vpop.eup %1065  ;;  %v334_v32 = vmul.f32 %v1064_v28, %v294_v53  ;;  %v336_v34 = vmul.f32 %v1064_v28, %v296_v54  ;;  %v340_v42 = vmul.f32 %v1064_v28, %v300_v63  ;;  %v338_v43 = vmul.f32 %v1064_v28, %v298_v57 }
  0x4c   : > { %v335_v33 = vmul.f32 %v1066_v29, %v295_v55  ;;  %v337_v35 = vmul.f32 %v1066_v29, %v297_v56  ;;  %v341_v44 = vmul.f32 %v1066_v29, %v301_v3  ;;  %v339_v45 = vmul.f32 %v1066_v29, %v299_v60  ;;  %v1055_v3 = vld [vmem:[%s1378_s3] sm:$0xff]  }
  0x87   : > { %v381_v30 = vpop.permute.xlu1 %380  ;;  %v349_v31 = vpop.permute.xlu0 %348 }
  0x88   : > { %v366_v36 = vmul.f32 %v349_v31, %v334_v32  ;;  %v367_v37 = vmul.f32 %v349_v31, %v335_v33 }
  0x8a   : > { %v399_v50 = vadd.f32 %v381_v30, %v367_v37  ;;  %v398_v51 = vadd.f32 %v381_v30, %v366_v36 }
  0x8b   : > { %v386_v38 = vpop.permute.xlu1 %385  ;;  %v354_v39 = vpop.permute.xlu0 %353 }
  0x8c   : > { %v368_v40 = vmul.f32 %v354_v39, %v336_v34  ;;  %v369_v41 = vmul.f32 %v354_v39, %v337_v35 }
  0x8e   : > { %v401_v46 = vadd.f32 %v386_v38, %v369_v41  ;;  %v400_v47 = vadd.f32 %v386_v38, %v368_v40 }
  0x8f   : > { %v364_v48 = vpop.permute.xlu1 %363  ;;  %v359_v49 = vpop.permute.xlu0 %358 }
  0x90   : > { %v423_v52 = vpack.c.bf16 %v401_v46, %v399_v50  ;;  %v422_v53 = vpack.c.bf16 %v400_v47, %v398_v51  ;;  %v372_v54 = vmul.f32 %v364_v48, %v340_v42  ;;  %v373_v55 = vmul.f32 %v364_v48, %v341_v44 }
  0x91   : > { %v370_v56 = vmul.f32 %v359_v49, %v338_v43  ;;  %v371_v58 = vmul.f32 %v359_v49, %v339_v45 }
  0x92   : > { %587 = vmatprep.subr.bf16.mxu0 %v423_v52  ;;  %1024 = vmatprep.subr.bf16.mxu1 %v423_v52 }
  0x93   : > { %v396_v59 = vpop.permute.xlu1 %395  ;;  %v391_v61 = vpop.permute.xlu0 %390  ;;  %588 = vmatpush1.bf16.msra.mxu0 %v422_v53  ;;  %1026 = vmatpush1.bf16.msra.mxu1 %v422_v53 }
  0x94   : > { %v404_v62 = vadd.f32 %v396_v59, %v372_v54  ;;  %v405_v57 = vadd.f32 %v396_v59, %v373_v55  ;;  %v402_v63 = vadd.f32 %v391_v61, %v370_v56  ;;  %v403_v60 = vadd.f32 %v391_v61, %v371_v58 }
  0x96   : > { %v424_v0 = vpack.c.bf16 %v404_v62, %v402_v63  ;;  %v425_v1 = vpack.c.bf16 %v405_v57, %v403_v60 }
  0x97   : > { %v1292_v11 = vpop.permute.xlu1 %509  ;;  %v1294_v12 = vpop.permute.xlu0 %504 }
  0x98   : > { %589 = vmatprep.subr.bf16.mxu0 %v425_v1  ;;  %1025 = vmatprep.subr.bf16.mxu1 %v425_v1 }
  0x99   : > { %590 = vmatpush1.bf16.msra.mxu0 %v424_v0  ;;  %1027 = vmatpush1.bf16.msra.mxu1 %v424_v0 }
  0x9b   : > { %v1296_v13 = vpop.permute.xlu1 %519 }
  0x9c   : > { %972 = vmatmul.mubr.msk.bf16.vlgmr.msra.gmra.mrb[0].mxu0 %vm562_vm0, %v1055_v3  ;;  %976 = vmatmul.mubr.msk.bf16.vlgmr.msra.gmra.mrb[0].mxu1 %vm562_vm0, %v1056_v4 }
  0x9d   : > { %629 = vmatprep.mubr.bf16.mxu0 %v1123_v2  ;;  %669 = vmatprep.mubr.bf16.mxu1 %v1123_v2 }
  0x9f   : > { %v450_v14 = vpop.permute.xlu1 %449 }
  0xa3   : > { %v460_v16 = vpop.permute.xlu1 %459 }
  0xa4   : > { %973 = vmatmul.mubr.msk.bf16.gmra.mrb[4].mxu0 %vm562_vm0, %v1057_v5  ;;  %977 = vmatmul.mubr.msk.bf16.gmra.mrb[4].mxu1 %vm562_vm0, %v1058_v6 }
  0xa5   : > { %639 = vmatprep.mubr.bf16.mxu0 %v1123_v2  ;;  %679 = vmatprep.mubr.bf16.mxu1 %v1123_v2 }
  0xa7   : > { %v1300_v18 = vpop.permute.xlu1 %469 }
  0xab   : > { %v1304_v20 = vpop.permute.xlu1 %479 }
  0xac   : > { %974 = vmatmul.mubr.msk.bf16.gmra.mrb[8].mxu0 %vm562_vm0, %v1059_v7  ;;  %978 = vmatmul.mubr.msk.bf16.gmra.mrb[8].mxu1 %vm562_vm0, %v1060_v8 }
  0xad   : > { %649 = vmatprep.mubr.bf16.mxu0 %v1123_v2  ;;  %689 = vmatprep.mubr.bf16.mxu1 %v1123_v2  ;;  %v1298_v2 = vpop.permute.xlu0 %514 }
  0xaf   : > { %v490_v22 = vpop.permute.xlu1 %489 }
  0xb1   : > { %v445_v15 = vpop.permute.xlu0 %444 }
  0xb3   : > { %v500_v44 = vpop.permute.xlu1 %499 }
  0xb4   : > { %975 = vmatmul.mubr.msk.bf16.gmra.mrb[12].mxu0 %vm562_vm0, %v1061_v9  ;;  %979 = vmatmul.mubr.msk.bf16.gmra.mrb[12].mxu1 %vm562_vm0, %v1062_v10 }
  0xb5   : > { %v455_v17 = vpop.permute.xlu0 %454 }
  0xb9   : > { %v1302_v19 = vpop.permute.xlu0 %464 }
  0xbd   : > { %v1306_v21 = vpop.permute.xlu0 %474 }
  0xc1   : > { %v485_v23 = vpop.permute.xlu0 %484 }
  0xc5   : > { %v495_v45 = vpop.permute.xlu0 %494 }
 0x16f   : > { %v621_v24 = vpop.f32.mrb[0].mxu0  ;;  %v661_v25 = vpop.f32.mrb[0].mxu1 }
 0x170   : > { %v622_v26 = vadd.f32 %v621_v24, %v445_v15  ;;  %v662_v27 = vadd.f32 %v661_v25, %v485_v23  ;;  %v623_v28 = vpop.f32.mrb[1].mxu0  ;;  %v663_v29 = vpop.f32.mrb[1].mxu1 }
 0x171   : > { %v624_v30 = vadd.f32 %v623_v28, %v445_v15  ;;  %v664_v31 = vadd.f32 %v663_v29, %v485_v23  ;;  %v625_v32 = vpop.f32.mrb[2].mxu0  ;;  %v665_v33 = vpop.f32.mrb[2].mxu1 }
 0x172   : > { %v626_v34 = vadd.f32 %v625_v32, %v450_v14  ;;  %v666_v35 = vadd.f32 %v665_v33, %v490_v22  ;;  %v627_v36 = vpop.f32.mrb[3].mxu0  ;;  %v667_v37 = vpop.f32.mrb[3].mxu1 }
 0x173   : > { %v1008_v38 = vpack.c.bf16 %v624_v30, %v622_v26  ;;  %v1016_v39 = vpack.c.bf16 %v664_v31, %v662_v27  ;;  %v628_v40 = vadd.f32 %v627_v36, %v450_v14  ;;  %v668_v41 = vadd.f32 %v667_v37, %v490_v22 }
 0x175   : > { %772 = vst [vmem:[%s1312_s30] sm:$0xff] %v1008_v38  ;;  %780 = vst [vmem:[%s1312_s30 + $0x40] sm:$0xff] %v1016_v39  ;;  %v1009_v42 = vpack.c.bf16 %v628_v40, %v626_v34  ;;  %v1017_v43 = vpack.c.bf16 %v668_v41, %v666_v35 }
 0x177   : > { %773 = vst [vmem:[%s1312_s30 + $0x8] sm:$0xff] %v1009_v42  ;;  %781 = vst [vmem:[%s1312_s30 + $0x48] sm:$0xff] %v1017_v43  ;;  %v631_v46 = vpop.f32.mrb[4].mxu0  ;;  %v671_v47 = vpop.f32.mrb[4].mxu1 }
 0x178   : > { %v632_v48 = vadd.f32 %v631_v46, %v455_v17  ;;  %v672_v49 = vadd.f32 %v671_v47, %v495_v45  ;;  %v633_v50 = vpop.f32.mrb[5].mxu0  ;;  %v673_v51 = vpop.f32.mrb[5].mxu1 }
 0x179   : > { %v634_v52 = vadd.f32 %v633_v50, %v455_v17  ;;  %v674_v53 = vadd.f32 %v673_v51, %v495_v45  ;;  %v635_v54 = vpop.f32.mrb[6].mxu0  ;;  %v675_v55 = vpop.f32.mrb[6].mxu1 }
 0x17a   : > { %v636_v56 = vadd.f32 %v635_v54, %v460_v16  ;;  %v676_v58 = vadd.f32 %v675_v55, %v500_v44  ;;  %v637_v59 = vpop.f32.mrb[7].mxu0  ;;  %v677_v61 = vpop.f32.mrb[7].mxu1 }
 0x17b   : > { %v1010_v62 = vpack.c.bf16 %v634_v52, %v632_v48  ;;  %v1018_v57 = vpack.c.bf16 %v674_v53, %v672_v49  ;;  %v638_v63 = vadd.f32 %v637_v59, %v460_v16  ;;  %v678_v60 = vadd.f32 %v677_v61, %v500_v44 }
 0x17d   : > { %774 = vst [vmem:[%s1312_s30 + $0x10] sm:$0xff] %v1010_v62  ;;  %782 = vst [vmem:[%s1312_s30 + $0x50] sm:$0xff] %v1018_v57  ;;  %v1011_v0 = vpack.c.bf16 %v638_v63, %v636_v56  ;;  %v1019_v1 = vpack.c.bf16 %v678_v60, %v676_v58 }
 0x17f   : > { %775 = vst [vmem:[%s1312_s30 + $0x18] sm:$0xff] %v1011_v0  ;;  %783 = vst [vmem:[%s1312_s30 + $0x58] sm:$0xff] %v1019_v1  ;;  %v641_v3 = vpop.f32.mrb[8].mxu0  ;;  %v681_v4 = vpop.f32.mrb[8].mxu1 }
 0x180   : > { %v642_v5 = vadd.f32 %v641_v3, %v1302_v19  ;;  %v1324_v6 = vadd.f32 %v681_v4, %v1294_v12  ;;  %v643_v7 = vpop.f32.mrb[9].mxu0  ;;  %v683_v8 = vpop.f32.mrb[9].mxu1 }
 0x181   : > { %v644_v9 = vadd.f32 %v643_v7, %v1302_v19  ;;  %v1328_v10 = vadd.f32 %v683_v8, %v1294_v12  ;;  %v645_v14 = vpop.f32.mrb[10].mxu0  ;;  %v685_v15 = vpop.f32.mrb[10].mxu1 }
 0x182   : > { %v992_v16 = vmul.f32 -1.442695, %v1324_v6  ;;  %v646_v17 = vadd.f32 %v645_v14, %v1300_v18  ;;  %v1333_v22 = vadd.f32 %v685_v15, %v1292_v11  ;;  %v647_v23 = vpop.f32.mrb[11].mxu0  ;;  %v687_v24 = vpop.f32.mrb[11].mxu1 }
 0x183   : > { %v1012_v25 = vpack.c.bf16 %v644_v9, %v642_v5  ;;  %v993_v26 = vmul.f32 -1.442695, %v1328_v10  ;;  %v648_v19 = vadd.f32 %v647_v23, %v1300_v18  ;;  %v1338_v12 = vadd.f32 %v687_v24, %v1292_v11 }
 0x184   : > { %1067 = vpow2.f32 %v992_v16  ;;  %v994_v27 = vmul.f32 -1.442695, %v1333_v22 }
 0x185   : > { %776 = vst [vmem:[%s1312_s30 + $0x20] sm:$0xff] %v1012_v25  ;;  %1069 = vpow2.f32 %v993_v26  ;;  %v1013_v28 = vpack.c.bf16 %v648_v19, %v646_v17  ;;  %v995_v29 = vmul.f32 -1.442695, %v1338_v12 }
 0x186   : > { %1071 = vpow2.f32 %v994_v27 }
 0x187   : > { %777 = vst [vmem:[%s1312_s30 + $0x28] sm:$0xff] %v1013_v28  ;;  %1073 = vpow2.f32 %v995_v29  ;;  %v651_v30 = vpop.f32.mrb[12].mxu0  ;;  %v691_v31 = vpop.f32.mrb[12].mxu1 }
 0x188   : > { %v652_v32 = vadd.f32 %v651_v30, %v1306_v21  ;;  %v1346_v18 = vadd.f32 %v691_v31, %v1298_v2  ;;  %v653_v11 = vpop.f32.mrb[13].mxu0  ;;  %v693_v33 = vpop.f32.mrb[13].mxu1 }
 0x189   : > { %v654_v34 = vadd.f32 %v653_v11, %v1306_v21  ;;  %v694_v35 = vadd.f32 %v693_v33, %v1298_v2  ;;  %v655_v36 = vpop.f32.mrb[14].mxu0  ;;  %v695_v37 = vpop.f32.mrb[14].mxu1 }
 0x18a   : > { %v996_v38 = vmul.f32 -1.442695, %v1346_v18  ;;  %v656_v39 = vadd.f32 %v655_v36, %v1304_v20  ;;  %v696_v40 = vadd.f32 %v695_v37, %v1296_v13  ;;  %v657_v41 = vpop.f32.mrb[15].mxu0  ;;  %v697_v42 = vpop.f32.mrb[15].mxu1 }
 0x18b   : > { %v1014_v43 = vpack.c.bf16 %v654_v34, %v652_v32  ;;  %v997_v44 = vmul.f32 -1.442695, %v694_v35  ;;  %v658_v45 = vadd.f32 %v657_v41, %v1304_v20  ;;  %v698_v46 = vadd.f32 %v697_v42, %v1296_v13 }
 0x18c   : > { %1075 = vpow2.f32 %v996_v38  ;;  %v998_v21 = vmul.f32 -1.442695, %v696_v40 }
 0x18d   : > { %778 = vst [vmem:[%s1312_s30 + $0x30] sm:$0xff] %v1014_v43  ;;  %1077 = vpow2.f32 %v997_v44  ;;  %v1015_v2 = vpack.c.bf16 %v658_v45, %v656_v39  ;;  %v999_v47 = vmul.f32 -1.442695, %v698_v46 }
 0x18e   : > { %v1068_v48 = vpop.eup %1067  ;;  %1079 = vpow2.f32 %v998_v21 }
 0x18f   : > { %v1070_v49 = vpop.eup %1069  ;;  %v808_v50 = vadd.f32 1.0, %v1068_v48  ;;  %779 = vst [vmem:[%s1312_s30 + $0x38] sm:$0xff] %v1015_v2  ;;  %1081 = vpow2.f32 %v999_v47 }
 0x190   : > { %v1072_v51 = vpop.eup %1071  ;;  %v809_v52 = vadd.f32 1.0, %v1070_v49 }
 0x191   : > { %v1074_v53 = vpop.eup %1073  ;;  %1083 = vrcp.f32 %v808_v50  ;;  %v810_v54 = vadd.f32 1.0, %v1072_v51 }
 0x192   : > { %1085 = vrcp.f32 %v809_v52  ;;  %v811_v20 = vadd.f32 1.0, %v1074_v53 }
 0x193   : > { %1087 = vrcp.f32 %v810_v54 }
 0x194   : > { %1089 = vrcp.f32 %v811_v20 }
 0x196   : > { %v1076_v13 = vpop.eup %1075 }
 0x197   : > { %v1078_v55 = vpop.eup %1077  ;;  %v812_v56 = vadd.f32 1.0, %v1076_v13 }
 0x198   : > { %v1080_v58 = vpop.eup %1079  ;;  %v813_v59 = vadd.f32 1.0, %v1078_v55 }
 0x199   : > { %v1082_v61 = vpop.eup %1081  ;;  %1091 = vrcp.f32 %v812_v56  ;;  %v814_v62 = vadd.f32 1.0, %v1080_v58 }
 0x19a   : > { %1093 = vrcp.f32 %v813_v59  ;;  %v815_v57 = vadd.f32 1.0, %v1082_v61 }
 0x19b   : > { %v1084_v63 = vpop.eup %1083  ;;  %1095 = vrcp.f32 %v814_v62 }
 0x19c   : > { %v1086_v60 = vpop.eup %1085  ;;  %v832_v0 = vmul.f32 %v1084_v63, %v1324_v6  ;;  %1097 = vrcp.f32 %v815_v57 }
 0x19d   : > { %v1088_v1 = vpop.eup %1087  ;;  %v833_v3 = vmul.f32 %v1086_v60, %v1328_v10 }
 0x19e   : > { %v1090_v4 = vpop.eup %1089  ;;  %v834_v5 = vmul.f32 %v1088_v1, %v1333_v22 }
 0x19f   : > { %v1020_v7 = vpack.c.bf16 %v833_v3, %v832_v0  ;;  %v835_v8 = vmul.f32 %v1090_v4, %v1338_v12 }
 0x1a1   : > { %864 = vst [vmem:[%s1312_s30 + $0x60] sm:$0xff] %v1020_v7  ;;  %v1021_v9 = vpack.c.bf16 %v835_v8, %v834_v5 }
 0x1a3   : > { %v1092_v14 = vpop.eup %1091  ;;  %865 = vst [vmem:[%s1312_s30 + $0x68] sm:$0xff] %v1021_v9 }
 0x1a4   : > { %v1094_v15 = vpop.eup %1093  ;;  %v836_v16 = vmul.f32 %v1092_v14, %v1346_v18 }
 0x1a5   : > { %v1096_v6 = vpop.eup %1095  ;;  %v837_v17 = vmul.f32 %v1094_v15, %v694_v35 }
 0x1a6   : > { %v1098_v23 = vpop.eup %1097  ;;  %v838_v24 = vmul.f32 %v1096_v6, %v696_v40 }
 0x1a7   : > { %v1022_v10 = vpack.c.bf16 %v837_v17, %v836_v16  ;;  %v839_v25 = vmul.f32 %v1098_v23, %v698_v46 }
 0x1a9   : > { %866 = vst [vmem:[%s1312_s30 + $0x70] sm:$0xff] %v1022_v10  ;;  %v1023_v26 = vpack.c.bf16 %v839_v25, %v838_v24 }
 0x1ab   : > { %867 = vst [vmem:[%s1312_s30 + $0x78] sm:$0xff] %v1023_v26 }
 0x1ac PF: > { %s15_s20 = sadd.s32 1, %s1121_s20   ;;  %s1381_s18 = smov %s1117_s19 }
 0x1ad   : > { %p12_p5 = scmp.ge.s32.totalorder %s15_s20, 4   ;;  %s1382_s19 = smov %s1384_s21 }
 0x1af   :  { %14 = sbr.rel (!%p12_p5) target bundleno = 2 (0x2), region = 70 }

// kernel: sparse_attention_forward.3
= control target key start
LH: loop header
LB: loop body
LE: loop exit
PB: predicated region body
PF: predicated region fallthrough
CT: control target
= control target key end

     0   :  { %s3427_s27 = smov 0   ;;  %s5937_s0 = inlined_call_operand.vmem [shape: bf16[2,128,256], index: 0, kind: input, shape index: {}]   ;;  %s5938_s1 = inlined_call_operand.vmem [shape: s32[2,256], index: 1, kind: input, shape index: {}]   ;;  %s5939_s2 = inlined_call_operand.vmem [shape: f32[96,9], index: 2, kind: input, shape index: {}]   ;;  %s5940_s3 = inlined_call_operand.vmem [shape: f32[96,1], index: 3, kind: input, shape index: {}]   ;;  %s5941_s4 = inlined_call_operand.vmem [shape: f32[32,1], index: 4, kind: input, shape index: {}]   ;;  %s5942_s5 = inlined_call_operand.vmem [shape: f32[32,32], index: 5, kind: input, shape index: {}]   ;;  %s5943_s6 = inlined_call_operand.vmem [shape: bf16[32,32], index: 6, kind: input, shape index: {}]   ;;  %s5944_s7 = inlined_call_operand.vmem [shape: f32[32,1], index: 7, kind: input, shape index: {}]   ;;  %s5945_s8 = inlined_call_operand.vmem [shape: f32[2,32,256], index: 8, kind: output, shape index: {}]  }
   0x1 LB: > { %s2726_s28 = sadd.s32 4294967295, %s3362_s27   ;;  %p2730_p0 = scmp.ge.s32.totalorder %s3362_s27, 1  ;;  %s3362_s27 = sphi %s3427_s27, %s18_s27  }
   0x2   : > { %p262_p1 = scmp.lt.s32.totalorder %s3362_s27, 3 }
   0x4   : > { %p263_p2 = pnand %p2730_p0, %p262_p1 }
   0x6   : > { %266 = sbr.rel (%p263_p2) target bundleno = 1997 (0x7cd), region = 52 }
   0xd   : > { %v3438_v0 = vld [vmem:[%s5939_s2 + $0x20] sm:$0xff]  ;;  %p296_p3 = scmp.lt.s32.totalorder %s2726_s28, 1  ;;  %v5985_v1 = vmov 0   ;;  %v5972_v2 = vmov 4   ;;  %v3449_v3 = vld [vmem:[%s5939_s2 + $0x28] sm:$0xff]  ;;  %v5974_v11 = vmov 1  }
   0xe   : > { %2781 = vset.pattern.permute.xlu1 %v5985_v1  ;;  %2780 = vset.pattern.permute.xlu0 %v5972_v2  ;;  %s3367_s15 = smov 17   ;;  %v3489_v13 = vld [vmem:[%s5939_s2 + $0x38] sm:$0xff]  ;;  %v5966_v18 = vmov 2   ;;  %s3369_s18 = smov 15   ;;  %v5960_v20 = vmov 3   ;;  %v3524_v21 = vld [vmem:[%s5939_s2 + $0x8] sm:$0xff] }
   0xf   : > { %592 = vperm.xlu1 %2781, %v3438_v0   ;;  %392 = vperm.xlu0 %2780, %v3438_v0   ;;  %s6478_s28 = smov (!%p296_p3, %s2726_s28), 1  ;;  %s3370_s19 = smov 16   ;;  %v3531_v22 = vld [vmem:[%s5939_s2 + $0x30] sm:$0xff]  ;;  %v5976_v26 = vmov 5   ;;  %v5968_v31 = vmov 6   ;;  %v2144_v34 = vld [vmem:[%s5940_s3 + $0x28] sm:$0xff] }
  0x10   : > { %2533 = vmatprep.mubr.bf16.mxu1 %v5985_v1  ;;  %s2752_s11 = sshll.u32 %s6478_s28, 7  ;;  %s3372_s24 = smov 112   ;;  %v3590_v33 = vld [vmem:[%s5939_s2 + $0x10] sm:$0xff]  ;;  %v5962_v35 = vmov 7   ;;  %v3632_v41 = vld [vmem:[%s5939_s2] sm:$0xff]  ;;  %v5970_v43 = vmov 8  }
  0x11   : > { %s3456_s14 = scalar_lea.vmem %s5937_s0, %s2752_s11  ;;  %s3374_s25 = smov 111   ;;  %v2145_v36 = vld [vmem:[%s5940_s3 + $0x30] sm:$0xff]  ;;  %v3651_v44 = vld [vmem:[%s5939_s2 + $0x18] sm:$0xff]  ;;  %v2143_v61 = vld [vmem:[%s5940_s3 + $0x20] sm:$0xff] }
  0x12   : > { %v3461_v4 = vld [vmem:[%s3456_s14 + $0x20] sm:$0xff]  ;;  %v3464_v5 = vld [vmem:[%s3456_s14 + $0x28] sm:$0xff]  ;;  %v3492_v14 = vld [vmem:[%s3456_s14 + $0x30] sm:$0xff]  ;;  %s3375_s26 = smov 127   ;;  %s3376_s29 = smov 1  }
  0x13   : > { %596 = vperm.xlu1 %2781, %v3449_v3   ;;  %397 = vperm.xlu0 %2780, %v3449_v3   ;;  %6136 = vst [vmem:[#allocation2_spill] sm:$0xff] %v3461_v4  ;;  %v5958_v6 = vunpack.c.h.bf16 %v3461_v4  ;;  %v5964_v7 = vunpack.c.h.bf16 %v3464_v5  ;;  %v5959_v8 = vunpack.c.l.bf16 %v3461_v4  ;;  %v5965_v9 = vunpack.c.l.bf16 %v3464_v5  ;;  %6137 = vst [vmem:[#allocation3_spill] sm:$0xff] %v3492_v14  ;;  %v3495_v15 = vld [vmem:[%s3456_s14 + $0x38] sm:$0xff]  ;;  %v3562_v27 = vld [vmem:[%s3456_s14] sm:$0xff]  ;;  %s3378_s30 = smov 113  }
  0x14   : > { %6138 = vst [vmem:[#allocation4_spill] sm:$0xff] %v3495_v15  ;;  %v5954_v16 = vunpack.c.h.bf16 %v3492_v14  ;;  %v5956_v17 = vunpack.c.h.bf16 %v3495_v15  ;;  %v5955_v23 = vunpack.c.l.bf16 %v3492_v14  ;;  %v5957_v24 = vunpack.c.l.bf16 %v3495_v15  ;;  %6139 = vst [vmem:[#allocation5_spill] sm:$0xff] %v3562_v27  ;;  %v3565_v28 = vld [vmem:[%s3456_s14 + $0x8] sm:$0xff]  ;;  %v3620_v37 = vld [vmem:[%s3456_s14 + $0x10] sm:$0xff] }
  0x15   : > { %v3474_v10 = vpack.i.bf16 %v5964_v7, %v5958_v6  ;;  %v3484_v12 = vpack.i.bf16 %v5965_v9, %v5959_v8  ;;  %6140 = vst [vmem:[#allocation6_spill] sm:$0xff] %v3565_v28  ;;  %v5948_v29 = vunpack.c.h.bf16 %v3562_v27  ;;  %v5952_v30 = vunpack.c.h.bf16 %v3565_v28  ;;  %6141 = vst [vmem:[#allocation7_spill] sm:$0xff] %v3620_v37  ;;  %v3623_v38 = vld [vmem:[%s3456_s14 + $0x18] sm:$0xff] }
  0x16   : > { %v3510_v19 = vpack.i.bf16 %v5956_v17, %v5954_v16  ;;  %v3545_v25 = vpack.i.bf16 %v5957_v24, %v5955_v23  ;;  %6142 = vst [vmem:[#allocation8_spill] sm:$0xff] %v3623_v38  ;;  %v5947_v39 = vunpack.c.h.bf16 %v3620_v37  ;;  %v5946_v40 = vunpack.c.h.bf16 %v3623_v38 }
  0x17   : > { %2782 = vset.pattern.permute.xlu1 %v5974_v11  ;;  %2790 = vrot.lane.b32.xlu0 %v3474_v10, %s3367_s15  ;;  %v3581_v32 = vpack.i.bf16 %v5952_v30, %v5948_v29  ;;  %v5953_v59 = vunpack.c.l.bf16 %v3565_v28  ;;  %v5949_v60 = vunpack.c.l.bf16 %v3562_v27 }
  0x18   : > { %806 = vperm.xlu1 %2782, %v3449_v3   ;;  %v3641_v42 = vpack.i.bf16 %v5946_v40, %v5947_v39 }
  0x1b   : > { %407 = vperm.xlu0 %2780, %v3489_v13  }
  0x1c   : > { %2784 = vrot.lane.b32.xlu1 %v3484_v12, %s3367_s15 }
  0x1d   : > { %2788 = vset.pattern.permute.xlu1 %v5966_v18 }
  0x1f   : > { %2808 = vrot.lane.b32.xlu0 %v3484_v12, %s3369_s18 }
  0x20   : > { %1013 = vperm.xlu1 %2788, %v3438_v0  }
  0x23   : > { %2836 = vrot.lane.b32.xlu0 %v3510_v19, %s3367_s15 }
  0x24   : > { %2795 = vrot.lane.b32.xlu1 %v3484_v12, %s3370_s19 }
  0x25   : > { %2804 = vset.pattern.permute.xlu1 %v5960_v20 }
  0x27   : > { %2858 = vrot.lane.b32.xlu0 %v3510_v19, %s3370_s19 }
  0x28   : > { %2800 = vrot.lane.b32.xlu1 %v3474_v10, %s3370_s19 }
  0x2b   : > { %377 = vperm.xlu0 %2780, %v3524_v21  }
  0x2c   : > { %1228 = vperm.xlu1 %2804, %v3449_v3  }
  0x2f   : > { %2875 = vset.pattern.permute.xlu0 %v5974_v11 }
  0x30   : > { %2805 = vset.pattern.permute.xlu1 %v5972_v2  ;;  %802 = vperm.xlu0 %2875, %v3438_v0  }
  0x31   : > { %402 = vperm.xlu1 %2805, %v3531_v22  }
  0x34   : > { %814 = vperm.xlu0 %2875, %v3489_v13  }
  0x35   : > { %2806 = vset.pattern.permute.xlu1 %v5985_v1 }
  0x36   : > { %600 = vperm.xlu1 %2806, %v3531_v22  }
  0x38   : > { %2878 = vrot.lane.b32.xlu0 %v3545_v25, %s3369_s18 }
  0x3a   : > { %604 = vperm.xlu1 %2806, %v3489_v13  }
  0x3c   : > { %2894 = vrot.lane.b32.xlu0 %v3474_v10, %s3372_s24 }
  0x3e   : > { %2813 = vrot.lane.b32.xlu1 %v3474_v10, %s3369_s18 }
  0x3f   : > { %2817 = vset.pattern.permute.xlu1 %v5976_v26 }
  0x40   : > { %790 = vperm.xlu0 %2875, %v3524_v21  }
  0x42   : > { %1436 = vperm.xlu1 %2817, %v3449_v3  }
  0x44   : > { %2916 = vrot.lane.b32.xlu0 %v3474_v10, %s3374_s25 }
  0x46   : > { %2818 = vset.pattern.permute.xlu1 %v5974_v11 }
  0x47   : > { %810 = vperm.xlu1 %2818, %v3531_v22  }
  0x48   : > { %2938 = vrot.lane.b32.xlu0 %v3510_v19, %s3375_s26 }
  0x4b   : > { %2820 = vrot.lane.b32.xlu1 %v3484_v12, %s3376_s29 }
  0x4c   : > { %2829 = vset.pattern.permute.xlu1 %v5968_v31  ;;  %2960 = vrot.lane.b32.xlu0 %v3510_v19, %s3378_s30 }
  0x4f   : > { %2825 = vrot.lane.b32.xlu1 %v3474_v10, %s3376_s29 }
  0x50   : > { %2973 = vrot.lane.b32.xlu0 %v3581_v32, %s3369_s18 }
  0x53   : > { %1648 = vperm.xlu1 %2829, %v3449_v3  }
  0x54   : > { %794 = vperm.xlu0 %2875, %v3590_v33  }
  0x57   : > { %2831 = vrot.lane.b32.xlu1 %v3545_v25, %s3367_s15 }
  0x58   : > { %2840 = vset.pattern.permute.xlu1 %v5966_v18  ;;  %2988 = vset.pattern.permute.xlu0 %v5985_v1 }
  0x59   : > { %2178 = vperm.xlu0 %2988, %v2144_v34  }
  0x5b   : > { %1021 = vperm.xlu1 %2840, %v3531_v22  }
  0x5d   : > { %584 = vperm.xlu0 %2988, %v3590_v33  }
  0x5f   : > { %2842 = vrot.lane.b32.xlu1 %v3484_v12, %s3375_s26 }
  0x60   : > { %2851 = vset.pattern.permute.xlu1 %v5962_v35 }
  0x61   : > { %2996 = vrot.lane.b32.xlu0 %v3581_v32, %s3376_s29 }
  0x63   : > { %2847 = vrot.lane.b32.xlu1 %v3474_v10, %s3375_s26 }
  0x65   : > { %2183 = vperm.xlu0 %2988, %v2145_v36  }
  0x67   : > { %1856 = vperm.xlu1 %2851, %v3449_v3  }
  0x69   : > { %3011 = vset.pattern.permute.xlu0 %v5966_v18 }
  0x6a   : > { %1017 = vperm.xlu0 %3011, %v3449_v3  }
  0x6b   : > { %2853 = vrot.lane.b32.xlu1 %v3545_v25, %s3370_s19 }
  0x6c   : > { %2862 = vset.pattern.permute.xlu1 %v5960_v20 }
  0x6e   : > { %1025 = vperm.xlu0 %3011, %v3489_v13  }
  0x6f   : > { %1232 = vperm.xlu1 %2862, %v3531_v22  }
  0x72   : > { %997 = vperm.xlu0 %3011, %v3632_v41  }
  0x73   : > { %2864 = vrot.lane.b32.xlu1 %v3484_v12, %s3378_s30 }
  0x74   : > { %2873 = vset.pattern.permute.xlu1 %v5970_v43 }
  0x76   : > { %3019 = vrot.lane.b32.xlu0 %v3641_v42, %s3367_s15 }
  0x77   : > { %2869 = vrot.lane.b32.xlu1 %v3474_v10, %s3378_s30  ;;  %v5951_v10 = vunpack.c.l.bf16 %v3620_v37 }
  0x7a   : > { %1009 = vperm.xlu0 %3011, %v3651_v44  }
  0x7b   : > { %2064 = vperm.xlu1 %2873, %v3449_v3   ;;  %v3734_v3 = vpack.i.bf16 %v5953_v59, %v5949_v60 }
  0x7e   : > { %3024 = vset.pattern.permute.xlu0 %v5960_v20 }
  0x7f   : > { %2874 = vset.pattern.permute.xlu1 %v5972_v2  ;;  %1224 = vperm.xlu0 %3024, %v3438_v0  }
  0x80   : > { %372 = vperm.xlu1 %2874, %v3632_v41  }
  0x83   : > { %1236 = vperm.xlu0 %3024, %v3489_v13  }
  0x84   : > { %2876 = vset.pattern.permute.xlu1 %v5985_v1 }
  0x85   : > { %576 = vperm.xlu1 %2876, %v3632_v41  }
  0x87   : > { %1208 = vperm.xlu0 %3024, %v3632_v41  }
  0x89   : > { %580 = vperm.xlu1 %2876, %v3524_v21  }
  0x8b   : > { %3042 = vrot.lane.b32.xlu0 %v3641_v42, %s3370_s19 }
  0x8d   : > { %2883 = vrot.lane.b32.xlu1 %v3510_v19, %s3369_s18 }
  0x8e   : > { %v3668_v45 = vpop.permute.xlu1 %592  ;;  %v3670_v46 = vpop.permute.xlu0 %392  ;;  %2887 = vset.pattern.permute.xlu1 %v5976_v26 }
  0x8f   : > { %6143 = vst [vmem:[#allocation9_spill] sm:$0xff] %v3668_v45  ;;  %6144 = vst [vmem:[#allocation10_spill] sm:$0xff] %v3670_v46  ;;  %1220 = vperm.xlu0 %3024, %v3651_v44   ;;  %v6212_v45 = vunpack.c.l.bf16 %v3464_v5 }
  0x91   : > { %1444 = vperm.xlu1 %2887, %v3489_v13  }
  0x92   : > { %v3675_v47 = vpop.permute.xlu1 %596  ;;  %v3677_v48 = vpop.permute.xlu0 %397 }
  0x93   : > { %3047 = vset.pattern.permute.xlu0 %v5976_v26  ;;  %v2140_v26 = vld [vmem:[%s5940_s3 + $0x8] sm:$0xff]  ;;  %v440_v46 = vmul.f32 %v3677_v48, %v6212_v45 }
  0x94   : > { %1432 = vperm.xlu0 %3047, %v3438_v0  }
  0x95   : > { %2889 = vrot.lane.b32.xlu1 %v3484_v12, %s3372_s24 }
  0x96   : > { %v3683_v49 = vpop.permute.xlu0 %2790  ;;  %2898 = vset.pattern.permute.xlu1 %v5974_v11 }
  0x97   : > { %v3686_v50 = vpop.permute.xlu1 %806 }
  0x98   : > { %1440 = vperm.xlu0 %3047, %v3531_v22  }
  0x99   : > { %786 = vperm.xlu1 %2898, %v3632_v41  }
  0x9a   : > { %v3692_v52 = vpop.permute.xlu0 %407 }
  0x9b   : > { %v3690_v51 = vpop.permute.xlu1 %2784  ;;  %6145 = vst [vmem:[#allocation11_spill] sm:$0xff] %v3692_v52 }
  0x9c   : > { %1420 = vperm.xlu0 %3047, %v3524_v21  }
  0x9d   : > { %2900 = vrot.lane.b32.xlu1 %v3545_v25, %s3376_s29 }
  0x9e   : > { %2909 = vset.pattern.permute.xlu1 %v5968_v31  ;;  %v3700_v54 = vpop.permute.xlu0 %2808 }
  0x9f   : > { %v3698_v53 = vpop.permute.xlu1 %1013 }
  0xa0   : > { %6146 = vst [vmem:[#allocation12_spill] sm:$0xff] %v3698_v53  ;;  %3065 = vrot.lane.b32.xlu0 %v3641_v42, %s3369_s18 }
  0xa1   : > { %2905 = vrot.lane.b32.xlu1 %v3510_v19, %s3376_s29 }
  0xa2   : > { %v3708_v56 = vpop.permute.xlu0 %2836 }
  0xa3   : > { %v3706_v55 = vpop.permute.xlu1 %2795  ;;  %6148 = vst [vmem:[#allocation14_spill] sm:$0xff] %v3708_v56  ;;  %v2811_v56 = vunpack.i.h.bf16 %v3700_v54 }
  0xa4   : > { %6147 = vst [vmem:[#allocation13_spill] sm:$0xff] %v3706_v55  ;;  %1428 = vperm.xlu0 %3047, %v3651_v44  }
  0xa5   : > { %1656 = vperm.xlu1 %2909, %v3489_v13  }
  0xa6   : > { %v3714_v58 = vpop.permute.xlu0 %2858 }
  0xa7   : > { %v3712_v57 = vpop.permute.xlu1 %2800  ;;  %6149 = vst [vmem:[#allocation15_spill] sm:$0xff] %v3714_v58  ;;  %v6202_v58 = vmov 2  }
  0xa8   : > { %3070 = vset.pattern.permute.xlu0 %v5968_v31  ;;  %v2803_v53 = vunpack.i.h.bf16 %v3712_v57 }
  0xa9   : > { %2911 = vrot.lane.b32.xlu1 %v3484_v12, %s3374_s25  ;;  %1644 = vperm.xlu0 %3070, %v3438_v0   ;;  %v5950_v12 = vunpack.c.l.bf16 %v3623_v38 }
  0xaa   : > { %2920 = vset.pattern.permute.xlu1 %v5985_v1  ;;  %v3728_v63 = vpop.permute.xlu0 %377 }
  0xab   : > { %v3726_v62 = vpop.permute.xlu1 %1228  ;;  %6150 = vst [vmem:[#allocation16_spill] sm:$0xff] %v3728_v63 }
  0xad   : > { %2173 = vperm.xlu1 %2920, %v2143_v61   ;;  %1652 = vperm.xlu0 %3070, %v3531_v22   ;;  %v3750_v61 = vpack.i.bf16 %v5950_v12, %v5951_v10 }
  0xaf   : > { %v3739_v34 = vpop.permute.xlu0 %802 }
  0xb0   : > { %6151 = vst [vmem:[#allocation17_spill] sm:$0xff] %v3739_v34  ;;  %v3741_v36 = vpop.permute.xlu1 %402  ;;  %v2798_v34 = vunpack.i.h.bf16 %v3706_v55 }
  0xb1   : > { %6152 = vst [vmem:[#allocation18_spill] sm:$0xff] %v3741_v36  ;;  %2922 = vrot.lane.b32.xlu1 %v3734_v3, %s3367_s15  ;;  %1632 = vperm.xlu0 %3070, %v3524_v21  }
  0xb2   : > { %2931 = vset.pattern.permute.xlu1 %v5966_v18 }
  0xb3   : > { %v3753_v40 = vpop.permute.xlu0 %814 }
  0xb4   : > { %6153 = vst [vmem:[#allocation19_spill] sm:$0xff] %v3753_v40 }
  0xb5   : > { %v3755_v39 = vpop.permute.xlu1 %600  ;;  %2927 = vrot.lane.b32.xlu1 %v3581_v32, %s3367_s15  ;;  %3082 = vrot.lane.b32.xlu0 %v3750_v61, %s3376_s29 }
  0xb6   : > { %6154 = vst [vmem:[#allocation20_spill] sm:$0xff] %v3755_v39 }
  0xb7   : > { %v3761_v29 = vpop.permute.xlu0 %2878 }
  0xb8   : > { %6155 = vst [vmem:[#allocation21_spill] sm:$0xff] %v3761_v29 }
  0xb9   : > { %v3763_v60 = vpop.permute.xlu1 %604  ;;  %1001 = vperm.xlu1 %2931, %v3524_v21   ;;  %1636 = vperm.xlu0 %3070, %v3590_v33  }
  0xba   : > { %6156 = vst [vmem:[#allocation22_spill] sm:$0xff] %v3763_v60 }
  0xbb   : > { %v3767_v12 = vpop.permute.xlu0 %2894 }
  0xbd   : > { %v3769_v10 = vpop.permute.xlu1 %2813  ;;  %2933 = vrot.lane.b32.xlu1 %v3545_v25, %s3375_s26  ;;  %3091 = vset.pattern.permute.xlu0 %v5962_v35 }
  0xbe   : > { %2942 = vset.pattern.permute.xlu1 %v5962_v35  ;;  %1852 = vperm.xlu0 %3091, %v3438_v0   ;;  %v2816_v15 = vunpack.i.h.bf16 %v3769_v10 }
  0xbf   : > { %v3776_v30 = vpop.permute.xlu0 %790 }
  0xc0   : > { %6157 = vst [vmem:[#allocation23_spill] sm:$0xff] %v3776_v30  ;;  %v2141_v30 = vld [vmem:[%s5940_s3 + $0x10] sm:$0xff] }
  0xc1   : > { %v3778_v59 = vpop.permute.xlu1 %1436  ;;  %1860 = vperm.xlu1 %2942, %v3531_v22  }
  0xc2   : > { %1864 = vperm.xlu0 %3091, %v3489_v13  }
  0xc3   : > { %v3782_v16 = vpop.permute.xlu0 %2916 }
  0xc5   : > { %2944 = vrot.lane.b32.xlu1 %v3734_v3, %s3370_s19 }
  0xc6   : > { %v3786_v23 = vpop.permute.xlu1 %810  ;;  %2953 = vset.pattern.permute.xlu1 %v5960_v20  ;;  %1836 = vperm.xlu0 %3091, %v3632_v41  }
  0xc7   : > { %6158 = vst [vmem:[#allocation24_spill] sm:$0xff] %v3786_v23  ;;  %v3790_v17 = vpop.permute.xlu0 %2938  ;;  %v502_v23 = vlaneseq }
  0xc8   : > { %6159 = vst [vmem:[#allocation25_spill] sm:$0xff] %v3790_v17  ;;  %v2787_v17 = vunpack.i.h.bf16 %v3690_v51 }
  0xc9   : > { %2949 = vrot.lane.b32.xlu1 %v3581_v32, %s3370_s19  ;;  %v542_v39 = vshrl.u32 %v502_v23, 7  ;;  %v3938_v60 = vand.u32 127, %v502_v23  ;;  %v2793_v23 = vunpack.i.h.bf16 %v3683_v49 }
  0xca   : > { %v3794_v24 = vpop.permute.xlu1 %2820  ;;  %3099 = vrot.lane.b32.xlu0 %v3581_v32, %s3374_s25 }
  0xcb   : > { %6160 = vst [vmem:[#allocation26_spill] sm:$0xff] %v3794_v24  ;;  %v3798_v6 = vpop.permute.xlu0 %2960 }
  0xcc   : > { %6161 = vst [vmem:[#allocation27_spill] sm:$0xff] %v3798_v6 }
  0xcd   : > { %1212 = vperm.xlu1 %2953, %v3524_v21  }
  0xce   : > { %v3801_v8 = vpop.permute.xlu1 %2825  ;;  %1844 = vperm.xlu0 %3091, %v3590_v33  }
  0xcf   : > { %6162 = vst [vmem:[#allocation28_spill] sm:$0xff] %v3801_v8  ;;  %v3804_v20 = vpop.permute.xlu0 %2973 }
  0xd0   : > { %6163 = vst [vmem:[#allocation29_spill] sm:$0xff] %v3804_v20  ;;  %v367_v20 = vld [vmem:[%s5938_s1] ss:$2 sm:$0x3] }
  0xd1   : > { %2955 = vrot.lane.b32.xlu1 %v3545_v25, %s3378_s30  ;;  %vm1165_vm11 = vcmp.ge.s32.totalorder %v367_v20, 0  ;;  %vm1166_vm12 = vcmp.lt.s32.totalorder %v367_v20, 16 }
  0xd2   : > { %v3808_v35 = vpop.permute.xlu1 %1648  ;;  %2964 = vset.pattern.permute.xlu1 %v5970_v43  ;;  %3114 = vset.pattern.permute.xlu0 %v5970_v43 }
  0xd3   : > { %2060 = vperm.xlu0 %3114, %v3438_v0   ;;  %v3813_v7 = vpop.permute.xlu0 %794 }
  0xd4   : > { %6164 = vst [vmem:[#allocation30_spill] sm:$0xff] %v3813_v7  ;;  %v6170_v7 = vmov 5  }
  0xd5   : > { %2068 = vperm.xlu1 %2964, %v3531_v22  }
  0xd6   : > { %v3816_v9 = vpop.permute.xlu1 %2831 }
  0xd7   : > { %6165 = vst [vmem:[#allocation31_spill] sm:$0xff] %v3816_v9  ;;  %2072 = vperm.xlu0 %3114, %v3489_v13  }
  0xd8   : > { %v3820_v18 = vpop.permute.xlu0 %2178 }
  0xd9   : > { %2965 = vset.pattern.permute.xlu1 %v5972_v2 }
  0xda   : > { %v3822_v31 = vpop.permute.xlu1 %1021  ;;  %382 = vperm.xlu1 %2965, %v3590_v33  }
  0xdb   : > { %6166 = vst [vmem:[#allocation32_spill] sm:$0xff] %v3822_v31  ;;  %2044 = vperm.xlu0 %3114, %v3632_v41   ;;  %v6012_v31 = vmov 0.0  }
  0xdc   : > { %v3826_v43 = vpop.permute.xlu0 %584 }
  0xdd   : > { %6167 = vst [vmem:[#allocation33_spill] sm:$0xff] %v3826_v43 }
  0xde   : > { %v3828_v0 = vpop.permute.xlu1 %2842  ;;  %387 = vperm.xlu1 %2965, %v3651_v44  }
  0xdf   : > { %3122 = vrot.lane.b32.xlu0 %v3641_v42, %s3378_s30 }
  0xe0   : > { %v3833_v13 = vpop.permute.xlu0 %2996 }
  0xe1   : > { %6168 = vst [vmem:[#allocation34_spill] sm:$0xff] %v3833_v13 }
  0xe2   : > { %v3835_v22 = vpop.permute.xlu1 %2847  ;;  %2966 = vset.pattern.permute.xlu1 %v5985_v1 }
  0xe3   : > { %588 = vperm.xlu1 %2966, %v3651_v44   ;;  %2056 = vperm.xlu0 %3114, %v3651_v44  }
  0xe4   : > { %v3842_v11 = vpop.permute.xlu0 %2183 }
  0xe5   : > { %6169 = vst [vmem:[#allocation35_spill] sm:$0xff] %v3842_v11  ;;  %v6177_v11 = vmov 6  }
  0xe6   : > { %v3840_v2 = vpop.permute.xlu1 %1856 }
  0xe7   : > { %2968 = vrot.lane.b32.xlu1 %v3734_v3, %s3369_s18  ;;  %3127 = vset.pattern.permute.xlu0 %v5985_v1  ;;  %v6173_v1 = vmov 1  }
  0xe8   : > { %2977 = vset.pattern.permute.xlu1 %v6170_v7  ;;  %2158 = vperm.xlu0 %3127, %v2140_v26  }
  0xe9   : > { %v3854_v38 = vpop.permute.xlu0 %1017 }
  0xea   : > { %v3851_v43 = vpop.permute.xlu1 %2853 }
  0xeb   : > { %6171 = vst [vmem:[#allocation36_spill] sm:$0xff] %v3851_v43  ;;  %1416 = vperm.xlu1 %2977, %v3632_v41  }
  0xec   : > { %3139 = vrot.lane.b32.xlu0 %v3750_v61, %s3374_s25 }
  0xed   : > { %v3866_v26 = vpop.permute.xlu0 %1025 }
  0xee   : > { %v3858_v37 = vpop.permute.xlu1 %1232  ;;  %6174 = vst [vmem:[#allocation38_spill] sm:$0xff] %v3866_v26 }
  0xef   : > { %6172 = vst [vmem:[#allocation37_spill] sm:$0xff] %v3858_v37  ;;  %2979 = vrot.lane.b32.xlu1 %v3545_v25, %s3372_s24 }
  0xf0   : > { %2989 = vset.pattern.permute.xlu1 %v6173_v1  ;;  %2163 = vperm.xlu0 %3127, %v2141_v30   ;;  %v3885_v30 = vld [vmem:[%s5938_s1 + $0x1] ss:$2 sm:$0x3]  ;;  %v529_v1 = vadd.s32 4294967295, %v367_v20 }
  0xf1   : > { %v3878_v63 = vpop.permute.xlu0 %997  ;;  %v3891_v37 = vadd.s32 4294967295, %v3885_v30  ;;  %v3904_v40 = vadd.s32 1, %v3885_v30  ;;  %vm744_vm4 = vcmp.ge.s32.totalorder %v3885_v30, 0  ;;  %vm746_vm9 = vcmp.lt.s32.totalorder %v3885_v30, 16 }
  0xf2   : > { %v3868_v27 = vpop.permute.xlu1 %2864  ;;  %6176 = vst [vmem:[#allocation40_spill] sm:$0xff] %v3878_v63  ;;  %vm530_vm0 = vcmp.ge.s32.totalorder %v529_v1, 0  ;;  %vm531_vm1 = vcmp.lt.s32.totalorder %v529_v1, 16 }
  0xf3   : > { %6175 = vst [vmem:[#allocation39_spill] sm:$0xff] %v3868_v27  ;;  %2984 = vrot.lane.b32.xlu1 %v3510_v19, %s3372_s24  ;;  %vm3898_vm2 = vmand %vm530_vm0, %vm531_vm1  ;;  %vm534_vm3 = vcmp.ge.s32.totalorder %v3891_v37, 0  ;;  %vm536_vm6 = vcmp.lt.s32.totalorder %v3891_v37, 16  ;;  %vm955_vm7 = vcmp.ge.s32.totalorder %v3904_v40, 0  ;;  %vm957_vm14 = vcmp.lt.s32.totalorder %v3904_v40, 16 }
  0xf4   : > { %vm535_vm5 = vmand %vm3898_vm2, %vm534_vm3 }
  0xf5   : > { %v3893_v26 = vpop.permute.xlu0 %3019  ;;  %vm745_vm8 = vmand %vm3898_vm2, %vm744_vm4 }
  0xf6   : > { %v3872_v13 = vpop.permute.xlu1 %2869  ;;  %6178 = vst [vmem:[#allocation41_spill] sm:$0xff] %v3893_v26  ;;  %v1584_v26 = vadd.s32 1, %v367_v20  ;;  %vm3929_vm10 = vmand %vm535_vm5, %vm536_vm6 }
  0xf7   : > { %798 = vperm.xlu1 %2989, %v3651_v44   ;;  %vm956_vm13 = vmand %vm3898_vm2, %vm955_vm7  ;;  %v2736_v6 = vsel %vm3929_vm10, 1.0, %v6012_v31 }
  0xf8   : > { %vm3947_vm15 = vmand %vm745_vm8, %vm746_vm9  ;;  %vm1585_vm0 = vcmp.ge.s32.totalorder %v1584_v26, 0  ;;  %vm1586_vm1 = vcmp.lt.s32.totalorder %v1584_v26, 16  ;;  %vm504_vm8 = vcmp.lt.s32.totalorder %v3938_v60, 17 }
  0xf9   : > { %v3909_v1 = vpop.permute.xlu0 %1009  ;;  %vm1167_vm5 = vmand %vm1165_vm11, %vm1166_vm12 }
  0xfa   : > { %v3880_v28 = vpop.permute.xlu1 %2064  ;;  %6182 = vst [vmem:[#allocation43_spill] sm:$0xff] %v3909_v1  ;;  %vm3962_vm2 = vmand %vm956_vm13, %vm957_vm14 }
  0xfb   : > { %2991 = vrot.lane.b32.xlu1 %v3734_v3, %s3376_s29  ;;  %vm3971_vm11 = vmand %vm1585_vm0, %vm1586_vm1  ;;  %vm719_vm0 = vcmp.lt.s32.totalorder %v3938_v60, 16 }
  0xfc   : > { %3000 = vset.pattern.permute.xlu1 %v6177_v11  ;;  %vm1168_vm10 = vmand %vm1167_vm5, %vm534_vm3  ;;  %v725_v52 = vsel %vm719_vm0, %v2798_v34, %v2803_v53 }
  0xfd   : > { %vm3982_vm12 = vmand %vm1167_vm5, %vm955_vm7 }
  0xfe   : > { %v3951_v20 = vpop.permute.xlu0 %1224  ;;  %vm1588_vm13 = vmand %vm3971_vm11, %vm534_vm3  ;;  %vm929_vm3 = vcmp.lt.s32.totalorder %v3938_v60, 15 }
  0xff   : > { %v3895_v63 = vpop.permute.xlu1 %372  ;;  %1628 = vperm.xlu1 %3000, %v3632_v41   ;;  %v6184_v41 = vmov 0   ;;  %6190 = vst [vmem:[#allocation46_spill] sm:$0xff] %v3951_v20  ;;  %vm4017_vm1 = vmand %vm3982_vm12, %vm957_vm14  ;;  %vm1559_vm12 = vcmp.lt.s32.totalorder %v3938_v60, 113  ;;  %v2867_v20 = vunpack.i.h.bf16 %v3868_v27 }
 0x100   : > { %6179 = vst [vmem:[#allocation42_spill] sm:$0xff] %v3895_v63  ;;  %vm4030_vm5 = vmand %vm1588_vm13, %vm536_vm6 }
 0x102   : > { %v3998_v36 = vpop.permute.xlu0 %1236 }
 0x103   : > { %3002 = vrot.lane.b32.xlu1 %v3545_v25, %s3374_s25  ;;  %6200 = vst [vmem:[#allocation49_spill] sm:$0xff] %v3998_v36 }
 0x104   : > { %v3911_v63 = vpop.permute.xlu1 %576  ;;  %3012 = vset.pattern.permute.xlu1 %v6184_v41 }
 0x105   : > { %6183 = vst [vmem:[#allocation44_spill] sm:$0xff] %v3911_v63  ;;  %v2146_v63 = vld [vmem:[%s5940_s3 + $0x38] sm:$0xff] }
 0x106   : > { %v4071_v4 = vpop.permute.xlu0 %1208 }
 0x107   : > { %3007 = vrot.lane.b32.xlu1 %v3510_v19, %s3374_s25  ;;  %v510_v19 = vsel %vm504_vm8, %v2787_v17, %v2793_v23  ;;  %6213 = vst [vmem:[#allocation54_spill] sm:$0xff] %v4071_v4 }
 0x108   : > { %v3933_v1 = vpop.permute.xlu1 %580 }
 0x109   : > { %6187 = vst [vmem:[#allocation45_spill] sm:$0xff] %v3933_v1  ;;  %v3953_v1 = vsub.s32 0, %v542_v39 }
 0x10b   : > { %2188 = vperm.xlu1 %3012, %v2146_v63   ;;  %v3969_v63 = vsub.s32 1, %v542_v39  ;;  %v3978_v25 = vrot.slane %v2736_v6, %v3953_v1  ;;  %v522_v39 = vsel %vm504_vm8, %v2793_v23, %v2787_v17 }
 0x10c   : > { %v3966_v26 = vpop.permute.xlu1 %2883 }
 0x10d   : > { %6193 = vst [vmem:[#allocation47_spill] sm:$0xff] %v3966_v26  ;;  %6196 = vst [vmem:[#allocation48_spill] sm:$0xff] %v3978_v25  ;;  %v6199_v26 = vmov 0.0   ;;  %v4004_v9 = vrot.slane %v2736_v6, %v3969_v63  ;;  %v561_v6 = vmul.f32 %v3978_v25, %v522_v39  ;;  %v737_v39 = vsel %vm719_vm0, %v2803_v53, %v2798_v34 }
 0x10e   : > { %v2737_v29 = vsel %vm3947_vm15, 1.0, %v6199_v26  ;;  %vm1169_vm15 = vmand %vm1168_vm10, %vm536_vm6  ;;  %v2738_v17 = vsel %vm3962_vm2, 1.0, %v6199_v26  ;;  %vm1140_vm10 = vcmp.lt.s32.totalorder %v3938_v60, 1  ;;  %vm1351_vm2 = vcmp.lt.s32.totalorder %v3938_v60, 127 }
 0x10f   : > { %3014 = vrot.lane.b32.xlu1 %v3750_v61, %s3367_s15  ;;  %6203 = vst [vmem:[#allocation51_spill] sm:$0xff] %v4004_v9  ;;  %v4036_v31 = vrot.slane %v2737_v29, %v3969_v63  ;;  %v2739_v36 = vsel %vm1169_vm15, 1.0, %v6199_v26  ;;  %v562_v37 = vmul.f32 %v4004_v9, %v510_v19  ;;  %vm4053_vm6 = vmand %vm3971_vm11, %vm744_vm4  ;;  %v4063_v53 = vrot.slane %v2738_v17, %v3953_v1 }
 0x110   : > { %v4000_v14 = vpop.permute.xlu1 %1444  ;;  %3023 = vset.pattern.permute.xlu1 %v6202_v58  ;;  %v2740_v34 = vsel %vm4017_vm1, 1.0, %v6199_v26  ;;  %v2741_v19 = vsel %vm4030_vm5, 1.0, %v6199_v26  ;;  %v633_v41 = vmul.f32 %v3675_v47, %v561_v6  ;;  %v2828_v9 = vunpack.i.h.bf16 %v3801_v8  ;;  %vm1797_vm13 = vmand %vm4053_vm6, %vm746_vm9 }
 0x111   : > { %6201 = vst [vmem:[#allocation50_spill] sm:$0xff] %v4000_v14  ;;  %v4023_v14 = vrot.slane %v2737_v29, %v3953_v1  ;;  %6208 = vst [vmem:[#allocation52_spill] sm:$0xff] %v4036_v31  ;;  %v6214_v25 = vunpack.c.h.bf16 %v3464_v5  ;;  %vm1771_vm4 = vcmp.lt.s32.totalorder %v3938_v60, 112  ;;  %v772_v23 = vmul.f32 %v4036_v31, %v725_v52 }
 0x112   : > { %v4084_v55 = vrot.slane %v2738_v17, %v3969_v63  ;;  %v4087_v6 = vrot.slane %v2739_v36, %v3953_v1  ;;  %v6218_v5 = vmov 7   ;;  %v935_v52 = vsel %vm929_vm3, %v2811_v56, %v2816_v15  ;;  %vm2004_vm9 = vmand %vm3971_vm11, %vm955_vm7 }
 0x113   : > { %1005 = vperm.xlu1 %3023, %v3590_v33   ;;  %v771_v45 = vmul.f32 %v4023_v14, %v737_v39  ;;  %v441_v58 = vmul.f32 %v3677_v48, %v6214_v25  ;;  %v634_v48 = vmul.f32 %v3675_v47, %v562_v37  ;;  %v2823_v25 = vunpack.i.h.bf16 %v3794_v24  ;;  %vm2005_vm7 = vmand %vm2004_vm9, %vm957_vm14 }
 0x114   : > { %v4042_v43 = vpop.permute.xlu1 %2889  ;;  %6215 = vst [vmem:[#allocation55_spill] sm:$0xff] %v4084_v55  ;;  %6216 = vst [vmem:[#allocation56_spill] sm:$0xff] %v4087_v6  ;;  %v947_v17 = vsel %vm929_vm3, %v2816_v15, %v2811_v56  ;;  %v4103_v4 = vrot.slane %v2739_v36, %v3969_v63  ;;  %v4106_v30 = vrot.slane %v2740_v34, %v3953_v1  ;;  %v2742_v15 = vsel %vm1797_vm13, 1.0, %v6199_v26 }
 0x115   : > { %6209 = vst [vmem:[#allocation53_spill] sm:$0xff] %v4042_v43  ;;  %v4109_v29 = vrot.slane %v2740_v34, %v3969_v63  ;;  %v1158_v47 = vsel %vm1140_vm10, %v2828_v9, %v2823_v25  ;;  %v657_v37 = vadd.f32 %v633_v41, %v440_v46  ;;  %v843_v24 = vmul.f32 %v3686_v50, %v771_v45 }
 0x116   : > { %v1146_v56 = vsel %vm1140_vm10, %v2823_v25, %v2828_v9  ;;  %v844_v36 = vmul.f32 %v3686_v50, %v772_v23  ;;  %v982_v34 = vmul.f32 %v4063_v53, %v947_v17  ;;  %v983_v8 = vmul.f32 %v4084_v55, %v935_v52 }
 0x117   : > { %3026 = vrot.lane.b32.xlu1 %v3734_v3, %s3375_s26  ;;  %v2850_v46 = vunpack.i.h.bf16 %v3835_v22  ;;  %v658_v41 = vadd.f32 %v634_v48, %v441_v58  ;;  %v2872_v9 = vunpack.i.h.bf16 %v3872_v13  ;;  %v2897_v50 = vunpack.i.h.bf16 %v3767_v12 }
 0x118   : > { %v4093_v39 = vpop.permute.xlu1 %786  ;;  %3035 = vset.pattern.permute.xlu1 %v6218_v5  ;;  %v4125_v5 = vpop.permute.xlu0 %3042  ;;  %v1193_v45 = vmul.f32 %v4087_v6, %v1158_v47  ;;  %v1054_v23 = vmul.f32 %v3854_v38, %v982_v34  ;;  %v1055_v25 = vmul.f32 %v3854_v38, %v983_v8  ;;  %v1194_v52 = vmul.f32 %v4103_v4, %v1146_v56 }
 0x119   : > { %6217 = vst [vmem:[#allocation57_spill] sm:$0xff] %v4093_v39  ;;  %v4112_v39 = vrot.slane %v2741_v19, %v3953_v1  ;;  %6220 = vst [vmem:[#allocation59_spill] sm:$0xff] %v4125_v5  ;;  %v2845_v17 = vunpack.i.h.bf16 %v3828_v0  ;;  %v2892_v5 = vunpack.i.h.bf16 %v4042_v43  ;;  %v867_v58 = vadd.f32 %v843_v24, %v657_v37 }
 0x11a   : > { %v868_v48 = vadd.f32 %v844_v36, %v658_v41  ;;  %v4147_v47 = vrot.slane %v2741_v19, %v3969_v63  ;;  %v4150_v8 = vrot.slane %v2742_v15, %v3953_v1  ;;  %v1565_v40 = vsel %vm1559_vm12, %v2867_v20, %v2872_v9 }
 0x11b   : > { %6219 = vst [vmem:[#allocation58_spill] sm:$0xff] %v4112_v39  ;;  %3031 = vrot.lane.b32.xlu1 %v3581_v32, %s3375_s26  ;;  %v1357_v56 = vsel %vm1351_vm2, %v2845_v17, %v2850_v46  ;;  %v1369_v34 = vsel %vm1351_vm2, %v2850_v46, %v2845_v17  ;;  %v1577_v24 = vsel %vm1559_vm12, %v2872_v9, %v2867_v20  ;;  %v2743_v43 = vsel %vm2005_vm7, 1.0, %v6199_v26 }
 0x11c   : > { %v4127_v31 = vpop.permute.xlu1 %2900  ;;  %6222 = vst [vmem:[#allocation61_spill] sm:$0xff] %v4147_v47  ;;  %6223 = vst [vmem:[#allocation62_spill] sm:$0xff] %v4150_v8  ;;  %v1078_v37 = vadd.f32 %v1054_v23, %v867_v58  ;;  %v1079_v19 = vadd.f32 %v1055_v25, %v868_v48  ;;  %v4162_v36 = vpop.permute.xlu0 %1220  ;;  %v4165_v41 = vrot.slane %v2742_v15, %v3969_v63  ;;  %vm1979_vm14 = vcmp.lt.s32.totalorder %v3938_v60, 111 }
 0x11d   : > { %6221 = vst [vmem:[#allocation60_spill] sm:$0xff] %v4127_v31  ;;  %6224 = vst [vmem:[#allocation63_spill] sm:$0xff] %v4162_v36  ;;  %v1265_v31 = vmul.f32 %v3726_v62, %v1193_v45  ;;  %v1266_v27 = vmul.f32 %v3726_v62, %v1194_v52  ;;  %v1777_v46 = vsel %vm1771_vm4, %v2892_v5, %v2897_v50  ;;  %v6227_v62 = vmov 3  }
 0x11e   : > { %6225 = vst [vmem:[#allocation64_spill] sm:$0xff] %v4165_v41  ;;  %v1789_v17 = vsel %vm1771_vm4, %v2897_v50, %v2892_v5  ;;  %v1401_v9 = vmul.f32 %v4106_v30, %v1357_v56  ;;  %v1402_v15 = vmul.f32 %v4109_v29, %v1369_v34  ;;  %v1613_v23 = vmul.f32 %v4112_v39, %v1565_v40 }
 0x11f   : > { %1840 = vperm.xlu1 %3035, %v3524_v21   ;;  %v1614_v26 = vmul.f32 %v4147_v47, %v1577_v24  ;;  %v1289_v25 = vadd.f32 %v1265_v31, %v1078_v37  ;;  %v1290_v52 = vadd.f32 %v1266_v27, %v1079_v19  ;;  %v1821_v20 = vmul.f32 %v4150_v8, %v1777_v46 }
 0x120   : > { %v4152_v38 = vpop.permute.xlu1 %2905  ;;  %v1822_v5 = vmul.f32 %v4165_v41, %v1789_v17  ;;  %v4188_v50 = vrot.slane %v2743_v43, %v3953_v1  ;;  %v4191_v58 = vrot.slane %v2743_v43, %v3969_v63  ;;  %v1473_v48 = vmul.f32 %v3778_v59, %v1401_v9  ;;  %v4197_v34 = vpop.permute.xlu0 %1432 }
 0x121   : > { %v1474_v56 = vmul.f32 %v3778_v59, %v1402_v15  ;;  %v1685_v27 = vmul.f32 %v3808_v35, %v1613_v23  ;;  %v1686_v31 = vmul.f32 %v3808_v35, %v1614_v26  ;;  %v2919_v24 = vunpack.i.h.bf16 %v3782_v16 }
 0x122   : > { %6228 = vst [vmem:[#allocation66_spill] sm:$0xff] %v4188_v50  ;;  %6229 = vst [vmem:[#allocation67_spill] sm:$0xff] %v4191_v58  ;;  %v1497_v37 = vadd.f32 %v1473_v48, %v1289_v25  ;;  %v1893_v63 = vmul.f32 %v3840_v2, %v1821_v20  ;;  %v1894_v43 = vmul.f32 %v3840_v2, %v1822_v5  ;;  %v6231_v26 = vmov 8  }
 0x123   : > { %3037 = vrot.lane.b32.xlu1 %v3750_v61, %s3370_s19  ;;  %v1498_v19 = vadd.f32 %v1474_v56, %v1290_v52  ;;  %vm2404_vm15 = vcmask 261120  }
 0x124   : > { %v4180_v45 = vpop.permute.xlu1 %1656  ;;  %3046 = vset.pattern.permute.xlu1 %v6227_v62  ;;  %v1709_v46 = vadd.f32 %v1685_v27, %v1497_v37  ;;  %v4216_v2 = vpop.permute.xlu0 %1440  ;;  %v6249_v62 = vmov 0  }
 0x125   : > { %6226 = vst [vmem:[#allocation65_spill] sm:$0xff] %v4180_v45  ;;  %v1710_v17 = vadd.f32 %v1686_v31, %v1498_v19  ;;  %6232 = vst [vmem:[#allocation69_spill] sm:$0xff] %v4216_v2 }
 0x126   : > { %v1917_v20 = vadd.f32 %v1893_v63, %v1709_v46 }
 0x127   : > { %1216 = vperm.xlu1 %3046, %v3590_v33   ;;  %v1918_v5 = vadd.f32 %v1894_v43, %v1710_v17 }
 0x128   : > { %v4199_v40 = vpop.permute.xlu1 %2911 }
 0x129   : > { %v2914_v1 = vunpack.i.h.bf16 %v4199_v40 }
 0x12b   : > { %v1985_v59 = vsel %vm1979_vm14, %v2914_v1, %v2919_v24  ;;  %v1997_v35 = vsel %vm1979_vm14, %v2919_v24, %v2914_v1  ;;  %3049 = vrot.lane.b32.xlu1 %v3734_v3, %s3378_s30  ;;  %v4231_v1 = vpop.permute.xlu0 %1420 }
 0x12c   : > { %v2029_v9 = vmul.f32 %v4188_v50, %v1985_v59  ;;  %v2030_v15 = vmul.f32 %v4191_v58, %v1997_v35  ;;  %v4213_v23 = vpop.permute.xlu1 %2173  ;;  %3058 = vset.pattern.permute.xlu1 %v6231_v26  ;;  %6236 = vst [vmem:[#allocation73_spill] sm:$0xff] %v4231_v1 }
 0x12d   : > { %6230 = vst [vmem:[#allocation68_spill] sm:$0xff] %v4213_v23  ;;  %v6268_v23 = vld [vmem:[#allocation3_spill] sm:$0xff] }
 0x12e   : > { %v2101_v25 = vmul.f32 %v3880_v28, %v2029_v9  ;;  %v2102_v52 = vmul.f32 %v3880_v28, %v2030_v15  ;;  %v2792_v9 = vunpack.i.l.bf16 %v3683_v49  ;;  %v2786_v15 = vunpack.i.l.bf16 %v3690_v51 }
 0x12f   : > { %3054 = vrot.lane.b32.xlu1 %v3581_v32, %s3378_s30  ;;  %v2815_v49 = vunpack.i.l.bf16 %v3769_v10 }
 0x130   : > { %v4222_v48 = vpop.permute.xlu1 %2922  ;;  %v2125_v56 = vadd.f32 %v2101_v25, %v1917_v20  ;;  %v2126_v27 = vadd.f32 %v2102_v52, %v1918_v5  ;;  %v521_v20 = vsel %vm504_vm8, %v2792_v9, %v2786_v15  ;;  %v2802_v5 = vunpack.i.l.bf16 %v3712_v57  ;;  %v2139_v57 = vld [vmem:[%s5940_s3] sm:$0xff] }
 0x131   : > { %6233 = vst [vmem:[#allocation70_spill] sm:$0xff] %v4222_v48 }
 0x132   : > { %v4225_v31 = vadd.f32 %v3820_v18, %v2125_v56  ;;  %v4228_v24 = vadd.f32 %v3820_v18, %v2126_v27  ;;  %v4244_v18 = vpop.permute.xlu0 %3065  ;;  %v2810_v56 = vunpack.i.l.bf16 %v3700_v54  ;;  %v6246_v27 = vld [vmem:[#allocation13_spill] sm:$0xff] }
 0x133   : > { %2048 = vperm.xlu1 %3058, %v3524_v21   ;;  %6239 = vst [vmem:[#allocation76_spill] sm:$0xff] %v4244_v18  ;;  %v2797_v51 = vunpack.i.l.bf16 %v6246_v27  ;;  %v6258_v18 = vld [vmem:[#allocation4_spill] sm:$0xff] }
 0x134   : > { %6234 = vst [vmem:[#allocation71_spill] sm:$0xff] %v4225_v31  ;;  %6235 = vst [vmem:[#allocation72_spill] sm:$0xff] %v4228_v24  ;;  %v4233_v28 = vpop.permute.xlu1 %2927  ;;  %v2245_v37 = vmul.f32 %v4225_v31, %v4225_v31  ;;  %v2246_v19 = vmul.f32 %v4228_v24, %v4228_v24 }
 0x135   : > { %6237 = vst [vmem:[#allocation74_spill] sm:$0xff] %v4233_v28  ;;  %v724_v54 = vsel %vm719_vm0, %v2797_v51, %v2802_v5  ;;  %v736_v10 = vsel %vm719_vm0, %v2802_v5, %v2797_v51  ;;  %v6256_v51 = vld [vmem:[#allocation52_spill] sm:$0xff] }
 0x136   : > { %v2266_v63 = vadd.f32 %v2246_v19, %v2245_v37  ;;  %v4251_v59 = vpop.permute.xlu0 %1428  ;;  %v6247_v37 = vld [vmem:[#allocation48_spill] sm:$0xff]  ;;  %v769_v5 = vmul.f32 %v4023_v14, %v736_v10  ;;  %v6263_v10 = vld [vmem:[#allocation31_spill] sm:$0xff] }
 0x137   : > { %3060 = vrot.lane.b32.xlu1 %v3750_v61, %s3369_s18  ;;  %6240 = vst [vmem:[#allocation77_spill] sm:$0xff] %v4251_v59  ;;  %v559_v19 = vmul.f32 %v6247_v37, %v521_v20  ;;  %v6253_v20 = vld [vmem:[#allocation10_spill] sm:$0xff]  ;;  %v6255_v59 = vld [vmem:[#allocation9_spill] sm:$0xff]  ;;  %v2833_v48 = vunpack.i.l.bf16 %v6263_v10 }
 0x138   : > { %2267 = vadd.xlane.f32.xlu0 %v2266_v63  ;;  %v4241_v43 = vpop.permute.xlu1 %1001  ;;  %3069 = vset.pattern.permute.xlu1 %v6170_v7  ;;  %v6248_v63 = vld [vmem:[#allocation51_spill] sm:$0xff] }
 0x139   : > { %6238 = vst [vmem:[#allocation75_spill] sm:$0xff] %v4241_v43  ;;  %v631_v36 = vmul.f32 %v6255_v59, %v559_v19 }
 0x13a   : > { %v4260_v17 = vpop.permute.xlu0 %1644 }
 0x13b   : > { %1424 = vperm.xlu1 %3069, %v3590_v33  }
 0x13c   : > { %v4247_v21 = vpop.permute.xlu1 %2933 }
 0x13e   : > { %v4269_v25 = vpop.permute.xlu0 %1652 }
 0x13f   : > { %3072 = vrot.lane.b32.xlu1 %v3734_v3, %s3372_s24  ;;  %6244 = vst [vmem:[#allocation81_spill] sm:$0xff] %v4269_v25 }
 0x140   : > { %v4253_v35 = vpop.permute.xlu1 %1860  ;;  %3092 = vset.pattern.permute.xlu1 %v6177_v11 }
 0x141   : > { %6241 = vst [vmem:[#allocation78_spill] sm:$0xff] %v4253_v35  ;;  %v6270_v35 = vld [vmem:[#allocation18_spill] sm:$0xff] }
 0x143   : > { %3077 = vrot.lane.b32.xlu1 %v3581_v32, %s3372_s24  ;;  %v509_v32 = vsel %vm504_vm8, %v2786_v15, %v2792_v9  ;;  %v4297_v9 = vpop.permute.xlu0 %1632  ;;  %v6251_v15 = vld [vmem:[#allocation2_spill] sm:$0xff] }
 0x144   : > { %v4258_v46 = vpop.permute.xlu1 %2944  ;;  %v560_v11 = vmul.f32 %v6248_v63, %v509_v32  ;;  %6250 = vst [vmem:[#allocation13_spill] sm:$0xff] %v4297_v9  ;;  %v6252_v32 = vunpack.c.l.bf16 %v6251_v15  ;;  %v6254_v31 = vunpack.c.h.bf16 %v6251_v15  ;;  %v934_v9 = vsel %vm929_vm3, %v2810_v56, %v2815_v49 }
 0x145   : > { %6242 = vst [vmem:[#allocation79_spill] sm:$0xff] %v4258_v46  ;;  %v6259_v15 = vunpack.c.l.bf16 %v6258_v18  ;;  %v6260_v46 = vld [vmem:[#allocation11_spill] sm:$0xff] }
 0x146   : > { %v438_v27 = vmul.f32 %v6253_v20, %v6252_v32  ;;  %v439_v24 = vmul.f32 %v6253_v20, %v6254_v31  ;;  %v632_v1 = vmul.f32 %v6255_v59, %v560_v11  ;;  %v6262_v20 = vld [vmem:[#allocation17_spill] sm:$0xff] }
 0x147   : > { %3087 = vrot.lane.b32.xlu1 %v3641_v42, %s3376_s29  ;;  %v4317_v31 = vmul.f32 %v6260_v46, %v6259_v15  ;;  %v841_v11 = vmul.f32 %v6262_v20, %v769_v5  ;;  %v981_v5 = vmul.f32 %v4084_v55, %v934_v9  ;;  %v4333_v28 = vpop.permute.xlu0 %3082 }
 0x148   : > { %v4264_v33 = vpop.permute.xlu1 %2949  ;;  %v656_v15 = vadd.f32 %v632_v1, %v439_v24  ;;  %6265 = vst [vmem:[#allocation10_spill] sm:$0xff] %v4333_v28  ;;  %v6273_v1 = vunpack.c.h.bf16 %v6268_v23 }
 0x149   : > { %6243 = vst [vmem:[#allocation80_spill] sm:$0xff] %v4264_v33  ;;  %v2834_v33 = vunpack.i.h.bf16 %v6263_v10 }
 0x14a   : > { %v443_v9 = vmul.f32 %v6270_v35, %v6273_v1 }
 0x14b   : > { %1640 = vperm.xlu1 %3092, %v3651_v44  }
 0x14c   : > { %v4271_v52 = vpop.permute.xlu1 %1212 }
 0x14d   : > { %6245 = vst [vmem:[#allocation82_spill] sm:$0xff] %v4271_v52  ;;  %v770_v52 = vmul.f32 %v6256_v51, %v724_v54 }
 0x14f   : > { %3094 = vrot.lane.b32.xlu1 %v3734_v3, %s3374_s25  ;;  %v946_v3 = vsel %vm929_vm3, %v2815_v49, %v2810_v56  ;;  %v842_v59 = vmul.f32 %v6262_v20, %v770_v52  ;;  %v6264_v56 = vunpack.c.h.bf16 %v6258_v18  ;;  %v6266_v52 = vmov 7   ;;  %v6271_v18 = vld [vmem:[#allocation12_spill] sm:$0xff] }
 0x150   : > { %v4285_v7 = vpop.permute.xlu1 %2955  ;;  %3103 = vset.pattern.permute.xlu1 %v6249_v62  ;;  %v980_v32 = vmul.f32 %v4063_v53, %v946_v3  ;;  %v655_v3 = vadd.f32 %v631_v36, %v438_v27  ;;  %v6274_v27 = vld [vmem:[#allocation21_spill] sm:$0xff] }
 0x151   : > { %v4330_v49 = vmul.f32 %v6260_v46, %v6264_v56  ;;  %v866_v24 = vadd.f32 %v842_v59, %v656_v15  ;;  %v1053_v59 = vmul.f32 %v6271_v18, %v981_v5 }
 0x152   : > { %v1052_v46 = vmul.f32 %v6271_v18, %v980_v32  ;;  %v865_v36 = vadd.f32 %v841_v11, %v655_v3  ;;  %v6275_v32 = vld [vmem:[#allocation36_spill] sm:$0xff] }
 0x153   : > { %2153 = vperm.xlu1 %3103, %v2139_v57   ;;  %v6261_v57 = vld [vmem:[#allocation14_spill] sm:$0xff]  ;;  %v2855_v25 = vunpack.i.l.bf16 %v6275_v32  ;;  %v2856_v15 = vunpack.i.h.bf16 %v6275_v32  ;;  %v6281_v32 = vld [vmem:[#allocation27_spill] sm:$0xff] }
 0x154   : > { %v4309_v43 = vpop.permute.xlu1 %2068  ;;  %v2839_v19 = vunpack.i.h.bf16 %v6261_v57  ;;  %v2838_v54 = vunpack.i.l.bf16 %v6261_v57  ;;  %v6267_v57 = vld [vmem:[#allocation15_spill] sm:$0xff]  ;;  %v4367_v1 = vadd.f32 %v1052_v46, %v865_v36  ;;  %v6280_v36 = vld [vmem:[#allocation25_spill] sm:$0xff] }
 0x155   : > { %6257 = vst [vmem:[#allocation2_spill] sm:$0xff] %v4309_v43  ;;  %v2861_v20 = vunpack.i.h.bf16 %v6267_v57  ;;  %v2860_v10 = vunpack.i.l.bf16 %v6267_v57  ;;  %v6269_v43 = vunpack.c.l.bf16 %v6268_v23  ;;  %v2880_v23 = vunpack.i.l.bf16 %v6274_v27 }
 0x156   : > { %v512_v57 = vsel %vm504_vm8, %v2834_v33, %v2839_v19  ;;  %v524_v28 = vsel %vm504_vm8, %v2839_v19, %v2834_v33  ;;  %v511_v11 = vsel %vm504_vm8, %v2833_v48, %v2838_v54  ;;  %v6276_v33 = vld [vmem:[#allocation28_spill] sm:$0xff] }
 0x157   : > { %3105 = vrot.lane.b32.xlu1 %v3750_v61, %s3375_s26  ;;  %v4341_v45 = vmul.f32 %v6270_v35, %v6269_v43  ;;  %v523_v43 = vsel %vm504_vm8, %v2838_v54, %v2833_v48  ;;  %v2827_v19 = vunpack.i.l.bf16 %v6276_v33  ;;  %v565_v2 = vmul.f32 %v6247_v37, %v524_v28  ;;  %v4375_v54 = vpop.permute.xlu0 %1636  ;;  %v6284_v28 = vld [vmem:[#allocation20_spill] sm:$0xff] }
 0x158   : > { %3115 = vset.pattern.permute.xlu1 %v6266_v52  ;;  %v566_v35 = vmul.f32 %v6248_v63, %v512_v57  ;;  %v563_v48 = vmul.f32 %v6247_v37, %v523_v43  ;;  %6279 = vst [vmem:[#allocation4_spill] sm:$0xff] %v4375_v54  ;;  %v564_v5 = vmul.f32 %v6248_v63, %v511_v11  ;;  %v2849_v43 = vunpack.i.l.bf16 %v3835_v22 }
 0x159   : > { %v4344_v56 = vpop.permute.xlu1 %382  ;;  %v726_v18 = vsel %vm719_vm0, %v2855_v25, %v2860_v10  ;;  %v738_v46 = vsel %vm719_vm0, %v2860_v10, %v2855_v25  ;;  %v4386_v33 = vadd.f32 %v1053_v59, %v866_v24  ;;  %v739_v11 = vsel %vm719_vm0, %v2861_v20, %v2856_v15 }
 0x15a   : > { %6272 = vst [vmem:[#allocation9_spill] sm:$0xff] %v4344_v56  ;;  %v6278_v56 = vld [vmem:[#allocation26_spill] sm:$0xff]  ;;  %v773_v57 = vmul.f32 %v4023_v14, %v738_v46  ;;  %v774_v24 = vmul.f32 %v6256_v51, %v726_v18  ;;  %v635_v54 = vmul.f32 %v6284_v28, %v563_v48  ;;  %v2844_v63 = vunpack.i.l.bf16 %v3828_v0 }
 0x15b   : > { %3110 = vrot.lane.b32.xlu1 %v3641_v42, %s3375_s26  ;;  %v2822_v58 = vunpack.i.l.bf16 %v6278_v56  ;;  %v727_v56 = vsel %vm719_vm0, %v2856_v15, %v2861_v20  ;;  %v4412_v18 = vpop.permute.xlu0 %1852 }
 0x15d   : > { %v4369_v52 = vpop.permute.xlu1 %387  ;;  %v1145_v3 = vsel %vm1140_vm10, %v2822_v58, %v2827_v19  ;;  %v1157_v25 = vsel %vm1140_vm10, %v2827_v19, %v2822_v58  ;;  %v6285_v19 = vld [vmem:[#allocation47_spill] sm:$0xff] }
 0x15e   : > { %6277 = vst [vmem:[#allocation52_spill] sm:$0xff] %v4369_v52  ;;  %v636_v52 = vmul.f32 %v6284_v28, %v564_v5  ;;  %v1191_v20 = vmul.f32 %v4087_v6, %v1157_v25  ;;  %v2885_v15 = vunpack.i.l.bf16 %v6285_v19  ;;  %v1192_v48 = vmul.f32 %v4103_v4, %v1145_v3  ;;  %v6286_v28 = vld [vmem:[#allocation24_spill] sm:$0xff] }
 0x15f   : > { %1848 = vperm.xlu1 %3115, %v3651_v44   ;;  %v6282_v44 = vld [vmem:[#allocation22_spill] sm:$0xff]  ;;  %v2886_v0 = vunpack.i.h.bf16 %v6285_v19  ;;  %v1356_v5 = vsel %vm1351_vm2, %v2844_v63, %v2849_v43  ;;  %v846_v25 = vmul.f32 %v6286_v28, %v774_v24  ;;  %v659_v3 = vadd.f32 %v635_v54, %v4341_v45  ;;  %v3355_v19 = vld [vmem:[%s5939_s2 + $0x10] sm:$0xff] }
 0x160   : > { %v637_v10 = vmul.f32 %v6282_v44, %v565_v2  ;;  %v638_v22 = vmul.f32 %v6282_v44, %v566_v35  ;;  %v775_v2 = vmul.f32 %v4023_v14, %v739_v11  ;;  %v776_v35 = vmul.f32 %v6256_v51, %v727_v56 }
 0x161   : > { %v845_v11 = vmul.f32 %v6286_v28, %v773_v57  ;;  %v1368_v44 = vsel %vm1351_vm2, %v2849_v43, %v2844_v63  ;;  %v936_v57 = vsel %vm929_vm3, %v2880_v23, %v2885_v15  ;;  %v948_v63 = vsel %vm929_vm3, %v2885_v15, %v2880_v23  ;;  %v4446_v28 = vpop.permute.xlu0 %1864  ;;  %v6289_v15 = vld [vmem:[#allocation39_spill] sm:$0xff] }
 0x162   : > { %v4400_v59 = vpop.permute.xlu1 %588  ;;  %v661_v46 = vadd.f32 %v637_v10, %v4317_v31  ;;  %v662_v56 = vadd.f32 %v638_v22, %v4330_v49  ;;  %v6287_v31 = vld [vmem:[#allocation19_spill] sm:$0xff]  ;;  %v1399_v43 = vmul.f32 %v4106_v30, %v1356_v5  ;;  %v2871_v45 = vunpack.i.l.bf16 %v3872_v13 }
 0x163   : > { %6283 = vst [vmem:[#allocation11_spill] sm:$0xff] %v4400_v59  ;;  %3117 = vrot.lane.b32.xlu1 %v3750_v61, %s3378_s30  ;;  %v847_v10 = vmul.f32 %v6287_v31, %v775_v2  ;;  %v848_v49 = vmul.f32 %v6287_v31, %v776_v35  ;;  %v1400_v54 = vmul.f32 %v4109_v29, %v1368_v44  ;;  %v2907_v2 = vunpack.i.l.bf16 %v4152_v38 }
 0x164   : > { %3126 = vset.pattern.permute.xlu1 %v6231_v26  ;;  %v660_v26 = vadd.f32 %v636_v52, %v443_v9  ;;  %v6288_v52 = vunpack.i.h.bf16 %v6274_v27  ;;  %v869_v24 = vadd.f32 %v845_v11, %v659_v3  ;;  %v2866_v5 = vunpack.i.l.bf16 %v6289_v15 }
 0x165   : > { %v985_v31 = vmul.f32 %v4084_v55, %v936_v57  ;;  %v2908_v3 = vunpack.i.h.bf16 %v4152_v38  ;;  %v872_v27 = vadd.f32 %v848_v49, %v662_v56  ;;  %v6293_v56 = vld [vmem:[#allocation32_spill] sm:$0xff] }
 0x166   : > { %v4425_v58 = vpop.permute.xlu1 %2968  ;;  %v949_v9 = vsel %vm929_vm3, %v2886_v0, %v6288_v52  ;;  %v870_v22 = vadd.f32 %v846_v25, %v660_v26  ;;  %v6290_v35 = vmov %v6288_v52  ;;  %v871_v26 = vadd.f32 %v847_v10, %v661_v46  ;;  %v6291_v25 = vld [vmem:[#allocation60_spill] sm:$0xff]  ;;  %v6292_v52 = vld [vmem:[#allocation46_spill] sm:$0xff] }
 0x167   : > { %2052 = vperm.xlu1 %3126, %v3355_v19   ;;  %v937_v13 = vsel %vm929_vm3, %v6290_v35, %v2886_v0  ;;  %v984_v19 = vmul.f32 %v4063_v53, %v948_v63  ;;  %v986_v11 = vmul.f32 %v4063_v53, %v949_v9  ;;  %v2902_v44 = vunpack.i.l.bf16 %v6291_v25  ;;  %v6294_v35 = vld [vmem:[#allocation38_spill] sm:$0xff] }
 0x168   : > { %v1263_v15 = vmul.f32 %v6292_v52, %v1191_v20  ;;  %v1564_v0 = vsel %vm1559_vm12, %v2866_v5, %v2871_v45  ;;  %v987_v57 = vmul.f32 %v4084_v55, %v937_v13  ;;  %v2903_v63 = vunpack.i.h.bf16 %v6291_v25  ;;  %v6295_v25 = vld [vmem:[#allocation53_spill] sm:$0xff] }
 0x169   : > { %v1576_v46 = vsel %vm1559_vm12, %v2871_v45, %v2866_v5  ;;  %v1264_v38 = vmul.f32 %v6292_v52, %v1192_v48  ;;  %v1056_v49 = vmul.f32 %v6293_v56, %v984_v19  ;;  %v1057_v20 = vmul.f32 %v6293_v56, %v985_v31  ;;  %v4487_v5 = vpop.permute.xlu0 %1836 }
 0x16a   : > { %v4448_v23 = vpop.permute.xlu1 %1416  ;;  %v1147_v9 = vsel %vm1140_vm10, %v2902_v44, %v2907_v2  ;;  %v1058_v13 = vmul.f32 %v6294_v35, %v986_v11  ;;  %v1148_v45 = vsel %vm1140_vm10, %v2903_v63, %v2908_v3  ;;  %v1160_v48 = vsel %vm1140_vm10, %v2908_v3, %v2903_v63 }
 0x16b   : > { %3129 = vrot.lane.b32.xlu1 %v3750_v61, %s3372_s24  ;;  %v1159_v61 = vsel %vm1140_vm10, %v2907_v2, %v2902_v44  ;;  %v1287_v19 = vadd.f32 %v1263_v15, %v4367_v1  ;;  %v1611_v2 = vmul.f32 %v4112_v39, %v1564_v0  ;;  %v1612_v44 = vmul.f32 %v4147_v47, %v1576_v46 }
 0x16c   : > { %3148 = vset.pattern.permute.xlu1 %v6249_v62  ;;  %v2891_v62 = vunpack.i.l.bf16 %v6295_v25  ;;  %v1195_v31 = vmul.f32 %v4087_v6, %v1159_v61  ;;  %v1059_v11 = vmul.f32 %v6294_v35, %v987_v57  ;;  %v1471_v52 = vmul.f32 %v4197_v34, %v1399_v43  ;;  %v6297_v61 = vld [vmem:[#allocation37_spill] sm:$0xff] }
 0x16d   : > { %v1472_v56 = vmul.f32 %v4197_v34, %v1400_v54  ;;  %v1196_v25 = vmul.f32 %v4103_v4, %v1147_v9  ;;  %v1288_v3 = vadd.f32 %v1264_v38, %v4386_v33  ;;  %v1197_v1 = vmul.f32 %v4087_v6, %v1160_v48  ;;  %v2142_v33 = vld [vmem:[%s5940_s3 + $0x18] sm:$0xff]  ;;  %v4520_v35 = vpop.permute.xlu0 %3099 }
 0x16e   : > { %v4472_v10 = vpop.permute.xlu1 %2979  ;;  %v1198_v15 = vmul.f32 %v4103_v4, %v1148_v45  ;;  %v2935_v0 = vunpack.i.l.bf16 %v4247_v21  ;;  %v1080_v57 = vadd.f32 %v1056_v49, %v869_v24  ;;  %v1081_v63 = vadd.f32 %v1057_v20, %v870_v22  ;;  %v6299_v45 = vld [vmem:[#allocation49_spill] sm:$0xff] }
 0x16f   : > { %3134 = vrot.lane.b32.xlu1 %v3641_v42, %s3372_s24  ;;  %v1082_v43 = vadd.f32 %v1058_v13, %v871_v26  ;;  %v6296_v34 = vunpack.i.l.bf16 %v3767_v12  ;;  %v1267_v46 = vmul.f32 %v6297_v61, %v1195_v31  ;;  %v2913_v38 = vunpack.i.l.bf16 %v4199_v40 }
 0x170   : > { %v2936_v9 = vunpack.i.h.bf16 %v4247_v21  ;;  %v1083_v22 = vadd.f32 %v1059_v11, %v872_v27  ;;  %v1495_v26 = vadd.f32 %v1471_v52, %v1287_v19  ;;  %v1496_v49 = vadd.f32 %v1472_v56, %v1288_v3 }
 0x171   : > { %v1776_v54 = vsel %vm1771_vm4, %v2891_v62, %v6296_v34  ;;  %v1268_v20 = vmul.f32 %v6297_v61, %v1196_v25  ;;  %v1269_v48 = vmul.f32 %v6299_v45, %v1197_v1  ;;  %v1270_v40 = vmul.f32 %v6299_v45, %v1198_v15 }
 0x172   : > { %v4497_v59 = vpop.permute.xlu1 %2984  ;;  %v6300_v21 = vunpack.i.l.bf16 %v6280_v36  ;;  %v1683_v19 = vmul.f32 %v4260_v17, %v1611_v2  ;;  %v1684_v31 = vmul.f32 %v4260_v17, %v1612_v44  ;;  %v1819_v11 = vmul.f32 %v4150_v8, %v1776_v54 }
 0x173   : > { %3144 = vrot.lane.b32.xlu1 %v3641_v42, %s3374_s25  ;;  %v6298_v42 = vmov %v6296_v34  ;;  %v1291_v56 = vadd.f32 %v1267_v46, %v1080_v57  ;;  %v6302_v25 = vunpack.i.h.bf16 %v6280_v36  ;;  %v2957_v1 = vunpack.i.l.bf16 %v4285_v7 }
 0x174   : > { %v1788_v24 = vsel %vm1771_vm4, %v6298_v42, %v2891_v62  ;;  %v1358_v12 = vsel %vm1351_vm2, %v2935_v0, %v6300_v21  ;;  %v6301_v62 = vmov %v6300_v21  ;;  %v6303_v15 = vunpack.i.l.bf16 %v3782_v16 }
 0x175   : > { %v1370_v27 = vsel %vm1351_vm2, %v6301_v62, %v2935_v0  ;;  %v1820_v52 = vmul.f32 %v4165_v41, %v1788_v24  ;;  %v1359_v3 = vsel %vm1351_vm2, %v2936_v9, %v6302_v25  ;;  %v1292_v2 = vadd.f32 %v1268_v20, %v1081_v63 }
 0x176   : > { %v4522_v13 = vpop.permute.xlu1 %798  ;;  %v1984_v0 = vsel %vm1979_vm14, %v2913_v38, %v6303_v15  ;;  %v6304_v17 = vmov %v6302_v25  ;;  %v1403_v57 = vmul.f32 %v4106_v30, %v1358_v12  ;;  %v1404_v34 = vmul.f32 %v4109_v29, %v1370_v27 }
 0x177   : > { %2168 = vperm.xlu1 %3148, %v2142_v33   ;;  %v1371_v44 = vsel %vm1351_vm2, %v6304_v17, %v2936_v9  ;;  %v2958_v33 = vunpack.i.h.bf16 %v4285_v7  ;;  %v6305_v61 = vmov %v6303_v15  ;;  %v1293_v42 = vadd.f32 %v1269_v48, %v1082_v43  ;;  %v4561_v9 = vpop.permute.xlu0 %1844  ;;  %v6312_v15 = vld [vmem:[#allocation50_spill] sm:$0xff] }
 0x178   : > { %v1996_v46 = vsel %vm1979_vm14, %v6305_v61, %v2913_v38  ;;  %v1294_v63 = vadd.f32 %v1270_v40, %v1083_v22  ;;  %v1707_v24 = vadd.f32 %v1683_v19, %v1495_v26  ;;  %v1708_v36 = vadd.f32 %v1684_v31, %v1496_v49  ;;  %6306 = vst [vmem:[#allocation14_spill] sm:$0xff] %v4561_v9  ;;  %v6309_v22 = vld [vmem:[#allocation69_spill] sm:$0xff] }
 0x179   : > { %v1405_v20 = vmul.f32 %v4106_v30, %v1359_v3  ;;  %v2027_v45 = vmul.f32 %v4188_v50, %v1984_v0  ;;  %v1406_v21 = vmul.f32 %v4109_v29, %v1371_v44  ;;  %v6307_v12 = vunpack.i.l.bf16 %v6281_v32  ;;  %v6313_v0 = vld [vmem:[#allocation67_spill] sm:$0xff] }
 0x17a   : > { %v4553_v54 = vpop.permute.xlu1 %2991  ;;  %v2986_v38 = vunpack.i.l.bf16 %v4497_v59  ;;  %v1475_v26 = vmul.f32 %v6309_v22, %v1403_v57  ;;  %v1476_v49 = vmul.f32 %v6309_v22, %v1404_v34  ;;  %v1891_v48 = vmul.f32 %v4412_v18, %v1819_v11 }
 0x17b   : > { %v1566_v7 = vsel %vm1559_vm12, %v2957_v1, %v6307_v12  ;;  %v6308_v16 = vmov %v6307_v12  ;;  %v1892_v40 = vmul.f32 %v4412_v18, %v1820_v52  ;;  %v6310_v27 = vunpack.i.h.bf16 %v6281_v32  ;;  %v2061_v12 = vpop.permute.xlu0 %2060 }
 0x17c   : > { %v1578_v43 = vsel %vm1559_vm12, %v6308_v16, %v2957_v1  ;;  %v2981_v3 = vunpack.i.l.bf16 %v4472_v10  ;;  %v2987_v1 = vunpack.i.h.bf16 %v4497_v59  ;;  %v1477_v11 = vmul.f32 %v6312_v15, %v1405_v20 }
 0x17d   : > { %v1567_v19 = vsel %vm1559_vm12, %v2958_v33, %v6310_v27  ;;  %v6311_v31 = vmov %v6310_v27  ;;  %v1615_v18 = vmul.f32 %v4112_v39, %v1566_v7  ;;  %v1616_v52 = vmul.f32 %v4147_v47, %v1578_v43  ;;  %v6314_v43 = vld [vmem:[#allocation81_spill] sm:$0xff] }
 0x17e   : > { %v4578_v62 = vpop.permute.xlu1 %1628  ;;  %v1579_v25 = vsel %vm1559_vm12, %v6311_v31, %v2958_v33  ;;  %v2028_v17 = vmul.f32 %v6313_v0, %v1996_v46  ;;  %v1478_v44 = vmul.f32 %v6312_v15, %v1406_v21  ;;  %v2982_v57 = vunpack.i.h.bf16 %v4472_v10 }
 0x17f   : > { %v1778_v32 = vsel %vm1771_vm4, %v2981_v3, %v2986_v38  ;;  %v1790_v34 = vsel %vm1771_vm4, %v2986_v38, %v2981_v3  ;;  %v1915_v33 = vadd.f32 %v1891_v48, %v1707_v24  ;;  %v1916_v59 = vadd.f32 %v1892_v40, %v1708_v36 }
 0x180   : > { %v1617_v61 = vmul.f32 %v4112_v39, %v1567_v19  ;;  %v1618_v20 = vmul.f32 %v4147_v47, %v1579_v25  ;;  %v1499_v16 = vadd.f32 %v1475_v26, %v1291_v56  ;;  %v1500_v46 = vadd.f32 %v1476_v49, %v1292_v2  ;;  %v6315_v49 = vld [vmem:[#allocation65_spill] sm:$0xff] }
 0x181   : > { %v1779_v21 = vsel %vm1771_vm4, %v2982_v57, %v2987_v1  ;;  %v1791_v10 = vsel %vm1771_vm4, %v2987_v1, %v2982_v57  ;;  %v1687_v22 = vmul.f32 %v6314_v43, %v1615_v18  ;;  %v1688_v38 = vmul.f32 %v6314_v43, %v1616_v52 }
 0x182   : > { %v3003_v7 = vpop.permute.xlu1 %3002  ;;  %v1823_v24 = vmul.f32 %v4150_v8, %v1778_v32  ;;  %v1824_v36 = vmul.f32 %v4165_v41, %v1790_v34  ;;  %v2099_v48 = vmul.f32 %v2061_v12, %v2027_v45  ;;  %v2100_v40 = vmul.f32 %v2061_v12, %v2028_v17  ;;  %v6316_v32 = vld [vmem:[#allocation78_spill] sm:$0xff]  ;;  %v2073_v12 = vpop.permute.xlu0 %2072 }
 0x183   : > { %v1501_v27 = vadd.f32 %v1477_v11, %v1293_v42  ;;  %v1502_v19 = vadd.f32 %v1478_v44, %v1294_v63  ;;  %v1825_v56 = vmul.f32 %v4150_v8, %v1779_v21  ;;  %v1826_v2 = vmul.f32 %v4165_v41, %v1791_v10 }
 0x184   : > { %v1689_v31 = vmul.f32 %v6315_v49, %v1617_v61  ;;  %v1690_v25 = vmul.f32 %v6315_v49, %v1618_v20  ;;  %v3005_v3 = vunpack.i.h.bf16 %v3003_v7  ;;  %v3004_v1 = vunpack.i.l.bf16 %v3003_v7 }
 0x185   : > { %v1711_v52 = vadd.f32 %v1687_v22, %v1499_v16  ;;  %v1712_v57 = vadd.f32 %v1688_v38, %v1500_v46  ;;  %v1895_v45 = vmul.f32 %v6316_v32, %v1823_v24  ;;  %v1896_v42 = vmul.f32 %v6316_v32, %v1824_v36  ;;  %v6317_v22 = vld [vmem:[#allocation2_spill] sm:$0xff] }
 0x186   : > { %v3008_v26 = vpop.permute.xlu1 %3007  ;;  %v2123_v46 = vadd.f32 %v2099_v48, %v1915_v33  ;;  %v2124_v21 = vadd.f32 %v2100_v40, %v1916_v59  ;;  %v1897_v10 = vmul.f32 %v4446_v28, %v1825_v56  ;;  %v1898_v43 = vmul.f32 %v4446_v28, %v1826_v2  ;;  %v6318_v48 = vld [vmem:[#allocation68_spill] sm:$0xff]  ;;  %v6320_v28 = vld [vmem:[#allocation35_spill] sm:$0xff] }
 0x187   : > { %v3010_v15 = vunpack.i.h.bf16 %v3008_v26  ;;  %v3009_v18 = vunpack.i.l.bf16 %v3008_v26  ;;  %v1919_v36 = vadd.f32 %v1895_v45, %v1711_v52  ;;  %v1920_v26 = vadd.f32 %v1896_v42, %v1712_v57 }
 0x188   : > { %v1713_v49 = vadd.f32 %v1689_v31, %v1501_v27  ;;  %v4635_v40 = vadd.f32 %v6318_v48, %v2123_v46  ;;  %v4644_v27 = vadd.f32 %v6318_v48, %v2124_v21  ;;  %v6327_v21 = vld [vmem:[#allocation74_spill] sm:$0xff] }
 0x189   : > { %v1986_v63 = vsel %vm1979_vm14, %v3004_v1, %v3009_v18  ;;  %v1998_v11 = vsel %vm1979_vm14, %v3009_v18, %v3004_v1  ;;  %v1987_v17 = vsel %vm1979_vm14, %v3005_v3, %v3010_v15  ;;  %v1999_v44 = vsel %vm1979_vm14, %v3010_v15, %v3005_v3 }
 0x18a   : > { %v2031_v34 = vmul.f32 %v4188_v50, %v1986_v63  ;;  %v2032_v61 = vmul.f32 %v6313_v0, %v1998_v11  ;;  %v2189_v20 = vpop.permute.xlu1 %2188  ;;  %v2033_v7 = vmul.f32 %v4188_v50, %v1987_v17  ;;  %v2034_v16 = vmul.f32 %v6313_v0, %v1999_v44  ;;  %6319 = vst [vmem:[#allocation17_spill] sm:$0xff] %v4635_v40 }
 0x18b   : > { %v1714_v3 = vadd.f32 %v1690_v25, %v1502_v19  ;;  %v1921_v33 = vadd.f32 %v1897_v10, %v1713_v49  ;;  %6323 = vst [vmem:[#allocation3_spill] sm:$0xff] %v4644_v27  ;;  %v2243_v45 = vmul.f32 %v4635_v40, %v4635_v40  ;;  %v2244_v44 = vmul.f32 %v4644_v27, %v4644_v27 }
 0x18c   : > { %v2103_v38 = vmul.f32 %v6317_v22, %v2031_v34  ;;  %v2104_v24 = vmul.f32 %v6317_v22, %v2032_v61  ;;  %v2105_v1 = vmul.f32 %v2073_v12, %v2033_v7  ;;  %v2106_v15 = vmul.f32 %v2073_v12, %v2034_v16 }
 0x18d   : > { %v1922_v59 = vadd.f32 %v1898_v43, %v1714_v3  ;;  %v2263_v61 = vadd.f32 %v2244_v44, %v2243_v45  ;;  %v2929_v10 = vunpack.i.l.bf16 %v6327_v21  ;;  %v2930_v22 = vunpack.i.h.bf16 %v6327_v21  ;;  %v6331_v3 = vld [vmem:[#allocation16_spill] sm:$0xff] }
 0x18e   : > { %v4632_v18 = vpop.permute.xlu1 %3014  ;;  %v2127_v32 = vadd.f32 %v2103_v38, %v1919_v36  ;;  %v2128_v63 = vadd.f32 %v2104_v24, %v1920_v26  ;;  %v2129_v19 = vadd.f32 %v2105_v1, %v1921_v33  ;;  %v6328_v38 = vld [vmem:[#allocation70_spill] sm:$0xff]  ;;  %v6336_v45 = vld [vmem:[#allocation80_spill] sm:$0xff] }
 0x18f   : > { %v2130_v31 = vadd.f32 %v2106_v15, %v1922_v59  ;;  %v2924_v24 = vunpack.i.l.bf16 %v6328_v38  ;;  %v2925_v36 = vunpack.i.h.bf16 %v6328_v38  ;;  %v6329_v26 = vld [vmem:[#allocation6_spill] sm:$0xff]  ;;  %v6334_v59 = vld [vmem:[#allocation29_spill] sm:$0xff]  ;;  %v2951_v44 = vunpack.i.l.bf16 %v6336_v45 }
 0x190   : > { %v4638_v56 = vadd.f32 %v6320_v28, %v2127_v32  ;;  %v4641_v2 = vadd.f32 %v6320_v28, %v2128_v63  ;;  %v4654_v42 = vadd.f32 %v2189_v20, %v2129_v19  ;;  %v6330_v49 = vunpack.c.l.bf16 %v6329_v26 }
 0x191   : > { %v4656_v11 = vadd.f32 %v2189_v20, %v2130_v31  ;;  %v517_v15 = vsel %vm504_vm8, %v2929_v10, %v2924_v24  ;;  %v6333_v63 = vunpack.c.h.bf16 %v6329_v26  ;;  %v2976_v48 = vunpack.i.h.bf16 %v6334_v59  ;;  %v6339_v26 = vld [vmem:[#allocation79_spill] sm:$0xff] }
 0x192   : > { %6321 = vst [vmem:[#allocation31_spill] sm:$0xff] %v4638_v56  ;;  %6322 = vst [vmem:[#allocation15_spill] sm:$0xff] %v4641_v2  ;;  %v4646_v25 = vpop.permute.xlu1 %1005  ;;  %v2247_v52 = vmul.f32 %v4638_v56, %v4638_v56  ;;  %v2248_v57 = vmul.f32 %v4641_v2, %v4641_v2  ;;  %v2249_v12 = vmul.f32 %v4654_v42, %v4654_v42  ;;  %v2975_v31 = vunpack.i.l.bf16 %v6334_v59 }
 0x193   : > { %6324 = vst [vmem:[#allocation18_spill] sm:$0xff] %v4646_v25  ;;  %6325 = vst [vmem:[#allocation12_spill] sm:$0xff] %v4654_v42  ;;  %v2250_v7 = vmul.f32 %v4656_v11, %v4656_v11  ;;  %v432_v1 = vmul.f32 %v6331_v3, %v6330_v49  ;;  %v4686_v33 = vmul.f32 %v6331_v3, %v6333_v63  ;;  %v2947_v49 = vunpack.i.h.bf16 %v6339_v26 }
 0x194   : > { %6326 = vst [vmem:[#allocation21_spill] sm:$0xff] %v4656_v11  ;;  %v2269_v17 = vadd.f32 %v2248_v57, %v2247_v52  ;;  %v505_v28 = vsel %vm504_vm8, %v2924_v24, %v2929_v10  ;;  %v518_v19 = vsel %vm504_vm8, %v2930_v22, %v2925_v36  ;;  %v6335_v52 = vld [vmem:[#allocation34_spill] sm:$0xff]  ;;  %v551_v21 = vmul.f32 %v6247_v37, %v517_v15  ;;  %v6338_v10 = vld [vmem:[#allocation51_spill] sm:$0xff]  ;;  %v6345_v11 = vld [vmem:[#allocation76_spill] sm:$0xff] }
 0x195   : > { %v2272_v46 = vadd.f32 %v2250_v7, %v2249_v12  ;;  %v2999_v57 = vunpack.i.h.bf16 %v6335_v52  ;;  %v6337_v12 = vld [vmem:[#allocation41_spill] sm:$0xff]  ;;  %v552_v38 = vmul.f32 %v6338_v10, %v505_v28  ;;  %v553_v24 = vmul.f32 %v6247_v37, %v518_v19  ;;  %v6342_v7 = vld [vmem:[#allocation42_spill] sm:$0xff]  ;;  %v6344_v15 = vld [vmem:[#allocation59_spill] sm:$0xff] }
 0x196   : > { %v4660_v34 = vpop.permute.xlu1 %3026  ;;  %2270 = vadd.xlane.f32.xlu0 %v2269_v17  ;;  %v2952_v17 = vunpack.i.h.bf16 %v6336_v45  ;;  %v2946_v3 = vunpack.i.l.bf16 %v6339_v26  ;;  %v6347_v28 = vld [vmem:[#allocation45_spill] sm:$0xff] }
 0x197   : > { %v625_v19 = vmul.f32 %v6347_v28, %v553_v24  ;;  %v2994_v24 = vunpack.i.h.bf16 %v4553_v54 }
 0x198   : > { %v720_v42 = vsel %vm719_vm0, %v2946_v3, %v2951_v44  ;;  %v732_v26 = vsel %vm719_vm0, %v2951_v44, %v2946_v3  ;;  %v733_v59 = vsel %vm719_vm0, %v2952_v17, %v2947_v49  ;;  %v721_v27 = vsel %vm719_vm0, %v2947_v49, %v2952_v17 }
 0x199   : > { %v2971_v44 = vunpack.i.h.bf16 %v4425_v58  ;;  %v761_v2 = vmul.f32 %v4023_v14, %v732_v26  ;;  %v2993_v17 = vunpack.i.l.bf16 %v4553_v54 }
 0x19a   : > { %v4666_v16 = vpop.permute.xlu1 %3031 }
 0x19b   : > { %2264 = vadd.xlane.f32.xlu1 %v2263_v61  ;;  %v2998_v61 = vunpack.i.l.bf16 %v6335_v52  ;;  %v6340_v52 = vld [vmem:[#allocation5_spill] sm:$0xff] }
 0x19c   : > { %v6341_v45 = vunpack.c.l.bf16 %v6340_v52 }
 0x19e   : > { %v4668_v20 = vpop.permute.xlu1 %1840  ;;  %v430_v56 = vmul.f32 %v6342_v7, %v6341_v45 }
 0x19f   : > { %2273 = vadd.xlane.f32.xlu1 %v2272_v46  ;;  %v506_v46 = vsel %vm504_vm8, %v2925_v36, %v2930_v22  ;;  %v6343_v22 = vunpack.c.h.bf16 %v6340_v52  ;;  %v6346_v52 = vld [vmem:[#allocation44_spill] sm:$0xff] }
 0x1a0   : > { %v554_v45 = vmul.f32 %v6338_v10, %v506_v46  ;;  %v623_v40 = vmul.f32 %v6346_v52, %v551_v21  ;;  %v762_v46 = vmul.f32 %v6256_v51, %v720_v42  ;;  %v763_v21 = vmul.f32 %v4023_v14, %v733_v59 }
 0x1a1   : > { %v431_v36 = vmul.f32 %v6342_v7, %v6343_v22  ;;  %v2970_v7 = vunpack.i.l.bf16 %v4425_v58  ;;  %v624_v22 = vmul.f32 %v6346_v52, %v552_v38  ;;  %v764_v52 = vmul.f32 %v6256_v51, %v721_v27 }
 0x1a2   : > { %v4671_v43 = vpop.permute.xlu1 %3037  ;;  %v626_v58 = vmul.f32 %v6347_v28, %v554_v45  ;;  %v647_v49 = vadd.f32 %v623_v40, %v430_v56  ;;  %v649_v42 = vadd.f32 %v625_v19, %v432_v1  ;;  %v943_v59 = vsel %vm929_vm3, %v2976_v48, %v2971_v44  ;;  %v6350_v40 = vld [vmem:[#allocation23_spill] sm:$0xff] }
 0x1a3   : > { %v942_v26 = vsel %vm929_vm3, %v2975_v31, %v2970_v7  ;;  %v648_v9 = vadd.f32 %v624_v22, %v431_v36  ;;  %v930_v25 = vsel %vm929_vm3, %v2970_v7, %v2975_v31  ;;  %v835_v56 = vmul.f32 %v6350_v40, %v763_v21  ;;  %v6354_v22 = vld [vmem:[#allocation9_spill] sm:$0xff] }
 0x1a4   : > { %v931_v27 = vsel %vm929_vm3, %v2971_v44, %v2976_v48  ;;  %v972_v36 = vmul.f32 %v4063_v53, %v942_v26  ;;  %v1154_v1 = vsel %vm1140_vm10, %v2999_v57, %v2994_v24  ;;  %v1141_v19 = vsel %vm1140_vm10, %v2993_v17, %v2998_v61  ;;  %v4778_v26 = vpop.permute.xlu0 %2044  ;;  %v6352_v44 = vld [vmem:[#allocation7_spill] sm:$0xff] }
 0x1a5   : > { %v1153_v31 = vsel %vm1140_vm10, %v2998_v61, %v2993_v17  ;;  %v973_v45 = vmul.f32 %v4084_v55, %v930_v25  ;;  %v1142_v48 = vsel %vm1140_vm10, %v2994_v24, %v2999_v57  ;;  %v650_v7 = vadd.f32 %v626_v58, %v4686_v33  ;;  %v6351_v33 = vld [vmem:[#allocation40_spill] sm:$0xff] }
 0x1a6   : > { %v4681_v32 = vpop.permute.xlu1 %1216  ;;  %v1185_v17 = vmul.f32 %v4087_v6, %v1154_v1  ;;  %v1184_v25 = vmul.f32 %v4103_v4, %v1141_v19  ;;  %v859_v24 = vadd.f32 %v835_v56, %v649_v42  ;;  %v1044_v58 = vmul.f32 %v6351_v33, %v972_v36 }
 0x1a7   : > { %6332 = vst [vmem:[#allocation36_spill] sm:$0xff] %v4681_v32  ;;  %v6349_v32 = vld [vmem:[#allocation57_spill] sm:$0xff]  ;;  %v1045_v1 = vmul.f32 %v6351_v33, %v973_v45  ;;  %v6356_v19 = vunpack.c.h.bf16 %v6352_v44  ;;  %v6362_v45 = vld [vmem:[#allocation82_spill] sm:$0xff] }
 0x1a8   : > { %v833_v54 = vmul.f32 %v6349_v32, %v761_v2  ;;  %v834_v28 = vmul.f32 %v6349_v32, %v762_v46  ;;  %v836_v2 = vmul.f32 %v6350_v40, %v764_v52  ;;  %v974_v32 = vmul.f32 %v4063_v53, %v943_v59 }
 0x1a9   : > { %v975_v46 = vmul.f32 %v4084_v55, %v931_v27  ;;  %v1183_v52 = vmul.f32 %v4087_v6, %v1153_v31  ;;  %v1186_v59 = vmul.f32 %v4103_v4, %v1142_v48  ;;  %v6353_v27 = vunpack.c.l.bf16 %v6352_v44  ;;  %v6363_v44 = vld [vmem:[#allocation54_spill] sm:$0xff] }
 0x1aa   : > { %v4706_v63 = vpop.permute.xlu1 %3049  ;;  %v857_v61 = vadd.f32 %v833_v54, %v647_v49  ;;  %v858_v57 = vadd.f32 %v834_v28, %v648_v9  ;;  %v860_v40 = vadd.f32 %v836_v2, %v650_v7  ;;  %v6355_v49 = vld [vmem:[#allocation75_spill] sm:$0xff]  ;;  %v4792_v31 = vmul.f32 %v6354_v22, %v6356_v19  ;;  %v6357_v9 = vld [vmem:[#allocation8_spill] sm:$0xff] }
 0x1ab   : > { %v4785_v55 = vmul.f32 %v6354_v22, %v6353_v27  ;;  %v1046_v54 = vmul.f32 %v6355_v49, %v974_v32  ;;  %v6358_v42 = vunpack.c.l.bf16 %v6357_v9  ;;  %v6359_v28 = vld [vmem:[#allocation52_spill] sm:$0xff]  ;;  %v6360_v36 = vunpack.c.h.bf16 %v6357_v9 }
 0x1ac   : > { %v1047_v48 = vmul.f32 %v6355_v49, %v975_v46  ;;  %v1257_v7 = vmul.f32 %v6362_v45, %v1185_v17  ;;  %v1255_v33 = vmul.f32 %v6363_v44, %v1183_v52  ;;  %v1256_v22 = vmul.f32 %v6363_v44, %v1184_v25  ;;  %v4816_v17 = vpop.permute.xlu0 %3122 }
 0x1ad   : > { %v4797_v56 = vmul.f32 %v6359_v28, %v6358_v42  ;;  %v4802_v2 = vmul.f32 %v6359_v28, %v6360_v36  ;;  %v3034_v27 = vunpack.i.h.bf16 %v4666_v16  ;;  %v1068_v19 = vadd.f32 %v1044_v58, %v857_v61 }
 0x1ae   : > { %v4732_v3 = vpop.permute.xlu1 %3054  ;;  %v1258_v42 = vmul.f32 %v6362_v45, %v1186_v59  ;;  %v3017_v9 = vunpack.i.h.bf16 %v4632_v18  ;;  %v3033_v28 = vunpack.i.l.bf16 %v4666_v16  ;;  %v1069_v36 = vadd.f32 %v1045_v1, %v858_v57 }
 0x1af   : > { %v1070_v6 = vadd.f32 %v1046_v54, %v859_v24  ;;  %v3016_v46 = vunpack.i.l.bf16 %v4632_v18  ;;  %v3029_v49 = vunpack.i.h.bf16 %v4660_v34  ;;  %v1071_v52 = vadd.f32 %v1047_v48, %v860_v40 }
 0x1b0   : > { %v3028_v25 = vunpack.i.l.bf16 %v4660_v34  ;;  %v1279_v59 = vadd.f32 %v1255_v33, %v1068_v19  ;;  %v1280_v45 = vadd.f32 %v1256_v22, %v1069_v36  ;;  %v6364_v18 = vunpack.i.h.bf16 %v6337_v12 }
 0x1b1   : > { %v1353_v16 = vsel %vm1351_vm2, %v3029_v49, %v3034_v27  ;;  %v1282_v57 = vadd.f32 %v1258_v42, %v1071_v52  ;;  %v3056_v40 = vunpack.i.l.bf16 %v4732_v3  ;;  %v3057_v33 = vunpack.i.h.bf16 %v4732_v3 }
 0x1b2   : > { %v4750_v38 = vpop.permute.xlu1 %2048  ;;  %v520_v24 = vsel %vm504_vm8, %v6364_v18, %v3017_v9  ;;  %v1352_v34 = vsel %vm1351_vm2, %v3028_v25, %v3033_v28  ;;  %v6365_v54 = vmov %v6364_v18  ;;  %v1365_v42 = vsel %vm1351_vm2, %v3034_v27, %v3029_v49 }
 0x1b3   : > { %v508_v1 = vsel %vm504_vm8, %v3017_v9, %v6365_v54  ;;  %v1393_v9 = vmul.f32 %v4106_v30, %v1353_v16  ;;  %v3051_v36 = vunpack.i.l.bf16 %v4706_v63  ;;  %v557_v18 = vmul.f32 %v6247_v37, %v520_v24 }
 0x1b4   : > { %v1391_v54 = vmul.f32 %v4106_v30, %v1352_v34 }
 0x1b5   : > { %v1572_v27 = vsel %vm1559_vm12, %v3056_v40, %v3051_v36 }
 0x1b6   : > { %v4773_v21 = vpop.permute.xlu1 %3060 }
 0x1ba   : > { %v4805_v32 = vpop.permute.xlu1 %1424 }
 0x1bb   : > { %6361 = vst [vmem:[#allocation28_spill] sm:$0xff] %v4805_v32  ;;  %v1281_v32 = vadd.f32 %v1257_v7, %v1070_v6  ;;  %v6366_v6 = vunpack.i.l.bf16 %v6337_v12  ;;  %v1364_v7 = vsel %vm1351_vm2, %v3033_v28, %v3028_v25  ;;  %v3052_v28 = vunpack.i.h.bf16 %v4706_v63 }
 0x1bc   : > { %v1392_v12 = vmul.f32 %v4109_v29, %v1364_v7  ;;  %v1394_v25 = vmul.f32 %v4109_v29, %v1365_v42  ;;  %v558_v63 = vmul.f32 %v6338_v10, %v508_v1  ;;  %v6368_v7 = vld [vmem:[#allocation73_spill] sm:$0xff]  ;;  %v1604_v42 = vmul.f32 %v4147_v47, %v1572_v27 }
 0x1bd   : > { %v507_v48 = vsel %vm504_vm8, %v3016_v46, %v6366_v6  ;;  %v6367_v22 = vmov %v6366_v6  ;;  %v1561_v16 = vsel %vm1559_vm12, %v3052_v28, %v3057_v33  ;;  %v1573_v24 = vsel %vm1559_vm12, %v3057_v33, %v3052_v28 }
 0x1be   : > { %v3073_v58 = vpop.permute.xlu1 %3072  ;;  %v519_v19 = vsel %vm504_vm8, %v6367_v22, %v3016_v46  ;;  %v1560_v46 = vsel %vm1559_vm12, %v3051_v36, %v3056_v40  ;;  %v1465_v22 = vmul.f32 %v6368_v7, %v1393_v9  ;;  %v1605_v1 = vmul.f32 %v4112_v39, %v1561_v16 }
 0x1bf   : > { %v3075_v34 = vunpack.i.h.bf16 %v3073_v58  ;;  %v4864_v6 = vmul.f32 %v6247_v37, %v519_v19  ;;  %v3074_v44 = vunpack.i.l.bf16 %v3073_v58  ;;  %v1603_v40 = vmul.f32 %v4112_v39, %v1560_v46  ;;  %v6369_v37 = vld [vmem:[#allocation11_spill] sm:$0xff] }
 0x1c0   : > { %v1606_v19 = vmul.f32 %v4147_v47, %v1573_v24  ;;  %v1463_v28 = vmul.f32 %v4448_v23, %v1391_v54  ;;  %v1464_v46 = vmul.f32 %v4448_v23, %v1392_v12  ;;  %v1466_v27 = vmul.f32 %v6368_v7, %v1394_v25 }
 0x1c1   : > { %v3039_v16 = vunpack.i.l.bf16 %v4671_v43  ;;  %v1675_v12 = vmul.f32 %v4578_v62, %v1603_v40 }
 0x1c2   : > { %v3078_v52 = vpop.permute.xlu1 %3077 }
 0x1c3   : > { %v3080_v3 = vunpack.i.h.bf16 %v3078_v52  ;;  %v3079_v49 = vunpack.i.l.bf16 %v3078_v52  ;;  %v556_v52 = vmul.f32 %v6338_v10, %v507_v48  ;;  %v1489_v48 = vadd.f32 %v1465_v22, %v1281_v32 }
 0x1c4   : > { %v1487_v10 = vadd.f32 %v1463_v28, %v1279_v59  ;;  %v4913_v28 = vpop.permute.xlu0 %2056 }
 0x1c5   : > { %v1773_v36 = vsel %vm1771_vm4, %v3075_v34, %v3080_v3  ;;  %v1785_v33 = vsel %vm1771_vm4, %v3080_v3, %v3075_v34  ;;  %v1772_v9 = vsel %vm1771_vm4, %v3074_v44, %v3079_v49  ;;  %v1784_v58 = vsel %vm1771_vm4, %v3079_v49, %v3074_v44  ;;  %v6371_v49 = vld [vmem:[#allocation13_spill] sm:$0xff] }
 0x1c6   : > { %v4867_v61 = vpop.permute.xlu1 %3087  ;;  %v629_v3 = vmul.f32 %v6369_v37, %v557_v18  ;;  %v1813_v24 = vmul.f32 %v4150_v8, %v1773_v36  ;;  %v1814_v34 = vmul.f32 %v4165_v41, %v1785_v33  ;;  %v4892_v44 = vmul.f32 %v6369_v37, %v558_v63 }
 0x1c7   : > { %v1811_v54 = vmul.f32 %v4150_v8, %v1772_v9  ;;  %v1812_v23 = vmul.f32 %v4165_v41, %v1784_v58  ;;  %v1676_v18 = vmul.f32 %v4578_v62, %v1604_v42  ;;  %v1677_v25 = vmul.f32 %v6371_v49, %v1605_v1 }
 0x1c8   : > { %v1678_v7 = vmul.f32 %v6371_v49, %v1606_v19  ;;  %v1490_v36 = vadd.f32 %v1466_v27, %v1282_v57  ;;  %v3040_v33 = vunpack.i.h.bf16 %v4671_v43  ;;  %v6372_v37 = vunpack.i.l.bf16 %v6344_v15 }
 0x1c9   : > { %v1885_v62 = vmul.f32 %v4668_v20, %v1813_v24  ;;  %v1886_v40 = vmul.f32 %v4668_v20, %v1814_v34  ;;  %v1883_v43 = vmul.f32 %v4487_v5, %v1811_v54  ;;  %v1884_v59 = vmul.f32 %v4487_v5, %v1812_v23 }
 0x1ca   : > { %v4889_v47 = vpop.permute.xlu1 %1640  ;;  %v722_v32 = vsel %vm719_vm0, %v3039_v16, %v6372_v37  ;;  %v6373_v63 = vmov %v6372_v37  ;;  %v1702_v19 = vadd.f32 %v1678_v7, %v1490_v36  ;;  %v1699_v9 = vadd.f32 %v1675_v12, %v1487_v10 }
 0x1cb   : > { %6370 = vst [vmem:[#allocation26_spill] sm:$0xff] %v4889_v47  ;;  %v1488_v47 = vadd.f32 %v1464_v46, %v1280_v45  ;;  %v734_v22 = vsel %vm719_vm0, %v6373_v63, %v3039_v16  ;;  %v1701_v45 = vadd.f32 %v1677_v25, %v1489_v48  ;;  %v6374_v46 = vunpack.i.h.bf16 %v4520_v35 }
 0x1cc   : > { %v6376_v24 = vunpack.i.l.bf16 %v4520_v35  ;;  %v1910_v7 = vadd.f32 %v1886_v40, %v1702_v19  ;;  %v765_v40 = vmul.f32 %v4023_v14, %v734_v22 }
 0x1cd   : > { %v1700_v58 = vadd.f32 %v1676_v18, %v1488_v47  ;;  %v6375_v20 = vmov %v6374_v46  ;;  %v1907_v18 = vadd.f32 %v1883_v43, %v1699_v9  ;;  %v1909_v25 = vadd.f32 %v1885_v62, %v1701_v45 }
 0x1ce   : > { %v3095_v42 = vpop.permute.xlu1 %3094  ;;  %v6377_v10 = vmov %v6376_v24 }
 0x1cf   : > { %v3097_v57 = vunpack.i.h.bf16 %v3095_v42  ;;  %v3096_v1 = vunpack.i.l.bf16 %v3095_v42  ;;  %v1908_v49 = vadd.f32 %v1884_v59, %v1700_v58  ;;  %v6378_v42 = vld [vmem:[#allocation33_spill] sm:$0xff]  ;;  %v766_v58 = vmul.f32 %v6256_v51, %v722_v32 }
 0x1d0   : > { %v628_v9 = vmul.f32 %v6378_v42, %v556_v52  ;;  %v3062_v52 = vunpack.i.l.bf16 %v4773_v21 }
 0x1d1   : > { %v1981_v27 = vsel %vm1979_vm14, %v3097_v57, %v6374_v46  ;;  %v1993_v16 = vsel %vm1979_vm14, %v6375_v20, %v3097_v57  ;;  %v1980_v5 = vsel %vm1979_vm14, %v3096_v1, %v6376_v24  ;;  %v1992_v47 = vsel %vm1979_vm14, %v6377_v10, %v3096_v1 }
 0x1d2   : > { %v2021_v34 = vmul.f32 %v4188_v50, %v1981_v27  ;;  %v2022_v48 = vmul.f32 %v6313_v0, %v1993_v16  ;;  %v2019_v54 = vmul.f32 %v4188_v50, %v1980_v5  ;;  %v2020_v23 = vmul.f32 %v6313_v0, %v1992_v47  ;;  %v2154_v12 = vpop.permute.xlu1 %2153 }
 0x1d3   : > { %v627_v57 = vmul.f32 %v6378_v42, %v4864_v6  ;;  %v6379_v1 = vunpack.i.h.bf16 %v6344_v15  ;;  %v653_v6 = vadd.f32 %v629_v3, %v4797_v56  ;;  %v3063_v27 = vunpack.i.h.bf16 %v4773_v21  ;;  %v2159_v15 = vpop.permute.xlu0 %2158  ;;  %v6381_v56 = vld [vmem:[#allocation30_spill] sm:$0xff] }
 0x1d4   : > { %v2093_v36 = vmul.f32 %v4750_v38, %v2021_v34  ;;  %v2094_v35 = vmul.f32 %v4750_v38, %v2022_v48  ;;  %v2091_v37 = vmul.f32 %v4778_v26, %v2019_v54  ;;  %v2092_v63 = vmul.f32 %v4778_v26, %v2020_v23 }
 0x1d5   : > { %v723_v46 = vsel %vm719_vm0, %v3040_v33, %v6379_v1  ;;  %v6380_v43 = vmov %v6379_v1  ;;  %v837_v3 = vmul.f32 %v6381_v56, %v765_v40  ;;  %v651_v54 = vadd.f32 %v627_v57, %v4785_v55 }
 0x1d6   : > { %v735_v62 = vsel %vm719_vm0, %v6380_v43, %v3040_v33  ;;  %v2115_v38 = vadd.f32 %v2091_v37, %v1907_v18  ;;  %v2116_v59 = vadd.f32 %v2092_v63, %v1908_v49  ;;  %v4950_v45 = vpop.permute.xlu1 %3105  ;;  %v2117_v26 = vadd.f32 %v2093_v36, %v1909_v25 }
 0x1d7   : > { %v2118_v19 = vadd.f32 %v2094_v35, %v1910_v7  ;;  %v767_v24 = vmul.f32 %v4023_v14, %v735_v62  ;;  %v768_v5 = vmul.f32 %v6256_v51, %v723_v46  ;;  %v838_v23 = vmul.f32 %v6381_v56, %v766_v58  ;;  %v6386_v62 = vld [vmem:[#allocation10_spill] sm:$0xff] }
 0x1d8   : > { %v4956_v20 = vadd.f32 %v2154_v12, %v2115_v38  ;;  %v4958_v33 = vadd.f32 %v2154_v12, %v2116_v59  ;;  %v4960_v22 = vadd.f32 %v2159_v15, %v2117_v26  ;;  %v6382_v12 = vunpack.i.h.bf16 %v6345_v11 }
 0x1d9   : > { %v4962_v16 = vadd.f32 %v2159_v15, %v2118_v19  ;;  %v3089_v18 = vunpack.i.l.bf16 %v4867_v61  ;;  %v654_v49 = vadd.f32 %v4892_v44, %v4802_v2  ;;  %v652_v25 = vadd.f32 %v628_v9, %v4792_v31  ;;  %v6388_v19 = vld [vmem:[#allocation55_spill] sm:$0xff] }
 0x1da   : > { %v2235_v32 = vmul.f32 %v4956_v20, %v4956_v20  ;;  %v2236_v10 = vmul.f32 %v4958_v33, %v4958_v33  ;;  %v3111_v47 = vpop.permute.xlu1 %3110  ;;  %v2237_v34 = vmul.f32 %v4960_v22, %v4960_v22  ;;  %v945_v21 = vsel %vm929_vm3, %v6382_v12, %v3063_v27 }
 0x1db   : > { %v2238_v48 = vmul.f32 %v4962_v16, %v4962_v16  ;;  %v839_v35 = vmul.f32 %v4522_v13, %v767_v24  ;;  %v840_v55 = vmul.f32 %v4522_v13, %v768_v5  ;;  %v861_v37 = vadd.f32 %v837_v3, %v651_v54  ;;  %v6390_v3 = vld [vmem:[#allocation43_spill] sm:$0xff] }
 0x1dc   : > { %v2251_v36 = vadd.f32 %v2236_v10, %v2235_v32  ;;  %v6383_v63 = vmov %v6382_v12  ;;  %v978_v57 = vmul.f32 %v4063_v53, %v945_v21  ;;  %v6384_v1 = vunpack.i.l.bf16 %v6345_v11 }
 0x1dd   : > { %v2254_v7 = vadd.f32 %v2238_v48, %v2237_v34  ;;  %v933_v42 = vsel %vm929_vm3, %v3063_v27, %v6383_v63  ;;  %v3090_v13 = vunpack.i.h.bf16 %v4867_v61  ;;  %v862_v43 = vadd.f32 %v838_v23, %v652_v25 }
 0x1de   : > { %v932_v2 = vsel %vm929_vm3, %v3062_v52, %v6384_v1  ;;  %v6385_v31 = vmov %v6384_v1  ;;  %v5002_v46 = vpop.permute.xlu1 %1848  ;;  %v6387_v40 = vunpack.i.l.bf16 %v6386_v62  ;;  %v3107_v59 = vunpack.i.l.bf16 %v4950_v45  ;;  %2252 = vadd.xlane.f32.xlu0 %v2251_v36  ;;  %v6394_v36 = vld [vmem:[#allocation18_spill] sm:$0xff] }
 0x1df   : > { %v944_v44 = vsel %vm929_vm3, %v6385_v31, %v3062_v52  ;;  %2255 = vadd.xlane.f32.xlu1 %v2254_v7  ;;  %v3112_v26 = vunpack.i.l.bf16 %v3111_v47  ;;  %v979_v11 = vmul.f32 %v6388_v19, %v933_v42  ;;  %v3108_v58 = vunpack.i.h.bf16 %v4950_v45 }
 0x1e0   : > { %v1143_v38 = vsel %vm1140_vm10, %v6387_v40, %v3089_v18  ;;  %v6389_v9 = vmov %v6387_v40  ;;  %v3113_v27 = vunpack.i.h.bf16 %v3111_v47  ;;  %v863_v15 = vadd.f32 %v839_v35, %v653_v6  ;;  %v6393_v47 = vld [vmem:[#allocation56_spill] sm:$0xff] }
 0x1e1   : > { %v1155_v61 = vsel %vm1140_vm10, %v3089_v18, %v6389_v9  ;;  %v864_v24 = vadd.f32 %v840_v55, %v654_v49  ;;  %v976_v5 = vmul.f32 %v4063_v53, %v944_v44  ;;  %v977_v56 = vmul.f32 %v6388_v19, %v932_v2  ;;  %v6397_v40 = vld [vmem:[#allocation36_spill] sm:$0xff] }
 0x1e2   : > { %v1050_v52 = vmul.f32 %v6390_v3, %v978_v57  ;;  %v6391_v32 = vunpack.i.h.bf16 %v6386_v62  ;;  %v1188_v45 = vmul.f32 %v4103_v4, %v1143_v38  ;;  %v3118_v6 = vpop.permute.xlu1 %3117  ;;  %v1187_v54 = vmul.f32 %v6393_v47, %v1155_v61 }
 0x1e3   : > { %v1354_v23 = vsel %vm1351_vm2, %v3107_v59, %v3112_v26  ;;  %v1366_v12 = vsel %vm1351_vm2, %v3112_v26, %v3107_v59  ;;  %v3119_v21 = vunpack.i.l.bf16 %v3118_v6  ;;  %v1051_v18 = vmul.f32 %v6390_v3, %v979_v11 }
 0x1e4   : > { %v1144_v10 = vsel %vm1140_vm10, %v6391_v32, %v3090_v13  ;;  %v6392_v34 = vmov %v6391_v32  ;;  %v1355_v49 = vsel %vm1351_vm2, %v3108_v58, %v3113_v27  ;;  %v1367_v25 = vsel %vm1351_vm2, %v3113_v27, %v3108_v58 }
 0x1e5   : > { %v1156_v48 = vsel %vm1140_vm10, %v3090_v13, %v6392_v34  ;;  %v3120_v7 = vunpack.i.h.bf16 %v3118_v6  ;;  %v1048_v35 = vmul.f32 %v6394_v36, %v976_v5  ;;  %v1049_v55 = vmul.f32 %v6394_v36, %v977_v56  ;;  %v6400_v56 = vld [vmem:[#allocation61_spill] sm:$0xff] }
 0x1e6   : > { %v6395_v63 = vunpack.i.l.bf16 %v4816_v17  ;;  %v1189_v2 = vmul.f32 %v6393_v47, %v1156_v48  ;;  %v1190_v31 = vmul.f32 %v4103_v4, %v1144_v10  ;;  %v1395_v44 = vmul.f32 %v4106_v30, %v1354_v23  ;;  %v5051_v62 = vpop.permute.xlu1 %2052  ;;  %v6402_v23 = vld [vmem:[#allocation28_spill] sm:$0xff] }
 0x1e7   : > { %v1396_v13 = vmul.f32 %v4109_v29, %v1366_v12  ;;  %v1259_v38 = vmul.f32 %v6397_v40, %v1187_v54  ;;  %v1260_v59 = vmul.f32 %v6397_v40, %v1188_v45  ;;  %v1397_v26 = vmul.f32 %v4106_v30, %v1355_v49  ;;  %v6401_v45 = vld [vmem:[#allocation63_spill] sm:$0xff]  ;;  %v6405_v40 = vld [vmem:[#allocation26_spill] sm:$0xff] }
 0x1e8   : > { %v1562_v42 = vsel %vm1559_vm12, %v3119_v21, %v6395_v63  ;;  %v6396_v57 = vmov %v6395_v63  ;;  %v1398_v11 = vmul.f32 %v4109_v29, %v1367_v25  ;;  %v6398_v9 = vunpack.i.h.bf16 %v4816_v17  ;;  %v3140_v63 = vpop.permute.xlu0 %3139 }
 0x1e9   : > { %v1574_v1 = vsel %vm1559_vm12, %v6396_v57, %v3119_v21  ;;  %v1607_v5 = vmul.f32 %v4112_v39, %v1562_v42  ;;  %v1072_v32 = vadd.f32 %v1048_v35, %v861_v37  ;;  %v1073_v10 = vadd.f32 %v1049_v55, %v862_v43  ;;  %v6403_v37 = vld [vmem:[#allocation77_spill] sm:$0xff] }
 0x1ea   : > { %v1563_v61 = vsel %vm1559_vm12, %v3120_v7, %v6398_v9  ;;  %v6399_v58 = vmov %v6398_v9  ;;  %v1608_v3 = vmul.f32 %v6400_v56, %v1574_v1  ;;  %v1074_v34 = vadd.f32 %v1050_v52, %v863_v15  ;;  %v3130_v17 = vpop.permute.xlu1 %3129 }
 0x1eb   : > { %v1575_v27 = vsel %vm1559_vm12, %v6399_v58, %v3120_v7  ;;  %v1075_v48 = vadd.f32 %v1051_v18, %v864_v24  ;;  %v1261_v6 = vmul.f32 %v6401_v45, %v1189_v2  ;;  %v1262_v54 = vmul.f32 %v6401_v45, %v1190_v31  ;;  %v6404_v24 = vld [vmem:[#allocation4_spill] sm:$0xff] }
 0x1ec   : > { %v1467_v12 = vmul.f32 %v6402_v23, %v1395_v44  ;;  %v1468_v21 = vmul.f32 %v6402_v23, %v1396_v13  ;;  %v1283_v49 = vadd.f32 %v1259_v38, %v1072_v32  ;;  %v1284_v25 = vadd.f32 %v1260_v59, %v1073_v10 }
 0x1ed   : > { %v1609_v7 = vmul.f32 %v4112_v39, %v1563_v61  ;;  %v1610_v36 = vmul.f32 %v6400_v56, %v1575_v27  ;;  %v1469_v43 = vmul.f32 %v6403_v37, %v1397_v26  ;;  %v1470_v15 = vmul.f32 %v6403_v37, %v1398_v11 }
 0x1ee   : > { %v1679_v52 = vmul.f32 %v6404_v24, %v1607_v5  ;;  %v1680_v18 = vmul.f32 %v6404_v24, %v1608_v3  ;;  %v3142_v35 = vunpack.i.h.bf16 %v3140_v63  ;;  %v3141_v55 = vunpack.i.l.bf16 %v3140_v63  ;;  %v3135_v13 = vpop.permute.xlu1 %3134 }
 0x1ef   : > { %v3132_v42 = vunpack.i.h.bf16 %v3130_v17  ;;  %v3131_v57 = vunpack.i.l.bf16 %v3130_v17  ;;  %v1285_v1 = vadd.f32 %v1261_v6, %v1074_v34  ;;  %v1286_v2 = vadd.f32 %v1262_v54, %v1075_v48 }
 0x1f0   : > { %v1491_v31 = vadd.f32 %v1467_v12, %v1283_v49  ;;  %v1492_v44 = vadd.f32 %v1468_v21, %v1284_v25  ;;  %v1681_v38 = vmul.f32 %v6405_v40, %v1609_v7  ;;  %v1682_v59 = vmul.f32 %v6405_v40, %v1610_v36  ;;  %v6406_v49 = vld [vmem:[#allocation14_spill] sm:$0xff] }
 0x1f1   : > { %v3137_v26 = vunpack.i.h.bf16 %v3135_v13  ;;  %v3136_v9 = vunpack.i.l.bf16 %v3135_v13  ;;  %v1493_v58 = vadd.f32 %v1469_v43, %v1285_v1  ;;  %v1494_v27 = vadd.f32 %v1470_v15, %v1286_v2 }
 0x1f2   : > { %v1703_v11 = vadd.f32 %v1679_v52, %v1491_v31  ;;  %v1704_v61 = vadd.f32 %v1680_v18, %v1492_v44  ;;  %v3145_v54 = vpop.permute.xlu1 %3144 }
 0x1f3   : > { %v1774_v5 = vsel %vm1771_vm4, %v3131_v57, %v3136_v9  ;;  %v1775_v3 = vsel %vm1771_vm4, %v3132_v42, %v3137_v26  ;;  %v1786_v32 = vsel %vm1771_vm4, %v3136_v9, %v3131_v57  ;;  %v1787_v10 = vsel %vm1771_vm4, %v3137_v26, %v3132_v42 }
 0x1f4   : > { %v1815_v34 = vmul.f32 %v4150_v8, %v1774_v5  ;;  %v1816_v48 = vmul.f32 %v4165_v41, %v1786_v32  ;;  %v1817_v45 = vmul.f32 %v4150_v8, %v1775_v3  ;;  %v1818_v6 = vmul.f32 %v4165_v41, %v1787_v10 }
 0x1f5   : > { %v3147_v23 = vunpack.i.h.bf16 %v3145_v54  ;;  %v3146_v12 = vunpack.i.l.bf16 %v3145_v54  ;;  %v1705_v21 = vadd.f32 %v1681_v38, %v1493_v58  ;;  %v1706_v17 = vadd.f32 %v1682_v59, %v1494_v27  ;;  %v2164_v58 = vpop.permute.xlu0 %2163  ;;  %v2367_v54 = vld [vmem:[%s5941_s4 + $0x18] sm:$0xff] }
 0x1f6   : > { %v1887_v25 = vmul.f32 %v6406_v49, %v1815_v34  ;;  %v1888_v7 = vmul.f32 %v6406_v49, %v1816_v48  ;;  %v1889_v36 = vmul.f32 %v5002_v46, %v1817_v45  ;;  %v1890_v63 = vmul.f32 %v5002_v46, %v1818_v6  ;;  %v2169_v40 = vpop.permute.xlu1 %2168  ;;  %v2365_v48 = vld [vmem:[%s5941_s4 + $0x8] sm:$0xff]  ;;  %v2366_v45 = vld [vmem:[%s5941_s4 + $0x10] sm:$0xff]  ;;  %v2364_v6 = vld [vmem:[%s5941_s4] sm:$0xff] }
 0x1f7   : > { %v1983_v37 = vsel %vm1979_vm14, %v3142_v35, %v3147_v23  ;;  %v1995_v43 = vsel %vm1979_vm14, %v3147_v23, %v3142_v35  ;;  %v1982_v15 = vsel %vm1979_vm14, %v3141_v55, %v3146_v12  ;;  %v1994_v24 = vsel %vm1979_vm14, %v3146_v12, %v3141_v55 }
 0x1f8   : > { %v2025_v52 = vmul.f32 %v4188_v50, %v1983_v37  ;;  %v2026_v18 = vmul.f32 %v6313_v0, %v1995_v43  ;;  %v2023_v42 = vmul.f32 %v4188_v50, %v1982_v15  ;;  %v2024_v46 = vmul.f32 %v6313_v0, %v1994_v24 }
 0x1f9   : > { %v1913_v57 = vadd.f32 %v1889_v36, %v1705_v21  ;;  %v1914_v1 = vadd.f32 %v1890_v63, %v1706_v17  ;;  %v1911_v2 = vadd.f32 %v1887_v25, %v1703_v11  ;;  %v1912_v31 = vadd.f32 %v1888_v7, %v1704_v61  ;;  %v2268_v12 = vpop.xlane.xlu0 %2267  ;;  %v5144_v21 = vld [vmem:[%s5939_s2 + $0x48] sm:$0xff]  ;;  %v5149_v17 = vld [vmem:[%s5939_s2 + $0x40] sm:$0xff] }
 0x1fa   : > { %v2095_v35 = vmul.f32 %v5051_v62, %v2023_v42  ;;  %v2096_v44 = vmul.f32 %v5051_v62, %v2024_v46  ;;  %v2097_v13 = vmul.f32 %v4913_v28, %v2025_v52  ;;  %v2098_v55 = vmul.f32 %v4913_v28, %v2026_v18  ;;  %v5154_v25 = vld [vmem:[%s3456_s14 + $0x40] sm:$0xff]  ;;  %v5157_v7 = vld [vmem:[%s3456_s14 + $0x48] sm:$0xff] }
 0x1fb   : > { %v6407_v23 = vmov 4   ;;  %v2280_v49 = vmax.f32 %v2268_v12, 1e-24  ;;  %v340_v63 = vunpack.c.h.bf16 %v5154_v25  ;;  %v342_v37 = vunpack.c.h.bf16 %v5157_v7 }
 0x1fc   : > { %v2121_v38 = vadd.f32 %v2097_v13, %v1913_v57  ;;  %v2122_v59 = vadd.f32 %v2098_v55, %v1914_v1  ;;  %v2119_v26 = vadd.f32 %v2095_v35, %v1911_v2  ;;  %v2120_v9 = vadd.f32 %v2096_v44, %v1912_v31  ;;  %v5187_v35 = vld [vmem:[%s5939_s2 + $0x50] sm:$0xff] }
 0x1fd   : > { %3339 = vrsqrt.f32 %v2280_v49  ;;  %v6408_v15 = vmov 0   ;;  %v339_v24 = vunpack.c.l.bf16 %v5154_v25  ;;  %v341_v52 = vunpack.c.l.bf16 %v5157_v7  ;;  %v6410_v55 = vld [vmem:[#allocation72_spill] sm:$0xff]  ;;  %v5206_v49 = vld [vmem:[%s5939_s2 + $0x58] sm:$0xff] }
 0x1fe   : > { %v5111_v27 = vadd.f32 %v2169_v40, %v2121_v38  ;;  %v5113_v5 = vadd.f32 %v2169_v40, %v2122_v59  ;;  %v5115_v11 = vadd.f32 %v2164_v58, %v2119_v26  ;;  %v5117_v61 = vadd.f32 %v2164_v58, %v2120_v9  ;;  %v6411_v38 = vld [vmem:[#allocation3_spill] sm:$0xff]  ;;  %v6412_v26 = vld [vmem:[#allocation17_spill] sm:$0xff] }
 0x1ff   : > { %v5168_v18 = vpack.i.bf16 %v342_v37, %v340_v63  ;;  %v6409_v42 = vmov 1   ;;  %v5178_v1 = vpack.i.bf16 %v341_v52, %v339_v24  ;;  %v6413_v58 = vld [vmem:[#allocation71_spill] sm:$0xff] }
 0x200   : > { %v2241_v62 = vmul.f32 %v5111_v27, %v5111_v27  ;;  %v2242_v28 = vmul.f32 %v5113_v5, %v5113_v5  ;;  %v2239_v3 = vmul.f32 %v5115_v11, %v5115_v11  ;;  %v2240_v32 = vmul.f32 %v5117_v61, %v5117_v61 }
 0x202   : > { %v2260_v10 = vadd.f32 %v2242_v28, %v2241_v62  ;;  %v2257_v34 = vadd.f32 %v2240_v32, %v2239_v3  ;;  %v6414_v3 = vmov 2  }
 0x204   : > { %2261 = vadd.xlane.f32.xlu1 %v2260_v10  ;;  %2258 = vadd.xlane.f32.xlu0 %v2257_v34 }
 0x207   : > { %v3340_v44 = vpop.eup %3339 }
 0x208   : > { %v2302_v40 = vmul.f32 %v3340_v44, %v6410_v55  ;;  %v2301_v62 = vmul.f32 %v3340_v44, %v6413_v58  ;;  %v5228_v44 = vld [vmem:[%s3456_s14 + $0x58] sm:$0xff] }
 0x209   : > { %v6100_v55 = vunpack.c.l.bf16 %v5228_v44 }
 0x215   : > { %2375 = vperm.xlu1 %3148, %v2365_v48   ;;  %v6415_v48 = vld [vmem:[#allocation15_spill] sm:$0xff] }
 0x219   : > { %2380 = vperm.xlu1 %3148, %v2366_v45  }
 0x21a   : > { %2370 = vperm.xlu0 %3127, %v2364_v6   ;;  %v6416_v6 = vld [vmem:[#allocation21_spill] sm:$0xff] }
 0x21d   : > { %3150 = vset.pattern.permute.xlu1 %v6407_v23 }
 0x21e   : > { %2385 = vperm.xlu0 %3127, %v2367_v54   ;;  %417 = vperm.xlu1 %3150, %v5144_v21  }
 0x222   : > { %3149 = vset.pattern.permute.xlu0 %v6407_v23  ;;  %3151 = vset.pattern.permute.xlu1 %v6408_v15 }
 0x223   : > { %412 = vperm.xlu0 %3149, %v5149_v17   ;;  %v2271_v36 = vpop.xlane.xlu0 %2270  ;;  %608 = vperm.xlu1 %3151, %v5149_v17  }
 0x224   : > { %v2281_v46 = vmax.f32 %v2271_v36, 1e-24  ;;  %v6417_v36 = vld [vmem:[#allocation12_spill] sm:$0xff] }
 0x227   : > { %3176 = vset.pattern.permute.xlu0 %v6409_v42  ;;  %612 = vperm.xlu1 %3151, %v5144_v21  }
 0x228   : > { %v2265_v43 = vpop.xlane.xlu1 %2264  ;;  %3160 = vrot.lane.b32.xlu0 %v5168_v18, %s3367_s15 }
 0x229   : > { %v2279_v57 = vmax.f32 %v2265_v43, 1e-24 }
 0x22b   : > { %3341 = vrsqrt.f32 %v2279_v57  ;;  %3152 = vset.pattern.permute.xlu1 %v6409_v42 }
 0x22c   : > { %v2274_v2 = vpop.xlane.xlu1 %2273  ;;  %3343 = vrsqrt.f32 %v2281_v46  ;;  %3167 = vrot.lane.b32.xlu0 %v5178_v1, %s3370_s19  ;;  %818 = vperm.xlu1 %3152, %v5149_v17   ;;  %v6418_v46 = vld [vmem:[#allocation31_spill] sm:$0xff] }
 0x22d   : > { %v2282_v31 = vmax.f32 %v2274_v2, 1e-24 }
 0x22f   : > { %3345 = vrsqrt.f32 %v2282_v31  ;;  %v5225_v31 = vld [vmem:[%s3456_s14 + $0x50] sm:$0xff] }
 0x230   : > { %826 = vperm.xlu0 %3176, %v5187_v35   ;;  %822 = vperm.xlu1 %3152, %v5144_v21  }
 0x234   : > { %3190 = vrot.lane.b32.xlu0 %v5178_v1, %s3369_s18  ;;  %3153 = vset.pattern.permute.xlu1 %v6407_v23  ;;  %v6419_v23 = vmov 3  }
 0x235   : > { %v3342_v13 = vpop.eup %3341  ;;  %3199 = vset.pattern.permute.xlu0 %v6414_v3  ;;  %422 = vperm.xlu1 %3153, %v5187_v35  }
 0x236   : > { %v2300_v59 = vmul.f32 %v3342_v13, %v6411_v38  ;;  %v2299_v9 = vmul.f32 %v3342_v13, %v6412_v26  ;;  %v3344_v28 = vpop.eup %3343  ;;  %v6102_v13 = vunpack.c.l.bf16 %v5225_v31  ;;  %v6099_v38 = vunpack.c.h.bf16 %v5228_v44 }
 0x237   : > { %v2304_v45 = vmul.f32 %v3344_v28, %v6415_v48  ;;  %v2303_v57 = vmul.f32 %v3344_v28, %v6418_v46  ;;  %v6422_v28 = vmov 5  }
 0x238   : > { %v2312_v32 = vpack.c.bf16 %v2302_v40, %v2300_v59  ;;  %v2311_v10 = vpack.c.bf16 %v2301_v62, %v2299_v9  ;;  %1037 = vperm.xlu0 %3199, %v5187_v35   ;;  %v5239_v40 = vpack.i.bf16 %v6100_v55, %v6102_v13 }
 0x239   : > { %v3346_v34 = vpop.eup %3345  ;;  %427 = vperm.xlu1 %3153, %v5206_v49  }
 0x23a   : > { %2315 = vmatprep.subr.bf16.mxu0 %v2312_v32  ;;  %v2306_v54 = vmul.f32 %v3346_v34, %v6416_v6  ;;  %v2305_v43 = vmul.f32 %v3346_v34, %v6417_v36  ;;  %6420 = vst [vmem:[#allocation25_spill] sm:$0xff] %v5239_v40 }
 0x23b   : > { %2316 = vmatpush1.bf16.xpose.msra.mxu0 %v2311_v10 }
 0x23c   : > { %v2314_v12 = vpack.c.bf16 %v2306_v54, %v2304_v45  ;;  %3200 = vset.pattern.permute.xlu0 %v6419_v23  ;;  %v2313_v2 = vpack.c.bf16 %v2305_v43, %v2303_v57 }
 0x23d   : > { %1244 = vperm.xlu0 %3200, %v5144_v21   ;;  %3155 = vrot.lane.b32.xlu1 %v5178_v1, %s3367_s15 }
 0x23e   : > { %2317 = vmatprep.subr.bf16.mxu0 %v2314_v12  ;;  %3164 = vset.pattern.permute.xlu1 %v6408_v15 }
 0x241   : > { %616 = vperm.xlu1 %3164, %v5187_v35  }
 0x243   : > { %2318 = vmatpush1.bf16.xpose.msra.mxu0 %v2313_v2 }
 0x245   : > { %3165 = vset.pattern.permute.xlu1 %v6414_v3 }
 0x246   : > { %1029 = vperm.xlu1 %3165, %v5149_v17  }
 0x24a   : > { %1033 = vperm.xlu1 %3165, %v5144_v21  }
 0x24e   : > { %3172 = vrot.lane.b32.xlu1 %v5168_v18, %s3370_s19 }
 0x24f   : > { %3177 = vset.pattern.permute.xlu1 %v6409_v42  ;;  %v6101_v42 = vunpack.c.h.bf16 %v5225_v31 }
 0x251   : > { %v5249_v59 = vpack.i.bf16 %v6099_v38, %v6101_v42 }
 0x252   : > { %830 = vperm.xlu1 %3177, %v5206_v49  }
 0x253   : > { %6421 = vst [vmem:[#allocation27_spill] sm:$0xff] %v5249_v59 }
 0x256   : > { %3178 = vset.pattern.permute.xlu1 %v6419_v23 }
 0x257   : > { %1240 = vperm.xlu1 %3178, %v5149_v17  }
 0x25b   : > { %3180 = vrot.lane.b32.xlu1 %v5239_v40, %s3367_s15 }
 0x25c   : > { %3201 = vset.pattern.permute.xlu1 %v6414_v3 }
 0x25f   : > { %3185 = vrot.lane.b32.xlu1 %v5249_v59, %s3367_s15 }
 0x263   : > { %3195 = vrot.lane.b32.xlu1 %v5168_v18, %s3369_s18 }
 0x267   : > { %1041 = vperm.xlu1 %3201, %v5206_v49  }
 0x26b   : > { %v2253_v58 = vpop.xlane.xlu0 %2252  ;;  %3202 = vset.pattern.permute.xlu1 %v6422_v28 }
 0x26c   : > { %v2256_v26 = vpop.xlane.xlu1 %2255  ;;  %v2275_v62 = vmax.f32 %v2253_v58, 1e-24 }
 0x26d   : > { %v2276_v9 = vmax.f32 %v2256_v26, 1e-24 }
 0x26f   : > { %3347 = vrsqrt.f32 %v2276_v9 }
 0x270   : > { %3349 = vrsqrt.f32 %v2275_v62 }
 0x279   : > { %v3348_v32 = vpop.eup %3347 }
 0x27a   : > { %v3350_v10 = vpop.eup %3349  ;;  %v2294_v3 = vmul.f32 %v3348_v32, %v4962_v16  ;;  %v2293_v34 = vmul.f32 %v3348_v32, %v4960_v22 }
 0x27b   : > { %v2292_v48 = vmul.f32 %v3350_v10, %v4958_v33  ;;  %v2291_v45 = vmul.f32 %v3350_v10, %v4956_v20 }
 0x27d   : > { %v2308_v6 = vpack.c.bf16 %v2294_v3, %v2292_v48  ;;  %v2307_v54 = vpack.c.bf16 %v2293_v34, %v2291_v45 }
 0x27f   : > { %2347 = vmatprep.mubr.bf16.mxu0 %v2308_v6 }
 0x280   : > { %2348 = vmatmul.mubr.bf16.vlgmr.msra.gmra.mrb[0].mxu0 %v2307_v54 }
 0x291   : > { %v2262_v12 = vpop.xlane.xlu1 %2261  ;;  %v2259_v36 = vpop.xlane.xlu0 %2258 }
 0x292   : > { %v2278_v43 = vmax.f32 %v2262_v12, 1e-24  ;;  %v2277_v46 = vmax.f32 %v2259_v36, 1e-24 }
 0x294   : > { %3351 = vrsqrt.f32 %v2278_v43 }
 0x295   : > { %3353 = vrsqrt.f32 %v2277_v46  ;;  %v5262_v57 = vpop.permute.xlu1 %2375 }
 0x299   : > { %v5268_v9 = vpop.permute.xlu1 %2380 }
 0x29d   : > { %v418_v32 = vpop.permute.xlu1 %417 }
 0x29e   : > { %v3352_v2 = vpop.eup %3351 }
 0x29f   : > { %v3354_v16 = vpop.eup %3353  ;;  %v2298_v22 = vmul.f32 %v3352_v2, %v5113_v5  ;;  %v2297_v33 = vmul.f32 %v3352_v2, %v5111_v27 }
 0x2a0   : > { %v2296_v20 = vmul.f32 %v3354_v16, %v5117_v61  ;;  %v2295_v26 = vmul.f32 %v3354_v16, %v5115_v11  ;;  %v5278_v11 = vpop.permute.xlu0 %2370 }
 0x2a2   : > { %v2310_v58 = vpack.c.bf16 %v2298_v22, %v2296_v20  ;;  %v2309_v62 = vpack.c.bf16 %v2297_v33, %v2295_v26  ;;  %v609_v10 = vpop.permute.xlu1 %608  ;;  %v448_v33 = vmul.f32 %v418_v32, %v341_v52 }
 0x2a4   : > { %2355 = vmatprep.mubr.bf16.mxu0 %v2310_v58  ;;  %v5282_v12 = vpop.permute.xlu0 %2385  ;;  %v449_v58 = vmul.f32 %v418_v32, %v342_v37  ;;  %v6425_v37 = vld [vmem:[#allocation48_spill] sm:$0xff] }
 0x2a5   : > { %2356 = vmatmul.mubr.bf16.gmra.mrb[4].mxu0 %v2309_v62 }
 0x2a6   : > { %v613_v3 = vpop.permute.xlu1 %612 }
 0x2a8   : > { %v413_v43 = vpop.permute.xlu0 %412 }
 0x2a9   : > { %v446_v38 = vmul.f32 %v413_v43, %v339_v24  ;;  %v447_v55 = vmul.f32 %v413_v43, %v340_v63  ;;  %v6426_v24 = vld [vmem:[#allocation51_spill] sm:$0xff] }
 0x2ab   : > { %v819_v34 = vpop.permute.xlu1 %818 }
 0x2ac   : > { %v3161_v22 = vpop.permute.xlu0 %3160 }
 0x2ad   : > { %v3163_v20 = vunpack.i.h.bf16 %v3161_v22  ;;  %v3162_v26 = vunpack.i.l.bf16 %v3161_v22 }
 0x2af   : > { %v823_v48 = vpop.permute.xlu1 %822 }
 0x2b0   : > { %v3168_v43 = vpop.permute.xlu0 %3167 }
 0x2b1   : > { %v3170_v50 = vunpack.i.h.bf16 %v3168_v43  ;;  %v3169_v41 = vunpack.i.l.bf16 %v3168_v43 }
 0x2b4   : > { %v5270_v45 = vpop.permute.xlu1 %422 }
 0x2b8   : > { %v5272_v5 = vpop.permute.xlu1 %427 }
 0x2b9   : > { %6423 = vst [vmem:[#allocation22_spill] sm:$0xff] %v5272_v5  ;;  %v5312_v5 = vpop.permute.xlu0 %826 }
 0x2bc   : > { %v3156_v27 = vpop.permute.xlu1 %3155 }
 0x2bd   : > { %v3158_v2 = vunpack.i.h.bf16 %v3156_v27  ;;  %v3157_v16 = vunpack.i.l.bf16 %v3156_v27 }
 0x2bf   : > { %v514_v27 = vsel %vm504_vm8, %v3158_v2, %v3163_v20  ;;  %v526_v52 = vsel %vm504_vm8, %v3163_v20, %v3158_v2  ;;  %v513_v22 = vsel %vm504_vm8, %v3157_v16, %v3162_v26  ;;  %v525_v7 = vsel %vm504_vm8, %v3162_v26, %v3157_v16 }
 0x2c0   : > { %v5274_v6 = vpop.permute.xlu1 %616  ;;  %v569_v32 = vmul.f32 %v6425_v37, %v526_v52  ;;  %v570_v13 = vmul.f32 %v6426_v24, %v514_v27  ;;  %v567_v25 = vmul.f32 %v6425_v37, %v525_v7  ;;  %v568_v63 = vmul.f32 %v6426_v24, %v513_v22 }
 0x2c2   : > { %v641_v8 = vmul.f32 %v613_v3, %v569_v32  ;;  %v642_v2 = vmul.f32 %v613_v3, %v570_v13  ;;  %v639_v20 = vmul.f32 %v609_v10, %v567_v25 }
 0x2c4   : > { %v665_v27 = vadd.f32 %v641_v8, %v448_v33  ;;  %v666_v52 = vadd.f32 %v642_v2, %v449_v58  ;;  %v663_v7 = vadd.f32 %v639_v20, %v446_v38  ;;  %v3191_v2 = vpop.permute.xlu0 %3190 }
 0x2c5   : > { %v5276_v61 = vpop.permute.xlu1 %1029 }
 0x2c9   : > { %v5280_v54 = vpop.permute.xlu1 %1033 }
 0x2cd   : > { %v3173_v36 = vpop.permute.xlu1 %3172 }
 0x2ce   : > { %v3175_v62 = vunpack.i.h.bf16 %v3173_v36  ;;  %v3174_v0 = vunpack.i.l.bf16 %v3173_v36 }
 0x2d0   : > { %v729_v16 = vsel %vm719_vm0, %v3170_v50, %v3175_v62  ;;  %v741_v26 = vsel %vm719_vm0, %v3175_v62, %v3170_v50  ;;  %v740_v3 = vsel %vm719_vm0, %v3174_v0, %v3169_v41 }
 0x2d1   : > { %v5284_v46 = vpop.permute.xlu1 %830  ;;  %v779_v36 = vmul.f32 %v4023_v14, %v741_v26  ;;  %v780_v13 = vmul.f32 %v6256_v51, %v729_v16  ;;  %v777_v32 = vmul.f32 %v4023_v14, %v740_v3 }
 0x2d2   : > { %6424 = vst [vmem:[#allocation20_spill] sm:$0xff] %v5284_v46  ;;  %v640_v46 = vmul.f32 %v609_v10, %v568_v63  ;;  %v728_v10 = vsel %vm719_vm0, %v3169_v41, %v3174_v0 }
 0x2d3   : > { %v778_v50 = vmul.f32 %v6256_v51, %v728_v10  ;;  %v851_v33 = vmul.f32 %v823_v48, %v779_v36  ;;  %v852_v38 = vmul.f32 %v823_v48, %v780_v13  ;;  %v3193_v13 = vunpack.i.h.bf16 %v3191_v2 }
 0x2d4   : > { %v664_v22 = vadd.f32 %v640_v46, %v447_v55  ;;  %v849_v46 = vmul.f32 %v819_v34, %v777_v32 }
 0x2d5   : > { %v850_v58 = vmul.f32 %v819_v34, %v778_v50  ;;  %v875_v62 = vadd.f32 %v851_v33, %v665_v27  ;;  %v876_v25 = vadd.f32 %v852_v38, %v666_v52  ;;  %v3192_v34 = vunpack.i.l.bf16 %v3191_v2 }
 0x2d6   : > { %v5294_v42 = vpop.permute.xlu1 %1240  ;;  %v873_v41 = vadd.f32 %v849_v46, %v663_v7 }
 0x2d7   : > { %v874_v0 = vadd.f32 %v850_v58, %v664_v22 }
 0x2da   : > { %v3181_v56 = vpop.permute.xlu1 %3180 }
 0x2db   : > { %v3182_v39 = vunpack.i.l.bf16 %v3181_v56 }
 0x2de   : > { %v3186_v8 = vpop.permute.xlu1 %3185 }
 0x2df   : > { %v3187_v55 = vunpack.i.l.bf16 %v3186_v8 }
 0x2e1   : > { %v515_v63 = vsel %vm504_vm8, %v3182_v39, %v3187_v55  ;;  %v527_v43 = vsel %vm504_vm8, %v3187_v55, %v3182_v39 }
 0x2e2   : > { %v571_v20 = vmul.f32 %v6425_v37, %v527_v43  ;;  %v572_v16 = vmul.f32 %v6426_v24, %v515_v63  ;;  %v3196_v26 = vpop.permute.xlu1 %3195 }
 0x2e3   : > { %v3198_v48 = vunpack.i.h.bf16 %v3196_v26  ;;  %v3197_v36 = vunpack.i.l.bf16 %v3196_v26 }
 0x2e4   : > { %v5329_v27 = vmul.f32 %v5274_v6, %v571_v20  ;;  %v5332_v52 = vmul.f32 %v5274_v6, %v572_v16  ;;  %v3183_v20 = vunpack.i.h.bf16 %v3181_v56  ;;  %v3188_v16 = vunpack.i.h.bf16 %v3186_v8 }
 0x2e5   : > { %v939_v39 = vsel %vm929_vm3, %v3193_v13, %v3198_v48  ;;  %v951_v7 = vsel %vm929_vm3, %v3198_v48, %v3193_v13  ;;  %v938_v22 = vsel %vm929_vm3, %v3192_v34, %v3197_v36  ;;  %v950_v10 = vsel %vm929_vm3, %v3197_v36, %v3192_v34 }
 0x2e6   : > { %v990_v3 = vmul.f32 %v4063_v53, %v951_v7  ;;  %v991_v32 = vmul.f32 %v6388_v19, %v939_v39  ;;  %v988_v50 = vmul.f32 %v4063_v53, %v950_v10  ;;  %v989_v6 = vmul.f32 %v6388_v19, %v938_v22 }
 0x2e7   : > { %v5360_v26 = vsel %vm504_vm8, %v3183_v20, %v3188_v16 }
 0x2e8   : > { %v1062_v33 = vmul.f32 %v5280_v54, %v990_v3  ;;  %v1063_v38 = vmul.f32 %v5280_v54, %v991_v32  ;;  %v1060_v55 = vmul.f32 %v5276_v61, %v988_v50  ;;  %v1061_v46 = vmul.f32 %v5276_v61, %v989_v6  ;;  %v5369_v61 = vld [vmem:[%s5942_s5] sm:$0xff]  ;;  %v5421_v50 = vld [vmem:[%s5942_s5 + $0x18] sm:$0xff] }
 0x2e9   : > { %v5364_v54 = vsel %vm504_vm8, %v3188_v16, %v3183_v20  ;;  %6427 = vst [vmem:[#allocation47_spill] sm:$0xff] %v5369_v61  ;;  %vm2396_vm11 = vcmp.gt.f32.partialorder %v5369_v61, 0.5  ;;  %6436 = vst [vmem:[#allocation37_spill] sm:$0xff] %v5421_v50  ;;  %vm2399_vm5 = vcmp.gt.f32.partialorder %v5421_v50, 0.5  ;;  %v2148_v20 = vld [vmem:[%s5940_s3 + $0x48] sm:$0xff] }
 0x2ea   : > { %v5350_v58 = vadd.f32 %v1062_v33, %v875_v62  ;;  %v5352_v63 = vadd.f32 %v1063_v38, %v876_v25  ;;  %v5354_v43 = vadd.f32 %v1060_v55, %v873_v41  ;;  %v5356_v2 = vadd.f32 %v1061_v46, %v874_v0  ;;  %v5374_v62 = vld [vmem:[%s5942_s5 + $0x8] sm:$0xff] }
 0x2eb   : > { %6428 = vst [vmem:[#allocation24_spill] sm:$0xff] %v5374_v62  ;;  %vm2397_vm8 = vcmp.gt.f32.partialorder %v5374_v62, 0.5  ;;  %v6440_v38 = vmov 7   ;;  %v6441_v55 = vmov 8  }
 0x353   : > { %v2349_v56 = vpop.f32.mrb[0].mxu0 }
 0x354   : > { %v5378_v8 = vmul.f32 %v5278_v11, %v2349_v56  ;;  %v2351_v25 = vpop.f32.mrb[1].mxu0 }
 0x355   : > { %v2352_v41 = vpop.f32.mrb[2].mxu0 }
 0x356   : > { %6429 = vst [vmem:[#allocation19_spill] sm:$0xff] %v5378_v8  ;;  %v5384_v0 = vsel %vm2396_vm11, %v5378_v8, -3e+38  ;;  %v5387_v48 = vmul.f32 %v5262_v57, %v2352_v41  ;;  %v2354_v36 = vpop.f32.mrb[3].mxu0  ;;  %v5405_v57 = vld [vmem:[%s5942_s5 + $0x10] sm:$0xff] }
 0x357   : > { %6430 = vst [vmem:[#allocation39_spill] sm:$0xff] %v5384_v0  ;;  %v2405_v13 = vsel %vm2404_vm15, %v5384_v0, -inf  ;;  %6433 = vst [vmem:[#allocation32_spill] sm:$0xff] %v5405_v57  ;;  %vm2398_vm1 = vcmp.gt.f32.partialorder %v5405_v57, 0.5 }
 0x358   : > { %6431 = vst [vmem:[#allocation60_spill] sm:$0xff] %v5387_v48  ;;  %v5394_v11 = vsel %vm2397_vm8, %v5387_v48, -3e+38  ;;  %2406 = vmax.xlane.f32.xlu1 %v2405_v13 }
 0x359   : > { %6432 = vst [vmem:[#allocation46_spill] sm:$0xff] %v5394_v11  ;;  %v2408_v34 = vsel %vm2404_vm15, %v5394_v11, -inf }
 0x35a   : > { %2409 = vmax.xlane.f32.xlu0 %v2408_v34 }
 0x369   : > { %1448 = vperm.xlu1 %3202, %v5149_v17  }
 0x36d   : > { %3204 = vrot.lane.b32.xlu1 %v5239_v40, %s3370_s19 }
 0x36e   : > { %3224 = vset.pattern.permute.xlu1 %v6419_v23 }
 0x378   : > { %v2357_v39 = vpop.f32.mrb[4].mxu0 }
 0x379   : > { %v5409_v7 = vmul.f32 %v5268_v9, %v2357_v39  ;;  %v2359_v22 = vpop.f32.mrb[5].mxu0 }
 0x37a   : > { %v2360_v10 = vpop.f32.mrb[6].mxu0 }
 0x37b   : > { %6434 = vst [vmem:[#allocation38_spill] sm:$0xff] %v5409_v7  ;;  %v5414_v3 = vsel %vm2398_vm1, %v5409_v7, -3e+38  ;;  %v2362_v32 = vpop.f32.mrb[7].mxu0  ;;  %v5424_v9 = vmul.f32 %v5282_v12, %v2360_v10  ;;  %v6439_v12 = vmov 6  }
 0x37c   : > { %6435 = vst [vmem:[#allocation53_spill] sm:$0xff] %v5414_v3  ;;  %v2411_v23 = vsel %vm2404_vm15, %v5414_v3, -inf }
 0x37d   : > { %2412 = vmax.xlane.f32.xlu0 %v2411_v23  ;;  %6437 = vst [vmem:[#allocation49_spill] sm:$0xff] %v5424_v9  ;;  %v5430_v6 = vsel %vm2399_vm5, %v5424_v9, -3e+38 }
 0x37e   : > { %6438 = vst [vmem:[#allocation69_spill] sm:$0xff] %v5430_v6  ;;  %v2414_v33 = vsel %vm2404_vm15, %v5430_v6, -inf }
 0x391   : > { %2415 = vmax.xlane.f32.xlu1 %v2414_v33 }
 0x393   : > { %3214 = vrot.lane.b32.xlu0 %v5178_v1, %s3376_s29 }
 0x397   : > { %1248 = vperm.xlu0 %3200, %v5187_v35  }
 0x39b   : > { %3223 = vset.pattern.permute.xlu0 %v6422_v28 }
 0x39c   : > { %1452 = vperm.xlu0 %3223, %v5144_v21  }
 0x3a0   : > { %3237 = vrot.lane.b32.xlu0 %v5178_v1, %s3375_s26 }
 0x3a2   : > { %3209 = vrot.lane.b32.xlu1 %v5249_v59, %s3370_s19 }
 0x3a4   : > { %1456 = vperm.xlu0 %3223, %v5187_v35  }
 0x3a6   : > { %3219 = vrot.lane.b32.xlu1 %v5168_v18, %s3376_s29 }
 0x3a8   : > { %3246 = vset.pattern.permute.xlu0 %v6439_v12 }
 0x3a9   : > { %1664 = vperm.xlu0 %3246, %v5144_v21  }
 0x3aa   : > { %1252 = vperm.xlu1 %3224, %v5206_v49  }
 0x3ad   : > { %3260 = vrot.lane.b32.xlu0 %v5178_v1, %s3378_s30 }
 0x3ae   : > { %3225 = vset.pattern.permute.xlu1 %v6439_v12 }
 0x3af   : > { %1660 = vperm.xlu1 %3225, %v5149_v17  }
 0x3b1   : > { %1668 = vperm.xlu0 %3246, %v5187_v35  }
 0x3b3   : > { %3227 = vrot.lane.b32.xlu1 %v5239_v40, %s3369_s18 }
 0x3b4   : > { %3247 = vset.pattern.permute.xlu1 %v6422_v28 }
 0x3b5   : > { %3269 = vset.pattern.permute.xlu0 %v6440_v38 }
 0x3b6   : > { %1872 = vperm.xlu0 %3269, %v5144_v21  }
 0x3b7   : > { %3232 = vrot.lane.b32.xlu1 %v5249_v59, %s3369_s18  ;;  %s2753_s18 = sshll.u32 %s6478_s28, 6 }
 0x3ba   : > { %3283 = vrot.lane.b32.xlu0 %v5178_v1, %s3372_s24 }
 0x3bb   : > { %3242 = vrot.lane.b32.xlu1 %v5168_v18, %s3375_s26 }
 0x3be   : > { %1876 = vperm.xlu0 %3269, %v5187_v35  }
 0x3bf   : > { %1460 = vperm.xlu1 %3247, %v5206_v49  }
 0x3c2   : > { %3292 = vset.pattern.permute.xlu0 %v6441_v55 }
 0x3c3   : > { %2080 = vperm.xlu0 %3292, %v5144_v21   ;;  %3248 = vset.pattern.permute.xlu1 %v6440_v38  ;;  %v5493_v21 = vpop.permute.xlu1 %1041 }
 0x3c4   : > { %1868 = vperm.xlu1 %3248, %v5149_v17  }
 0x3c7   : > { %3300 = vrot.lane.b32.xlu0 %v5249_v59, %s3378_s30 }
 0x3c8   : > { %3250 = vrot.lane.b32.xlu1 %v5239_v40, %s3376_s29 }
 0x3c9   : > { %3270 = vset.pattern.permute.xlu1 %v6439_v12  ;;  %v6444_v12 = vunpack.c.l.bf16 %v5225_v31 }
 0x3cb   : > { %3310 = vrot.lane.b32.xlu0 %v5168_v18, %s3374_s25 }
 0x3cc   : > { %3255 = vrot.lane.b32.xlu1 %v5249_v59, %s3376_s29  ;;  %s305_s29 = scalar_lea.vmem %s5945_s8, %s2753_s18 }
 0x3cf   : > { %2088 = vperm.xlu0 %3292, %v5206_v49  }
 0x3d0   : > { %3265 = vrot.lane.b32.xlu1 %v5168_v18, %s3378_s30 }
 0x3d3   : > { %3315 = vset.pattern.permute.xlu0 %v6408_v15 }
 0x3d4   : > { %620 = vperm.xlu0 %3315, %v5206_v49   ;;  %1672 = vperm.xlu1 %3270, %v5206_v49  }
 0x3d8   : > { %3271 = vset.pattern.permute.xlu1 %v6441_v55 }
 0x3d9   : > { %2076 = vperm.xlu1 %3271, %v5149_v17  }
 0x3dd   : > { %3273 = vrot.lane.b32.xlu1 %v5239_v40, %s3375_s26 }
 0x3de   : > { %3293 = vset.pattern.permute.xlu1 %v6440_v38  ;;  %v450_v38 = vmul.f32 %v5270_v45, %v6444_v12 }
 0x3e0   : > { %v667_v50 = vadd.f32 %v5329_v27, %v450_v38 }
 0x3e1   : > { %3278 = vrot.lane.b32.xlu1 %v5249_v59, %s3375_s26 }
 0x3e5   : > { %3288 = vrot.lane.b32.xlu1 %v5168_v18, %s3372_s24  ;;  %v2407_v28 = vpop.xlane.xlu1 %2406  ;;  %v2147_v18 = vld [vmem:[%s5940_s3 + $0x40] sm:$0xff] }
 0x3e6   : > { %vm2417_vm6 = vcmp.ge.f32.partialorder %v5384_v0, %v2407_v28 }
 0x3e7   : > { %v5502_v17 = vsel %vm2417_vm6, -3e+38, %v5384_v0  ;;  %v6447_v0 = vunpack.c.l.bf16 %v5228_v44 }
 0x3e8   : > { %v2425_v46 = vsel %vm2404_vm15, %v5502_v17, -inf }
 0x3e9   : > { %1880 = vperm.xlu1 %3293, %v5206_v49   ;;  %v5513_v49 = vpop.permute.xlu0 %1037  ;;  %v5525_v36 = vpop.permute.xlu1 %1448 }
 0x3ed   : > { %3295 = vrot.lane.b32.xlu1 %v5239_v40, %s3378_s30  ;;  %v3205_v34 = vpop.permute.xlu1 %3204 }
 0x3ee   : > { %3314 = vset.pattern.permute.xlu1 %v6441_v55 }
 0x3f1   : > { %3305 = vrot.lane.b32.xlu1 %v5178_v1, %s3374_s25  ;;  %v1245_v1 = vpop.permute.xlu0 %1244 }
 0x3f3   : > { %2426 = vmax.xlane.f32.xlu0 %v2425_v46  ;;  %v3207_v46 = vunpack.i.h.bf16 %v3205_v34 }
 0x3f5   : > { %2084 = vperm.xlu1 %3314, %v5187_v35   ;;  %v2410_v16 = vpop.xlane.xlu0 %2409 }
 0x3f6   : > { %vm2418_vm9 = vcmp.ge.f32.partialorder %v5394_v11, %v2410_v16 }
 0x3f7   : > { %v5533_v22 = vsel %vm2418_vm9, -3e+38, %v5394_v11  ;;  %v6448_v11 = vld [vmem:[#allocation22_spill] sm:$0xff] }
 0x3f8   : > { %6442 = vst [vmem:[#allocation50_spill] sm:$0xff] %v5533_v22  ;;  %v2428_v33 = vsel %vm2404_vm15, %v5533_v22, -inf }
 0x3f9   : > { %3316 = vset.pattern.permute.xlu1 %v6408_v15 }
 0x3fa   : > { %2193 = vperm.xlu1 %3316, %v2147_v18   ;;  %v3206_v18 = vunpack.i.l.bf16 %v3205_v34 }
 0x3fe   : > { %2198 = vperm.xlu1 %3316, %v2148_v20  }
 0x40a   : > { %v2413_v56 = vpop.xlane.xlu0 %2412 }
 0x40b   : > { %vm2419_vm13 = vcmp.ge.f32.partialorder %v5414_v3, %v2413_v56  ;;  %v6445_v56 = vunpack.c.h.bf16 %v5225_v31 }
 0x40c   : > { %v5521_v35 = vsel %vm2419_vm13, -3e+38, %v5414_v3 }
 0x40d   : > { %v2431_v25 = vsel %vm2404_vm15, %v5521_v35, -inf }
 0x40e   : > { %2432 = vmax.xlane.f32.xlu0 %v2431_v25  ;;  %v3215_v41 = vpop.permute.xlu0 %3214  ;;  %v451_v25 = vmul.f32 %v5270_v45, %v6445_v56 }
 0x40f   : > { %v3216_v7 = vunpack.i.l.bf16 %v3215_v41 }
 0x416   : > { %v5527_v13 = vpop.permute.xlu0 %1248 }
 0x41b   : > { %v5529_v39 = vpop.permute.xlu0 %1452 }
 0x41e   : > { %v2416_v10 = vpop.xlane.xlu1 %2415 }
 0x41f   : > { %v5535_v32 = vpop.permute.xlu0 %3237  ;;  %vm2420_vm7 = vcmp.ge.f32.partialorder %v5430_v6, %v2416_v10  ;;  %v3217_v10 = vunpack.i.h.bf16 %v3215_v41 }
 0x420   : > { %v5539_v23 = vsel %vm2420_vm7, -3e+38, %v5430_v6 }
 0x421   : > { %6443 = vst [vmem:[#allocation81_spill] sm:$0xff] %v5539_v23  ;;  %v2434_v12 = vsel %vm2404_vm15, %v5539_v23, -inf }
 0x422   : > { %v3210_v55 = vpop.permute.xlu1 %3209  ;;  %2429 = vmax.xlane.f32.xlu1 %v2428_v33 }
 0x423   : > { %v5546_v28 = vpop.permute.xlu0 %1456  ;;  %v3212_v20 = vunpack.i.h.bf16 %v3210_v55  ;;  %v3211_v16 = vunpack.i.l.bf16 %v3210_v55 }
 0x424   : > { %3318 = vrot.lane.b32.xlu0 %v5239_v40, %s3372_s24 }
 0x425   : > { %v5557_v33 = vsel %vm719_vm0, %v3207_v46, %v3212_v20  ;;  %v5561_v34 = vsel %vm719_vm0, %v3212_v20, %v3207_v46  ;;  %v730_v55 = vsel %vm719_vm0, %v3206_v18, %v3211_v16  ;;  %v742_v31 = vsel %vm719_vm0, %v3211_v16, %v3206_v18 }
 0x426   : > { %v781_v45 = vmul.f32 %v4023_v14, %v742_v31  ;;  %v782_v41 = vmul.f32 %v6256_v51, %v730_v55  ;;  %v3220_v56 = vpop.permute.xlu1 %3219  ;;  %2435 = vmax.xlane.f32.xlu1 %v2434_v12  ;;  %v668_v46 = vadd.f32 %v5332_v52, %v451_v25 }
 0x427   : > { %v3222_v9 = vunpack.i.h.bf16 %v3220_v56  ;;  %v3221_v57 = vunpack.i.l.bf16 %v3220_v56 }
 0x428   : > { %v5569_v3 = vpop.permute.xlu0 %1664  ;;  %v853_v20 = vmul.f32 %v5312_v5, %v781_v45  ;;  %v854_v6 = vmul.f32 %v5312_v5, %v782_v41 }
 0x429   : > { %v1149_v18 = vsel %vm1140_vm10, %v3216_v7, %v3221_v57  ;;  %v1150_v16 = vsel %vm1140_vm10, %v3217_v10, %v3222_v9  ;;  %v1161_v12 = vsel %vm1140_vm10, %v3221_v57, %v3216_v7  ;;  %v1162_v55 = vsel %vm1140_vm10, %v3222_v9, %v3217_v10 }
 0x42a   : > { %v877_v31 = vadd.f32 %v853_v20, %v667_v50  ;;  %v878_v27 = vadd.f32 %v854_v6, %v668_v46  ;;  %v1199_v52 = vmul.f32 %v6393_v47, %v1161_v12  ;;  %v1200_v38 = vmul.f32 %v4103_v4, %v1149_v18  ;;  %v5585_v25 = vpop.permute.xlu1 %1252 }
 0x42b   : > { %v1201_v5 = vmul.f32 %v6393_v47, %v1162_v55  ;;  %v1202_v45 = vmul.f32 %v4103_v4, %v1150_v16 }
 0x42c   : > { %v5589_v41 = vpop.permute.xlu0 %3260  ;;  %v1271_v56 = vmul.f32 %v5294_v42, %v1199_v52  ;;  %v1272_v57 = vmul.f32 %v5294_v42, %v1200_v38 }
 0x42d   : > { %v1273_v7 = vmul.f32 %v1245_v1, %v1201_v5  ;;  %v1274_v9 = vmul.f32 %v1245_v1, %v1202_v45 }
 0x42e   : > { %v5594_v50 = vadd.f32 %v1271_v56, %v5354_v43  ;;  %v5597_v6 = vadd.f32 %v1272_v57, %v5356_v2  ;;  %v5599_v10 = vpop.permute.xlu1 %1660 }
 0x42f   : > { %v5602_v46 = vadd.f32 %v1273_v7, %v5350_v58  ;;  %v5605_v20 = vadd.f32 %v1274_v9, %v5352_v63 }
 0x430   : > { %v5607_v18 = vpop.permute.xlu0 %1668 }
 0x432   : > { %v3228_v16 = vpop.permute.xlu1 %3227 }
 0x433   : > { %v3230_v12 = vunpack.i.h.bf16 %v3228_v16  ;;  %v3229_v43 = vunpack.i.l.bf16 %v3228_v16 }
 0x435   : > { %v5609_v42 = vpop.permute.xlu0 %1872 }
 0x436   : > { %v3233_v1 = vpop.permute.xlu1 %3232 }
 0x437   : > { %v3235_v55 = vunpack.i.h.bf16 %v3233_v1  ;;  %v3234_v52 = vunpack.i.l.bf16 %v3233_v1  ;;  %3323 = vrot.lane.b32.xlu1 %v5249_v59, %s3372_s24  ;;  %v6449_v59 = vunpack.c.h.bf16 %v5228_v44 }
 0x439   : > { %v5613_v2 = vpop.permute.xlu0 %3283  ;;  %v940_v58 = vsel %vm929_vm3, %v3229_v43, %v3234_v52  ;;  %v941_v63 = vsel %vm929_vm3, %v3230_v12, %v3235_v55  ;;  %v952_v38 = vsel %vm929_vm3, %v3234_v52, %v3229_v43  ;;  %v953_v5 = vsel %vm929_vm3, %v3235_v55, %v3230_v12 }
 0x43a   : > { %v992_v45 = vmul.f32 %v4063_v53, %v952_v38  ;;  %v993_v56 = vmul.f32 %v6388_v19, %v940_v58  ;;  %v5625_v57 = vpop.permute.xlu1 %3242  ;;  %v3239_v12 = vunpack.i.l.bf16 %v5535_v32  ;;  %v453_v40 = vmul.f32 %v6448_v11, %v6449_v59 }
 0x43b   : > { %v3244_v55 = vunpack.i.l.bf16 %v5625_v57 }
 0x43c   : > { %v1064_v7 = vmul.f32 %v5513_v49, %v992_v45  ;;  %v1065_v9 = vmul.f32 %v5513_v49, %v993_v56 }
 0x43d   : > { %v5629_v16 = vpop.permute.xlu0 %1876  ;;  %v1360_v49 = vsel %vm1351_vm2, %v3239_v12, %v3244_v55 }
 0x43e   : > { %6446 = vst [vmem:[#allocation65_spill] sm:$0xff] %v5629_v16  ;;  %v1088_v1 = vadd.f32 %v1064_v7, %v877_v31  ;;  %v1089_v15 = vadd.f32 %v1065_v9, %v878_v27  ;;  %v5631_v8 = vpop.permute.xlu1 %1460  ;;  %v1372_v31 = vsel %vm1351_vm2, %v3244_v55, %v3239_v12  ;;  %v1407_v45 = vmul.f32 %v4106_v30, %v1360_v49 }
 0x43f   : > { %v1408_v56 = vmul.f32 %v4109_v29, %v1372_v31  ;;  %v452_v16 = vmul.f32 %v6448_v11, %v6447_v0  ;;  %v3262_v12 = vunpack.i.l.bf16 %v5589_v41  ;;  %v573_v49 = vmul.f32 %v6425_v37, %v5364_v54 }
 0x441   : > { %v1480_v23 = vmul.f32 %v5525_v36, %v1408_v56 }
 0x442   : > { %v5633_v43 = vpop.permute.xlu0 %2080 }
 0x443   : > { %v5635_v52 = vpop.permute.xlu1 %1868 }
 0x446   : > { %v5639_v58 = vpop.permute.xlu0 %3300 }
 0x447   : > { %v3251_v38 = vpop.permute.xlu1 %3250 }
 0x448   : > { %v3253_v9 = vunpack.i.h.bf16 %v3251_v38  ;;  %v3252_v48 = vunpack.i.l.bf16 %v3251_v38 }
 0x44a   : > { %v5645_v27 = vpop.permute.xlu0 %3310 }
 0x44b   : > { %v3256_v7 = vpop.permute.xlu1 %3255 }
 0x44c   : > { %v3258_v61 = vunpack.i.h.bf16 %v3256_v7  ;;  %v3257_v62 = vunpack.i.l.bf16 %v3256_v7 }
 0x44e   : > { %v5656_v55 = vpop.permute.xlu0 %2088  ;;  %v1151_v38 = vsel %vm1140_vm10, %v3252_v48, %v3257_v62  ;;  %v1152_v31 = vsel %vm1140_vm10, %v3253_v9, %v3258_v61  ;;  %v1163_v0 = vsel %vm1140_vm10, %v3257_v62, %v3252_v48  ;;  %v1164_v44 = vsel %vm1140_vm10, %v3258_v61, %v3253_v9 }
 0x44f   : > { %6450 = vst [vmem:[#allocation78_spill] sm:$0xff] %v5656_v55  ;;  %v1203_v59 = vmul.f32 %v6393_v47, %v1163_v0  ;;  %v1204_v11 = vmul.f32 %v4103_v4, %v1151_v38  ;;  %v1205_v7 = vmul.f32 %v6393_v47, %v1164_v44  ;;  %v1206_v37 = vmul.f32 %v4103_v4, %v1152_v31  ;;  %v5672_v54 = vpop.permute.xlu1 %3265  ;;  %v6451_v38 = vld [vmem:[#allocation58_spill] sm:$0xff] }
 0x450   : > { %v1479_v55 = vmul.f32 %v5525_v36, %v1407_v45  ;;  %v3267_v22 = vunpack.i.l.bf16 %v5672_v54  ;;  %v574_v62 = vmul.f32 %v6426_v24, %v5360_v26  ;;  %v783_v4 = vmul.f32 %v4023_v14, %v5561_v34 }
 0x451   : > { %v1275_v61 = vmul.f32 %v5527_v13, %v1203_v59  ;;  %v1276_v48 = vmul.f32 %v5527_v13, %v1204_v11  ;;  %v1277_v9 = vmul.f32 %v5585_v25, %v1205_v7  ;;  %v1278_v47 = vmul.f32 %v5585_v25, %v1206_v37  ;;  %v6452_v25 = vld [vmem:[#allocation61_spill] sm:$0xff] }
 0x452   : > { %v784_v45 = vmul.f32 %v6256_v51, %v5557_v33  ;;  %v1568_v36 = vsel %vm1559_vm12, %v3262_v12, %v3267_v22  ;;  %v1580_v24 = vsel %vm1559_vm12, %v3267_v22, %v3262_v12  ;;  %v994_v14 = vmul.f32 %v4063_v53, %v953_v5  ;;  %v6453_v12 = vld [vmem:[#allocation20_spill] sm:$0xff] }
 0x453   : > { %v621_v26 = vpop.permute.xlu0 %620  ;;  %v5691_v56 = vadd.f32 %v1275_v61, %v1088_v1  ;;  %v5693_v13 = vadd.f32 %v1276_v48, %v1089_v15  ;;  %v1619_v31 = vmul.f32 %v6451_v38, %v1568_v36  ;;  %v1620_v0 = vmul.f32 %v6452_v25, %v1580_v24  ;;  %v5697_v44 = vpop.permute.xlu1 %1672 }
 0x454   : > { %v995_v51 = vmul.f32 %v6388_v19, %v941_v63  ;;  %v645_v33 = vmul.f32 %v621_v26, %v573_v49  ;;  %v646_v34 = vmul.f32 %v621_v26, %v574_v62  ;;  %v1503_v1 = vadd.f32 %v1479_v55, %v5594_v50 }
 0x455   : > { %v1691_v59 = vmul.f32 %v5599_v10, %v1619_v31  ;;  %v1692_v22 = vmul.f32 %v5599_v10, %v1620_v0  ;;  %v1504_v15 = vadd.f32 %v1480_v23, %v5597_v6  ;;  %v855_v11 = vmul.f32 %v6453_v12, %v783_v4 }
 0x456   : > { %v856_v7 = vmul.f32 %v6453_v12, %v784_v45  ;;  %v669_v37 = vadd.f32 %v645_v33, %v452_v16  ;;  %v670_v61 = vadd.f32 %v646_v34, %v453_v40  ;;  %v1066_v19 = vmul.f32 %v5493_v21, %v994_v14 }
 0x457   : > { %v5707_v48 = vadd.f32 %v1691_v59, %v1503_v1  ;;  %v5709_v53 = vadd.f32 %v1692_v22, %v1504_v15  ;;  %v1067_v63 = vmul.f32 %v5493_v21, %v995_v51  ;;  %v3240_v23 = vunpack.i.h.bf16 %v5535_v32 }
 0x458   : > { %v879_v5 = vadd.f32 %v855_v11, %v669_v37  ;;  %v880_v10 = vadd.f32 %v856_v7, %v670_v61  ;;  %v5713_v49 = vpop.permute.xlu1 %2076  ;;  %v3245_v50 = vunpack.i.h.bf16 %v5625_v57  ;;  %v3263_v57 = vunpack.i.h.bf16 %v5589_v41 }
 0x45a   : > { %v1090_v6 = vadd.f32 %v1066_v19, %v879_v5  ;;  %v1091_v55 = vadd.f32 %v1067_v63, %v880_v10  ;;  %v1361_v4 = vsel %vm1351_vm2, %v3240_v23, %v3245_v50  ;;  %v1373_v45 = vsel %vm1351_vm2, %v3245_v50, %v3240_v23 }
 0x45b   : > { %v1409_v21 = vmul.f32 %v4106_v30, %v1361_v4  ;;  %v1410_v0 = vmul.f32 %v4109_v29, %v1373_v45  ;;  %v3286_v63 = vunpack.i.h.bf16 %v5613_v2  ;;  %v3285_v5 = vunpack.i.l.bf16 %v5613_v2 }
 0x45c   : > { %v1301_v16 = vadd.f32 %v1277_v9, %v1090_v6  ;;  %v1302_v40 = vadd.f32 %v1278_v47, %v1091_v55  ;;  %v3274_v62 = vpop.permute.xlu1 %3273  ;;  %v3268_v9 = vunpack.i.h.bf16 %v5672_v54  ;;  %v3302_v4 = vunpack.i.l.bf16 %v5639_v58 }
 0x45d   : > { %v3276_v24 = vunpack.i.h.bf16 %v3274_v62  ;;  %v3275_v26 = vunpack.i.l.bf16 %v3274_v62  ;;  %v1481_v1 = vmul.f32 %v5529_v39, %v1409_v21  ;;  %v1482_v61 = vmul.f32 %v5529_v39, %v1410_v0 }
 0x45e   : > { %v1569_v19 = vsel %vm1559_vm12, %v3263_v57, %v3268_v9  ;;  %v3313_v45 = vunpack.i.h.bf16 %v5645_v27  ;;  %v3312_v21 = vunpack.i.l.bf16 %v5645_v27 }
 0x45f   : > { %v1621_v39 = vmul.f32 %v6451_v38, %v1569_v19  ;;  %v6456_v19 = vld [vmem:[#allocation66_spill] sm:$0xff] }
 0x460   : > { %v3279_v36 = vpop.permute.xlu1 %3278 }
 0x461   : > { %v3281_v31 = vunpack.i.h.bf16 %v3279_v36  ;;  %v3280_v32 = vunpack.i.l.bf16 %v3279_v36 }
 0x463   : > { %v1362_v47 = vsel %vm1351_vm2, %v3275_v26, %v3280_v32  ;;  %v1363_v14 = vsel %vm1351_vm2, %v3276_v24, %v3281_v31  ;;  %v1374_v51 = vsel %vm1351_vm2, %v3280_v32, %v3275_v26  ;;  %v1375_v33 = vsel %vm1351_vm2, %v3281_v31, %v3276_v24  ;;  %v6454_v24 = vld [vmem:[#allocation62_spill] sm:$0xff]  ;;  %v6455_v31 = vld [vmem:[#allocation64_spill] sm:$0xff] }
 0x464   : > { %v1411_v34 = vmul.f32 %v4106_v30, %v1362_v47  ;;  %v1412_v41 = vmul.f32 %v4109_v29, %v1374_v51  ;;  %v1413_v59 = vmul.f32 %v4106_v30, %v1363_v14  ;;  %v1414_v54 = vmul.f32 %v4109_v29, %v1375_v33  ;;  %v3289_v22 = vpop.permute.xlu1 %3288 }
 0x465   : > { %v3290_v15 = vunpack.i.l.bf16 %v3289_v22  ;;  %v1581_v30 = vsel %vm1559_vm12, %v3268_v9, %v3263_v57  ;;  %v3291_v29 = vunpack.i.h.bf16 %v3289_v22  ;;  %v1693_v9 = vmul.f32 %v5569_v3, %v1621_v39 }
 0x466   : > { %v1483_v12 = vmul.f32 %v5546_v28, %v1411_v34  ;;  %v1484_v11 = vmul.f32 %v5546_v28, %v1412_v41  ;;  %v1485_v7 = vmul.f32 %v5631_v8, %v1413_v59  ;;  %v1486_v37 = vmul.f32 %v5631_v8, %v1414_v54 }
 0x467   : > { %v1622_v6 = vmul.f32 %v6452_v25, %v1581_v30  ;;  %v1780_v55 = vsel %vm1771_vm4, %v3285_v5, %v3290_v15  ;;  %v1792_v62 = vsel %vm1771_vm4, %v3290_v15, %v3285_v5  ;;  %v1781_v2 = vsel %vm1771_vm4, %v3286_v63, %v3291_v29 }
 0x468   : > { %v5749_v10 = vpop.permute.xlu1 %1880  ;;  %v1507_v28 = vadd.f32 %v1483_v12, %v5691_v56  ;;  %v1508_v23 = vadd.f32 %v1484_v11, %v5693_v13  ;;  %v1509_v8 = vadd.f32 %v1485_v7, %v1301_v16  ;;  %v1510_v50 = vadd.f32 %v1486_v37, %v1302_v40 }
 0x469   : > { %v1793_v56 = vsel %vm1771_vm4, %v3291_v29, %v3286_v63  ;;  %v1505_v13 = vadd.f32 %v1481_v1, %v5602_v46  ;;  %v1506_v16 = vadd.f32 %v1482_v61, %v5605_v20  ;;  %v3303_v40 = vunpack.i.h.bf16 %v5639_v58  ;;  %v6457_v29 = vld [vmem:[#allocation67_spill] sm:$0xff] }
 0x46a   : > { %v1827_v26 = vmul.f32 %v6454_v24, %v1780_v55  ;;  %v1828_v32 = vmul.f32 %v6455_v31, %v1792_v62  ;;  %v1694_v46 = vmul.f32 %v5569_v3, %v1622_v6  ;;  %v1829_v20 = vmul.f32 %v6454_v24, %v1781_v2 }
 0x46b   : > { %v1830_v47 = vmul.f32 %v6455_v31, %v1793_v56 }
 0x46c   : > { %v3296_v36 = vpop.permute.xlu1 %3295  ;;  %v1899_v1 = vmul.f32 %v5635_v52, %v1827_v26  ;;  %v1900_v15 = vmul.f32 %v5635_v52, %v1828_v32 }
 0x46d   : > { %v3298_v57 = vunpack.i.h.bf16 %v3296_v36  ;;  %v3297_v0 = vunpack.i.l.bf16 %v3296_v36 }
 0x46e   : > { %v1923_v36 = vadd.f32 %v1899_v1, %v5707_v48  ;;  %v6461_v1 = vld [vmem:[#allocation27_spill] sm:$0xff] }
 0x46f   : > { %v1570_v58 = vsel %vm1559_vm12, %v3297_v0, %v3302_v4  ;;  %v1571_v27 = vsel %vm1559_vm12, %v3298_v57, %v3303_v40  ;;  %v1582_v14 = vsel %vm1559_vm12, %v3302_v4, %v3297_v0  ;;  %v1583_v51 = vsel %vm1559_vm12, %v3303_v40, %v3298_v57 }
 0x470   : > { %v1623_v33 = vmul.f32 %v6451_v38, %v1570_v58  ;;  %v1624_v3 = vmul.f32 %v6452_v25, %v1582_v14  ;;  %v1625_v34 = vmul.f32 %v6451_v38, %v1571_v27  ;;  %v1626_v41 = vmul.f32 %v6452_v25, %v1583_v51  ;;  %v3306_v59 = vpop.permute.xlu1 %3305 }
 0x471   : > { %v3308_v54 = vunpack.i.h.bf16 %v3306_v59  ;;  %v3307_v22 = vunpack.i.l.bf16 %v3306_v59  ;;  %v1901_v40 = vmul.f32 %v5609_v42, %v1829_v20  ;;  %v1902_v4 = vmul.f32 %v5609_v42, %v1830_v47  ;;  %v6459_v59 = vld [vmem:[#allocation81_spill] sm:$0xff] }
 0x472   : > { %v1695_v12 = vmul.f32 %v5607_v18, %v1623_v33  ;;  %v1696_v11 = vmul.f32 %v5607_v18, %v1624_v3  ;;  %v1697_v7 = vmul.f32 %v5697_v44, %v1625_v34  ;;  %v1698_v37 = vmul.f32 %v5697_v44, %v1626_v41  ;;  %v6458_v3 = vld [vmem:[#allocation50_spill] sm:$0xff] }
 0x473   : > { %v1988_v38 = vsel %vm1979_vm14, %v3307_v22, %v3312_v21  ;;  %v1989_v25 = vsel %vm1979_vm14, %v3308_v54, %v3313_v45  ;;  %v2000_v61 = vsel %vm1979_vm14, %v3312_v21, %v3307_v22  ;;  %v2001_v52 = vsel %vm1979_vm14, %v3313_v45, %v3308_v54  ;;  %v6460_v54 = vld [vmem:[#allocation25_spill] sm:$0xff] }
 0x474   : > { %v2035_v30 = vmul.f32 %v6456_v19, %v1988_v38  ;;  %v2036_v18 = vmul.f32 %v6457_v29, %v2000_v61  ;;  %v2037_v63 = vmul.f32 %v6456_v19, %v1989_v25  ;;  %v2038_v44 = vmul.f32 %v6457_v29, %v2001_v52  ;;  %v5805_v5 = vpop.permute.xlu1 %2084 }
 0x475   : > { %v5807_v39 = vadd.f32 %v1695_v12, %v1507_v28  ;;  %v5809_v6 = vadd.f32 %v1696_v11, %v1508_v23  ;;  %v5811_v55 = vadd.f32 %v1697_v7, %v1509_v8  ;;  %v5813_v62 = vadd.f32 %v1698_v37, %v1510_v50  ;;  %v2149_v37 = vld [vmem:[%s5940_s3 + $0x50] sm:$0xff] }
 0x476   : > { %v2107_v2 = vmul.f32 %v5713_v49, %v2035_v30  ;;  %v2108_v56 = vmul.f32 %v5713_v49, %v2036_v18  ;;  %v1717_v45 = vadd.f32 %v1693_v9, %v1505_v13  ;;  %v1718_v21 = vadd.f32 %v1694_v46, %v1506_v16 }
 0x477   : > { %v1924_v28 = vadd.f32 %v1900_v15, %v5709_v53  ;;  %v2109_v23 = vmul.f32 %v5633_v43, %v2037_v63  ;;  %v2110_v8 = vmul.f32 %v5633_v43, %v2038_v44  ;;  %v2150_v44 = vld [vmem:[%s5940_s3 + $0x58] sm:$0xff] }
 0x478   : > { %v2131_v26 = vadd.f32 %v2107_v2, %v1923_v36  ;;  %v1925_v57 = vadd.f32 %v1901_v40, %v1717_v45  ;;  %v1926_v0 = vadd.f32 %v1902_v4, %v1718_v21  ;;  %v2570_v2 = vld [vmem:[%s5944_s7] sm:$0xff]  ;;  %v2571_v21 = vld [vmem:[%s5944_s7 + $0x8] sm:$0xff]  ;;  %v2572_v36 = vld [vmem:[%s5944_s7 + $0x10] sm:$0xff] }
 0x479   : > { %v2194_v50 = vpop.permute.xlu1 %2193  ;;  %v2132_v32 = vadd.f32 %v2108_v56, %v1924_v28  ;;  %v2573_v56 = vld [vmem:[%s5944_s7 + $0x18] sm:$0xff] }
 0x47a   : > { %v2133_v49 = vadd.f32 %v2109_v23, %v1925_v57  ;;  %v2134_v58 = vadd.f32 %v2110_v8, %v1926_v0  ;;  %v2227_v27 = vadd.f32 %v2194_v50, %v2131_v26 }
 0x47b   : > { %v2228_v42 = vadd.f32 %v2194_v50, %v2132_v32 }
 0x47d   : > { %v2199_v20 = vpop.permute.xlu1 %2198 }
 0x47e   : > { %v2229_v13 = vadd.f32 %v2199_v20, %v2133_v49  ;;  %v2230_v16 = vadd.f32 %v2199_v20, %v2134_v58 }
 0x480   : > { %v2427_v9 = vpop.xlane.xlu0 %2426  ;;  %v2492_v48 = vpack.c.bf16 %v2230_v16, %v2228_v42  ;;  %v2491_v53 = vpack.c.bf16 %v2229_v13, %v2227_v27 }
 0x481   : > { %vm2437_vm0 = vcmp.ge.f32.partialorder %v5502_v17, %v2427_v9 }
 0x482   : > { %v2441_v46 = vsel %vm2437_vm0, -3e+38, %v5502_v17  ;;  %2501 = vmatprep.subr.bf16.mxu1 %v2492_v48 }
 0x483   : > { %v2445_v43 = vsel %vm2404_vm15, %v2441_v46, -inf  ;;  %2502 = vmatpush1.bf16.msra.mxu1 %v2491_v53 }
 0x484   : > { %2446 = vmax.xlane.f32.xlu0 %v2445_v43 }
 0x49b   : > { %v2433_v47 = vpop.xlane.xlu0 %2432 }
 0x49c   : > { %vm2439_vm3 = vcmp.ge.f32.partialorder %v5521_v35, %v2433_v47 }
 0x49d   : > { %v2443_v14 = vsel %vm2439_vm3, -3e+38, %v5521_v35 }
 0x49e   : > { %v2451_v51 = vsel %vm2404_vm15, %v2443_v14, -inf }
 0x49f   : > { %2452 = vmax.xlane.f32.xlu0 %v2451_v51  ;;  %v3319_v15 = vpop.permute.xlu0 %3318 }
 0x4a0   : > { %v3321_v26 = vunpack.i.h.bf16 %v3319_v15  ;;  %v3320_v32 = vunpack.i.l.bf16 %v3319_v15 }
 0x4af   : > { %v2430_v33 = vpop.xlane.xlu1 %2429 }
 0x4b0   : > { %vm2438_vm10 = vcmp.ge.f32.partialorder %v6458_v3, %v2430_v33 }
 0x4b1   : > { %v2442_v34 = vsel %vm2438_vm10, -3e+38, %v6458_v3 }
 0x4b2   : > { %v2448_v17 = vsel %vm2404_vm15, %v2442_v34, -inf }
 0x4b3   : > { %2449 = vmax.xlane.f32.xlu1 %v2448_v17  ;;  %v2436_v41 = vpop.xlane.xlu1 %2435  ;;  %v6462_v17 = vld [vmem:[#allocation65_spill] sm:$0xff] }
 0x4b4   : > { %vm2440_vm2 = vcmp.ge.f32.partialorder %v6459_v59, %v2436_v41 }
 0x4b5   : > { %3328 = vrot.lane.b32.xlu0 %v6460_v54, %s3374_s25  ;;  %v2444_v22 = vsel %vm2440_vm2, -3e+38, %v6459_v59 }
 0x4b6   : > { %v2454_v35 = vsel %vm2404_vm15, %v2444_v22, -inf }
 0x4b7   : > { %2455 = vmax.xlane.f32.xlu1 %v2454_v35  ;;  %v3324_v38 = vpop.permute.xlu1 %3323  ;;  %v6463_v35 = vld [vmem:[#allocation78_spill] sm:$0xff] }
 0x4b8   : > { %v3326_v8 = vunpack.i.h.bf16 %v3324_v38  ;;  %v3325_v50 = vunpack.i.l.bf16 %v3324_v38 }
 0x4ba   : > { %v1783_v20 = vsel %vm1771_vm4, %v3321_v26, %v3326_v8  ;;  %v1795_v27 = vsel %vm1771_vm4, %v3326_v8, %v3321_v26  ;;  %v1782_v42 = vsel %vm1771_vm4, %v3320_v32, %v3325_v50  ;;  %v1794_v13 = vsel %vm1771_vm4, %v3325_v50, %v3320_v32  ;;  %v6473_v26 = vld [vmem:[#allocation53_spill] sm:$0xff] }
 0x4bb   : > { %v1834_v43 = vmul.f32 %v6455_v31, %v1795_v27  ;;  %v1831_v47 = vmul.f32 %v6454_v24, %v1782_v42  ;;  %v319_v27 = vld [vmem:[%s3456_s14 + $0x60] sm:$0xff]  ;;  %v320_v42 = vld [vmem:[%s3456_s14 + $0x68] sm:$0xff] }
 0x4bd   : > { %v1903_v41 = vmul.f32 %v6462_v17, %v1831_v47  ;;  %v1906_v54 = vmul.f32 %v5749_v10, %v1834_v43 }
 0x4c8   : > { %3333 = vrot.lane.b32.xlu1 %v6461_v1, %s3374_s25 }
 0x511   : > { %v2447_v12 = vpop.xlane.xlu0 %2446 }
 0x512   : > { %vm2457_vm12 = vcmp.ge.f32.partialorder %v2441_v46, %v2447_v12 }
 0x513   : > { %v2461_v11 = vsel %vm2457_vm12, -3e+38, %v2441_v46  ;;  %v1833_v46 = vmul.f32 %v6454_v24, %v1783_v20 }
 0x514   : > { %v2465_v7 = vsel %vm2404_vm15, %v2461_v11, -inf }
 0x515   : > { %2466 = vmax.xlane.f32.xlu0 %v2465_v7  ;;  %v1905_v59 = vmul.f32 %v5749_v10, %v1833_v46  ;;  %v1930_v7 = vadd.f32 %v1906_v54, %v5813_v62  ;;  %v6464_v10 = vld [vmem:[#allocation46_spill] sm:$0xff] }
 0x517   : > { %v1929_v11 = vadd.f32 %v1905_v59, %v5811_v55 }
 0x52b   : > { %2203 = vperm.xlu0 %3315, %v2149_v37  }
 0x52c   : > { %v2453_v40 = vpop.xlane.xlu0 %2452 }
 0x52d   : > { %vm2459_vm9 = vcmp.ge.f32.partialorder %v2443_v14, %v2453_v40 }
 0x52e   : > { %v2463_v4 = vsel %vm2459_vm9, -3e+38, %v2443_v14  ;;  %v1832_v14 = vmul.f32 %v6455_v31, %v1794_v13  ;;  %v347_v13 = vunpack.c.l.bf16 %v319_v27 }
 0x52f   : > { %v2471_v45 = vsel %vm2404_vm15, %v2463_v4, -inf  ;;  %v6469_v4 = vld [vmem:[#allocation19_spill] sm:$0xff] }
 0x530   : > { %v3329_v23 = vpop.permute.xlu0 %3328  ;;  %v1904_v60 = vmul.f32 %v6462_v17, %v1832_v14 }
 0x531   : > { %v3331_v49 = vunpack.i.h.bf16 %v3329_v23  ;;  %v3330_v58 = vunpack.i.l.bf16 %v3329_v23  ;;  %v6471_v23 = vld [vmem:[#allocation69_spill] sm:$0xff] }
 0x532   : > { %v1928_v12 = vadd.f32 %v1904_v60, %v5809_v6  ;;  %v322_v60 = vld [vmem:[%s3456_s14 + $0x78] sm:$0xff] }
 0x533   : > { %v353_v54 = vunpack.c.l.bf16 %v322_v60 }
 0x540   : > { %v2450_v25 = vpop.xlane.xlu1 %2449 }
 0x541   : > { %vm2458_vm6 = vcmp.ge.f32.partialorder %v2442_v34, %v2450_v25 }
 0x542   : > { %v2462_v61 = vsel %vm2458_vm6, -3e+38, %v2442_v34 }
 0x543   : > { %v2468_v52 = vsel %vm2404_vm15, %v2462_v61, -inf }
 0x544   : > { %2469 = vmax.xlane.f32.xlu1 %v2468_v52  ;;  %v2456_v30 = vpop.xlane.xlu1 %2455  ;;  %v6465_v52 = vld [vmem:[#allocation39_spill] sm:$0xff] }
 0x545   : > { %vm2460_vm13 = vcmp.ge.f32.partialorder %v2444_v22, %v2456_v30 }
 0x546   : > { %v2464_v18 = vsel %vm2460_vm13, -3e+38, %v2444_v22 }
 0x547   : > { %v2474_v63 = vsel %vm2404_vm15, %v2464_v18, -inf }
 0x548   : > { %v3334_v28 = vpop.permute.xlu1 %3333 }
 0x549   : > { %v3336_v57 = vunpack.i.h.bf16 %v3334_v28  ;;  %v3335_v0 = vunpack.i.l.bf16 %v3334_v28 }
 0x54a   : > { %2475 = vmax.xlane.f32.xlu0 %v2474_v63 }
 0x54b   : > { %v1991_v16 = vsel %vm1979_vm14, %v3331_v49, %v3336_v57  ;;  %v2003_v9 = vsel %vm1979_vm14, %v3336_v57, %v3331_v49  ;;  %v1990_v48 = vsel %vm1979_vm14, %v3330_v58, %v3335_v0  ;;  %v2002_v53 = vsel %vm1979_vm14, %v3335_v0, %v3330_v58  ;;  %v6475_v57 = vld [vmem:[#allocation49_spill] sm:$0xff]  ;;  %v6476_v49 = vld [vmem:[#allocation38_spill] sm:$0xff] }
 0x54c   : > { %v2041_v51 = vmul.f32 %v6456_v19, %v1991_v16  ;;  %v2042_v33 = vmul.f32 %v6457_v29, %v2003_v9  ;;  %v2039_v3 = vmul.f32 %v6456_v19, %v1990_v48  ;;  %v2040_v34 = vmul.f32 %v6457_v29, %v2002_v53 }
 0x54d   : > { %v1927_v29 = vadd.f32 %v1903_v41, %v5807_v39  ;;  %v349_v16 = vunpack.c.l.bf16 %v320_v42  ;;  %v348_v48 = vunpack.c.h.bf16 %v319_v27  ;;  %v350_v53 = vunpack.c.h.bf16 %v320_v42  ;;  %v321_v41 = vld [vmem:[%s3456_s14 + $0x70] sm:$0xff] }
 0x54e   : > { %v2111_v24 = vmul.f32 %v5805_v5, %v2039_v3  ;;  %v2112_v31 = vmul.f32 %v5805_v5, %v2040_v34  ;;  %v2113_v1 = vmul.f32 %v6463_v35, %v2041_v51  ;;  %v2114_v15 = vmul.f32 %v6463_v35, %v2042_v33 }
 0x54f   : > { %v351_v59 = vunpack.c.l.bf16 %v321_v41 }
 0x550   : > { %v2135_v38 = vadd.f32 %v2111_v24, %v1927_v29  ;;  %v2136_v25 = vadd.f32 %v2112_v31, %v1928_v12  ;;  %v2137_v61 = vadd.f32 %v2113_v1, %v1929_v11  ;;  %v2138_v5 = vadd.f32 %v2114_v15, %v1930_v7 }
 0x551   : > { %v352_v24 = vunpack.c.h.bf16 %v321_v41  ;;  %v354_v31 = vunpack.c.h.bf16 %v322_v60 }
 0x555   : > { %2208 = vperm.xlu1 %3316, %v2150_v44  }
 0x560   : > { %2576 = vperm.xlu0 %3315, %v2570_v2  }
 0x564   : > { %2591 = vperm.xlu0 %3315, %v2573_v56   ;;  %v6468_v56 = vld [vmem:[#allocation60_spill] sm:$0xff] }
 0x579   : > { %2472 = vmax.xlane.f32.xlu1 %v2471_v45 }
 0x58a   : > { %2581 = vperm.xlu1 %3316, %v2571_v21  }
 0x58e   : > { %2586 = vperm.xlu1 %3316, %v2572_v36   ;;  %v6470_v36 = vmov 0  }
 0x5a2   : > { %v2467_v22 = vpop.xlane.xlu0 %2466 }
 0x5a3   : > { %vm2477_vm14 = vcmp.ge.f32.partialorder %v6465_v52, %v2467_v22 }
 0x5a4   : > { %vm2481_vm0 = vmand %vm2396_vm11, %vm2477_vm14 }
 0x5a5   : > { %v2485_v45 = vsel %vm2481_vm0, %v6469_v4, 0.0 }
 0x5aa   : > { %v2204_v37 = vpop.permute.xlu0 %2203 }
 0x5ab   : > { %v2231_v18 = vadd.f32 %v2204_v37, %v2135_v38  ;;  %v2232_v63 = vadd.f32 %v2204_v37, %v2136_v25  ;;  %v3338_v38 = vld [vmem:[%s5943_s6 + $0x8] sm:$0xff]  }
 0x5d1   : > { %v2470_v19 = vpop.xlane.xlu1 %2469 }
 0x5d2   : > { %vm2478_vm4 = vcmp.ge.f32.partialorder %v6464_v10, %v2470_v19  ;;  %v3337_v10 = vld [vmem:[%s5943_s6] sm:$0xff]  }
 0x5d3   : > { %vm2482_vm7 = vmand %vm2397_vm8, %vm2478_vm4 }
 0x5d4   : > { %v2486_v40 = vsel %vm2482_vm7, %v6468_v56, 0.0 }
 0x5d5   : > { %v2209_v30 = vpop.permute.xlu1 %2208  ;;  %v2489_v21 = vpack.c.bf16 %v2486_v40, %v2485_v45 }
 0x5d6   : > { %v2233_v39 = vadd.f32 %v2209_v30, %v2137_v61  ;;  %v2234_v6 = vadd.f32 %v2209_v30, %v2138_v5 }
 0x5d7   : > { %v2476_v28 = vpop.xlane.xlu0 %2475 }
 0x5d8   : > { %v2493_v62 = vpack.c.bf16 %v2233_v39, %v2231_v18  ;;  %v2494_v2 = vpack.c.bf16 %v2234_v6, %v2232_v63  ;;  %vm2480_vm8 = vcmp.ge.f32.partialorder %v6471_v23, %v2476_v28 }
 0x5d9   : > { %vm2484_vm11 = vmand %vm2399_vm5, %vm2480_vm8 }
 0x5da   : > { %2503 = vmatprep.subr.bf16.mxu1 %v2494_v2  ;;  %v2488_v0 = vsel %vm2484_vm11, %v6475_v57, 0.0 }
 0x5db   : > { %2504 = vmatpush1.bf16.msra.mxu1 %v2493_v62 }
 0x5de   : > { %2744 = vmatmul.mubr.msk.bf16.vlgmr.msra.gmra.mrb[0].mxu1 %vm2404_vm15, %v2489_v21 }
 0x5df   : > { %2543 = vmatprep.mubr.bf16.mxu1 %v6470_v36  ;;  %v2577_v25 = vpop.permute.xlu0 %2576 }
 0x5e3   : > { %v2592_v40 = vpop.permute.xlu0 %2591 }
 0x606   : > { %v2473_v50 = vpop.xlane.xlu1 %2472 }
 0x607   : > { %vm2479_vm3 = vcmp.ge.f32.partialorder %v6473_v26, %v2473_v50 }
 0x608   : > { %vm2483_vm10 = vmand %vm2398_vm1, %vm2479_vm3 }
 0x609   : > { %v2487_v58 = vsel %vm2483_vm10, %v6476_v49, 0.0 }
 0x60a   : > { %v2490_v20 = vpack.c.bf16 %v2488_v0, %v2487_v58  ;;  %v2582_v30 = vpop.permute.xlu1 %2581 }
 0x60c   : > { %2745 = vmatmul.mubr.msk.bf16.gmra.mrb[4].mxu1 %vm2404_vm15, %v2490_v20 }
 0x60d   : > { %2642 = vmatprep.mubr.bf16.mxu1 %v6470_v36 }
 0x60e   : > { %v2587_v55 = vpop.permute.xlu1 %2586 }
 0x6b1   : > { %v2535_v9 = vpop.f32.mrb[0].mxu1 }
 0x6b2   : > { %v2537_v46 = vpop.f32.mrb[1].mxu1  ;;  %v2554_v47 = vmul.f32 %v2535_v9, %v347_v13 }
 0x6b3   : > { %v2539_v43 = vpop.f32.mrb[2].mxu1  ;;  %v2555_v33 = vmul.f32 %v2537_v46, %v348_v48 }
 0x6b4   : > { %v2556_v14 = vmul.f32 %v2539_v43, %v349_v16  ;;  %v2541_v51 = vpop.f32.mrb[3].mxu1 }
 0x6b5   : > { %v2557_v3 = vmul.f32 %v2541_v51, %v350_v53 }
 0x6b6   : > { %v2566_v34 = vpack.c.bf16 %v2556_v14, %v2554_v47 }
 0x6b7   : > { %v2567_v17 = vpack.c.bf16 %v2557_v3, %v2555_v33 }
 0x6b9   : > { %2610 = vmatprep.subr.bf16.mxu1 %v2567_v17 }
 0x6ba   : > { %2611 = vmatpush1.bf16.msra.mxu1 %v2566_v34 }
 0x6df   : > { %v2545_v22 = vpop.f32.mrb[4].mxu1 }
 0x6e0   : > { %v2547_v35 = vpop.f32.mrb[5].mxu1  ;;  %v2558_v15 = vmul.f32 %v2545_v22, %v351_v59 }
 0x6e1   : > { %v2549_v1 = vpop.f32.mrb[6].mxu1  ;;  %v2559_v12 = vmul.f32 %v2547_v35, %v352_v24 }
 0x6e2   : > { %v2560_v19 = vmul.f32 %v2549_v1, %v353_v54  ;;  %v2551_v29 = vpop.f32.mrb[7].mxu1 }
 0x6e3   : > { %v2561_v11 = vmul.f32 %v2551_v29, %v354_v31 }
 0x6e4   : > { %v2568_v7 = vpack.c.bf16 %v2560_v19, %v2558_v15 }
 0x6e5   : > { %v2569_v37 = vpack.c.bf16 %v2561_v11, %v2559_v12 }
 0x6e7   : > { %2612 = vmatprep.subr.bf16.mxu1 %v2569_v37 }
 0x6e8   : > { %2613 = vmatpush1.bf16.msra.mxu1 %v2568_v7 }
 0x6eb   : > { %2748 = vmatmul.mubr.msk.bf16.vlgmr.msra.gmra.mrb[8].mxu1 %vm2404_vm15, %v3337_v10 }
 0x6ec   : > { %2652 = vmatprep.mubr.bf16.mxu1 %v6470_v36 }
 0x6f3   : > { %2749 = vmatmul.mubr.msk.bf16.gmra.mrb[12].mxu1 %vm2404_vm15, %v3338_v38 }
 0x7be   : > { %v2644_v61 = vpop.f32.mrb[8].mxu1 }
 0x7bf   : > { %v2645_v5 = vadd.f32 %v2644_v61, %v2577_v25  ;;  %v2646_v52 = vpop.f32.mrb[9].mxu1 }
 0x7c0   : > { %v2647_v18 = vadd.f32 %v2646_v52, %v2577_v25  ;;  %v2648_v63 = vpop.f32.mrb[10].mxu1 }
 0x7c1   : > { %2663 = vst [vmem:[%s305_s29] sm:$0xff] %v2645_v5  ;;  %v2649_v44 = vadd.f32 %v2648_v63, %v2582_v30  ;;  %v2650_v39 = vpop.f32.mrb[11].mxu1 }
 0x7c2   : > { %2664 = vst [vmem:[%s305_s29 + $0x8] sm:$0xff] %v2647_v18  ;;  %v2651_v6 = vadd.f32 %v2650_v39, %v2582_v30 }
 0x7c3   : > { %2665 = vst [vmem:[%s305_s29 + $0x10] sm:$0xff] %v2649_v44 }
 0x7c4   : > { %2666 = vst [vmem:[%s305_s29 + $0x18] sm:$0xff] %v2651_v6 }
 0x7c6   : > { %v2654_v62 = vpop.f32.mrb[12].mxu1 }
 0x7c7   : > { %v2655_v2 = vadd.f32 %v2654_v62, %v2587_v55  ;;  %v2656_v56 = vpop.f32.mrb[13].mxu1 }
 0x7c8   : > { %v2657_v4 = vadd.f32 %v2656_v56, %v2587_v55  ;;  %v2658_v45 = vpop.f32.mrb[14].mxu1 }
 0x7c9   : > { %2667 = vst [vmem:[%s305_s29 + $0x20] sm:$0xff] %v2655_v2  ;;  %v2659_v21 = vadd.f32 %v2658_v45, %v2592_v40  ;;  %v2660_v36 = vpop.f32.mrb[15].mxu1 }
 0x7ca   : > { %2668 = vst [vmem:[%s305_s29 + $0x28] sm:$0xff] %v2657_v4  ;;  %v2661_v28 = vadd.f32 %v2660_v36, %v2592_v40 }
 0x7cb   : > { %2669 = vst [vmem:[%s305_s29 + $0x30] sm:$0xff] %v2659_v21 }
 0x7cc   : > { %2670 = vst [vmem:[%s305_s29 + $0x38] sm:$0xff] %v2661_v28 }
 0x7cd PF: > { %s18_s27 = sadd.s32 1, %s3362_s27  }
 0x7ce   : > { %p15_p4 = scmp.ge.s32.totalorder %s18_s27, 4  }
 0x7d0   :  { %17 = sbr.rel (!%p15_p4) target bundleno = 1 (0x1), region = 83 }

</bundles_post_ra>
